<compile_context>
chip_gen: v5e
topology: v5e:2x2
jax: 0.10.0
libtpu: 0.0.40
codegen_flags: <defaults>
</compile_context>

<pallas_src>
import numpy as np
import jax
import jax.numpy as jnp
from jax.experimental import pallas as pl
from jax.experimental.pallas import tpu as pltpu


# ----------------------------------------------------------------------------
# Fused kernel factory.
# ----------------------------------------------------------------------------
def make_dit_block_kernel(L, D, num_heads, slice_size, mlp_hidden):
    H = num_heads
    Dh = D // H
    S = slice_size
    J = L // S
    f32 = jnp.float32
    bf16 = jnp.bfloat16

    def _ln(v, eps=1e-6):
        mu = jnp.mean(v, axis=-1, keepdims=True)
        d = v - mu
        var = jnp.mean(d * d, axis=-1, keepdims=True)
        return d * jax.lax.rsqrt(var + eps)

    def _softmax(a, approx):
        m = jnp.max(a, axis=-1, keepdims=True)
        e = jnp.exp(a - m)
        s = jnp.sum(e, axis=-1, keepdims=True)
        if approx:
            return e * pl.reciprocal(s, approx=True)   # EUP slot, off the VALU
        return e / s

    def _gelu_tanh(v):
        return 0.5 * v * (1.0 + jnp.tanh(0.7978845608028654 * (v + 0.044715 * v * v * v)))

    def kernel(x_ref, mod_ref, mod2_ref,
               wq_ref, wk_ref, wv_ref, bq_ref, bk_ref, bv_ref,
               w_proj_ref, b_proj_ref,
               wnq_ref, wnk_ref, wnv_ref, w_nproj_ref, b_nproj_ref,
               w1a_ref, w1b_ref, b1_ref, w2_ref, b2_ref,
               o_ref):
        x = x_ref[...]          # (L, D) f32
        mod = mod_ref[...]      # (7, D) f32  -- row-indexed adaLN terms (sublane slices)
        mod2 = mod2_ref[...]    # (4, D) f32

        shift_msa = mod[0:1, :]
        scale_msa = mod[1:2, :]
        gate_msa = mod[2:3, :]
        gate_mlp = mod[3:4, :]
        shift_nat = mod[4:5, :]
        scale_nat = mod[5:6, :]
        gate_nat = mod[6:7, :]
        shift_mlp1 = mod2[0:1, :]   # first / second halves of the 2D-wide shift_mlp
        shift_mlp2 = mod2[1:2, :]
        scale_mlp1 = mod2[2:3, :]
        scale_mlp2 = mod2[3:4, :]

        # --- norm4 ---
        x0 = _ln(x)                                   # (L, D) f32
        x0_bf = x0.astype(bf16)

        # --- local_nat: single-head attention inside each of the S contiguous slices ---
        # Reshape-only slice split (sublane-contiguous) -- no relayout copies.
        qn = jnp.dot(x0_bf, wnq_ref[...], preferred_element_type=f32).astype(bf16).reshape(S, J, D)
        kn = jnp.dot(x0_bf, wnk_ref[...], preferred_element_type=f32).astype(bf16).reshape(S, J, D)
        vn = jnp.dot(x0_bf, wnv_ref[...], preferred_element_type=f32).astype(bf16).reshape(S, J, D)
        sn = jnp.einsum('sjd,skd->sjk', qn, kn, preferred_element_type=f32) * (D ** -0.5)
        pn = _softmax(sn, approx=True)
        on = jnp.einsum('sjk,skd->sjd', pn.astype(bf16), vn, preferred_element_type=f32)
        on2 = on.reshape(L, D).astype(bf16)
        x1p = jnp.dot(on2, w_nproj_ref[...], preferred_element_type=f32) + b_nproj_ref[...]
        x1 = x0 + gate_nat * (_ln(x1p) * (1.0 + scale_nat) + shift_nat)

        # --- multi-head self-attention (batched over heads, single relayout per tensor) ---
        xm = (_ln(x0) * (1.0 + scale_msa) + shift_msa).astype(bf16)
        qf = jnp.dot(xm, wq_ref[...], preferred_element_type=f32) + bq_ref[...]
        kf = jnp.dot(xm, wk_ref[...], preferred_element_type=f32) + bk_ref[...]
        vf = jnp.dot(xm, wv_ref[...], preferred_element_type=f32) + bv_ref[...]
        qh = jnp.transpose(qf.reshape(L, H, Dh), (1, 0, 2)).astype(bf16)   # (H, L, Dh)
        kh = jnp.transpose(kf.reshape(L, H, Dh), (1, 0, 2)).astype(bf16)
        vh = jnp.transpose(vf.reshape(L, H, Dh), (1, 0, 2)).astype(bf16)
        sm = jnp.einsum('hqd,hkd->hqk', qh, kh, preferred_element_type=f32) * (Dh ** -0.5)
        pm = _softmax(sm, approx=False)          # exact divide: wide-range global logits
        om = jnp.einsum('hqk,hkd->hqd', pm.astype(bf16), vh, preferred_element_type=f32)
        om2 = jnp.transpose(om, (1, 0, 2)).reshape(L, D).astype(bf16)       # (L, D)
        o = jnp.dot(om2, w_proj_ref[...], preferred_element_type=f32) + b_proj_ref[...]
        x2 = x0 + gate_msa * o

        # --- norm3 of concat([x1, x2], -1) WITHOUT materializing the (L, 2D) concat ---
        mu = (jnp.sum(x1, axis=-1, keepdims=True)
              + jnp.sum(x2, axis=-1, keepdims=True)) / (2 * D)
        d1 = x1 - mu
        d2 = x2 - mu
        var = (jnp.sum(d1 * d1, axis=-1, keepdims=True)
               + jnp.sum(d2 * d2, axis=-1, keepdims=True)) / (2 * D)
        inv = jax.lax.rsqrt(var + 1e-6)
        x1m = d1 * inv * (1.0 + scale_mlp1) + shift_mlp1
        x2m = d2 * inv * (1.0 + scale_mlp2) + shift_mlp2

        # --- MLP: w1 split into two K=D matmuls accumulating into one (L, mlp_hidden) tile ---
        hh = (jnp.dot(x1m.astype(bf16), w1a_ref[...], preferred_element_type=f32)
              + jnp.dot(x2m.astype(bf16), w1b_ref[...], preferred_element_type=f32)
              + b1_ref[...])
        hh = _gelu_tanh(hh)
        y = jnp.dot(hh.astype(bf16), w2_ref[...], preferred_element_type=f32) + b2_ref[...]

        o_ref[...] = x0 + gate_mlp * y

    return kernel


# ----------------------------------------------------------------------------
# Wrapper: host-side adaLN + weight prep, then the fused pallas_call over the batch.
# ----------------------------------------------------------------------------
def dit_block_forward(x, c, params, *, num_heads, slice_size):
    B, L, D = x.shape
    mlp_hidden = params['w1'].shape[1]
    H = num_heads
    S = slice_size
    J = L // S
    f32, bf16 = jnp.float32, jnp.bfloat16

    # adaLN modulation outside the kernel: one batched matmul over the whole batch,
    # keeping only the columns that are consumed (mod cols 3D:5D and mod2 cols 4D: are dead).
    # Reshaped to (B, 7, D) / (B, 4, D) so the kernel row-indexes (sublane slices).
    silu_c = (c * jax.nn.sigmoid(c)).astype(f32)
    w_ada_u = jnp.concatenate([params['w_ada'][:, :3 * D], params['w_ada'][:, 5 * D:]], axis=1)
    b_ada_u = jnp.concatenate([params['b_ada'][:, :3 * D], params['b_ada'][:, 5 * D:]], axis=1)
    mod = (silu_c @ w_ada_u + b_ada_u).astype(f32).reshape(B, 7, D)
    mod2 = (silu_c @ params['w_ada2'][:, :4 * D]
            + params['b_ada2'][:, :4 * D]).astype(f32).reshape(B, 4, D)

    # bf16 matmul weights (native MXU path); f32 biases added after f32 accumulation.
    # qkv weights split host-side -> three K=D matmuls, no (L, 3D) intermediate.
    wq = params['w_qkv'][:, 0 * D:1 * D].astype(bf16)
    wk = params['w_qkv'][:, 1 * D:2 * D].astype(bf16)
    wv = params['w_qkv'][:, 2 * D:3 * D].astype(bf16)
    bq = params['b_qkv'][:, 0 * D:1 * D].astype(f32)
    bk = params['b_qkv'][:, 1 * D:2 * D].astype(f32)
    bv = params['b_qkv'][:, 2 * D:3 * D].astype(f32)
    w_proj = params['w_proj'].astype(bf16)
    b_proj = params['b_proj'].astype(f32)
    wnq = params['w_nqkv'][:, 0 * D:1 * D].astype(bf16)     # local_nat qkv has no bias
    wnk = params['w_nqkv'][:, 1 * D:2 * D].astype(bf16)
    wnv = params['w_nqkv'][:, 2 * D:3 * D].astype(bf16)
    w_nproj = params['w_nproj'].astype(bf16)
    b_nproj = params['b_nproj'].astype(f32)
    w1a = params['w1'][:D, :].astype(bf16)    # rows multiplying the x1 half of the concat
    w1b = params['w1'][D:, :].astype(bf16)    # rows multiplying the x2 half
    b1 = params['b1'].astype(f32)
    w2 = params['w2'].astype(bf16)
    b2 = params['b2'].astype(f32)
    weights = [wq, wk, wv, bq, bk, bv, w_proj, b_proj,
               wnq, wnk, wnv, w_nproj, b_nproj,
               w1a, w1b, b1, w2, b2]

    kernel = make_dit_block_kernel(L, D, H, S, mlp_hidden)

    in_specs = [
        pl.BlockSpec((None, L, D), lambda b: (b, 0, 0)),    # x : one batch row, (L, D) in-kernel
        pl.BlockSpec((None, 7, D), lambda b: (b, 0, 0)),    # mod  (row-indexed adaLN terms)
        pl.BlockSpec((None, 4, D), lambda b: (b, 0, 0)),    # mod2 (shift/scale_mlp halves)
    ]
    # Weights: full blocks with constant index maps -> fetched once, VMEM-resident across B.
    # TODO(synk): at production scale set pipeline_mode=pl.Buffered(1) on these (constant index
    #             maps => no pipelining needed) and add L / mlp_hidden tiling for v7x's 64 MiB.
    for w in weights:
        in_specs.append(pl.BlockSpec(w.shape, lambda b: (0, 0)))

    out_specs = pl.BlockSpec((None, L, D), lambda b: (b, 0, 0))

    # Advisory cost estimate so XLA schedules around the fused call.
    mm_flops = (2 * L * D * 3 * D) * 2                      # msa + nat qkv projections
    mm_flops += 4 * L * L * D                               # msa scores + PV (all heads)
    mm_flops += 4 * L * J * D                               # nat scores + PV (all slices)
    mm_flops += 2 * 2 * L * D * D                           # two output projections
    mm_flops += 2 * L * (2 * D) * mlp_hidden + 2 * L * mlp_hidden * D   # MLP
    flops = B * mm_flops
    transcendentals = B * (H * L * L + S * J * J + L * mlp_hidden + 8 * L)
    bytes_accessed = (B * L * D * 4            # x read
                      + B * L * D * 4          # output writeback
                      + B * 11 * D * 4         # mod (7D) + mod2 (4D) reads
                      + sum(int(np.prod(w.shape)) * int(w.dtype.itemsize) for w in weights))
    cost = pl.CostEstimate(flops=int(flops), transcendentals=int(transcendentals),
                           bytes_accessed=int(bytes_accessed))

    return pl.pallas_call(
        kernel,
        out_shape=jax.ShapeDtypeStruct((B, L, D), f32),
        grid=(B,),
        in_specs=in_specs,
        out_specs=out_specs,
        compiler_params=pltpu.CompilerParams(
            dimension_semantics=("parallel",),
            vmem_limit_bytes=64 * 1024 * 1024),
        cost_estimate=cost,
    )(x.astype(f32), mod, mod2, *weights)


# ----------------------------------------------------------------------------
# Pure-JAX f32 reference (same math as the PyTorch module) for a correctness check.
# ----------------------------------------------------------------------------
def ref_forward(x, c, p, *, num_heads, slice_size):
    B, L, D = x.shape
    H, Dh, S, J = num_heads, D // num_heads, slice_size, L // slice_size

    def ln(v, eps=1e-6):
        mu = jnp.mean(v, -1, keepdims=True)
        d = v - mu
        var = jnp.mean(d * d, -1, keepdims=True)
        return d * jax.lax.rsqrt(var + eps)

    silu_c = c * jax.nn.sigmoid(c)
    mod = silu_c @ p['w_ada'] + p['b_ada']
    (shift_msa, scale_msa, gate_msa, _sm, _scm, gate_mlp,
     shift_nat, scale_nat, gate_nat) = jnp.split(mod, 9, axis=1)
    mod2 = silu_c @ p['w_ada2'] + p['b_ada2']
    shift_mlp, scale_mlp, _ = jnp.split(mod2, 3, axis=1)

    x0 = ln(x)

    xs = x0.reshape(B * S, J, D)
    qkvn = jnp.einsum('bjd,de->bje', xs, p['w_nqkv'])
    qn, kn, vn = qkvn[..., :D], qkvn[..., D:2 * D], qkvn[..., 2 * D:]
    a = jax.nn.softmax(jnp.einsum('bqd,bkd->bqk', qn, kn) * (D ** -0.5), axis=-1)
    on = jnp.einsum('bqk,bkd->bqd', a, vn)
    on = jnp.einsum('bjd,de->bje', on, p['w_nproj']) + p['b_nproj']
    x1 = on.reshape(B, L, D)
    x1 = x0 + gate_nat[:, None, :] * (ln(x1) * (1 + scale_nat[:, None, :]) + shift_nat[:, None, :])

    xm = ln(x0) * (1 + scale_msa[:, None, :]) + shift_msa[:, None, :]
    qkv = jnp.einsum('bld,de->ble', xm, p['w_qkv']) + p['b_qkv']
    q = qkv[..., :D].reshape(B, L, H, Dh)
    k = qkv[..., D:2 * D].reshape(B, L, H, Dh)
    v = qkv[..., 2 * D:].reshape(B, L, H, Dh)
    a = jax.nn.softmax(jnp.einsum('bqhd,bkhd->bhqk', q, k) * (Dh ** -0.5), axis=-1)
    o = jnp.einsum('bhqk,bkhd->bqhd', a, v).reshape(B, L, D)
    o = jnp.einsum('bld,de->ble', o, p['w_proj']) + p['b_proj']
    x2 = x0 + gate_msa[:, None, :] * o

    xc = jnp.concatenate([x1, x2], axis=-1)
    xc = ln(xc) * (1 + scale_mlp[:, None, :]) + shift_mlp[:, None, :]
    h = jnp.einsum('ble,ef->blf', xc, p['w1']) + p['b1']
    h = 0.5 * h * (1 + jnp.tanh(0.7978845608028654 * (h + 0.044715 * h ** 3)))
    y = jnp.einsum('blf,fd->bld', h, p['w2']) + p['b2']
    return x0 + gate_mlp[:, None, :] * y


# ----------------------------------------------------------------------------
if __name__ == "__main__":
    B = 2
    D = 32            # hidden_size
    L = 16            # sequence length (slice_size * 8 -> slices are sublane-aligned)
    num_heads = 4
    mlp_ratio = 2.0
    slice_size = 2
    mlp_hidden = int(D * mlp_ratio)

    key = jax.random.PRNGKey(0)
    keys = jax.random.split(key, 20)

    def nrm(k, shape, scale=0.02):
        return (scale * jax.random.normal(k, shape)).astype(jnp.float32)

    params = {
        'w_ada':  nrm(keys[0],  (D, 9 * D)),  'b_ada':  nrm(keys[1],  (1, 9 * D)),
        'w_ada2': nrm(keys[2],  (D, 6 * D)),  'b_ada2': nrm(keys[3],  (1, 6 * D)),
        'w_qkv':  nrm(keys[4],  (D, 3 * D)),  'b_qkv':  nrm(keys[5],  (1, 3 * D)),
        'w_proj': nrm(keys[6],  (D, D)),      'b_proj': nrm(keys[7],  (1, D)),
        'w_nqkv': nrm(keys[8],  (D, 3 * D)),                    # local_nat qkv has no bias
        'w_nproj': nrm(keys[9], (D, D)),      'b_nproj': nrm(keys[10], (1, D)),
        'w1':     nrm(keys[11], (2 * D, mlp_hidden)), 'b1': nrm(keys[12], (1, mlp_hidden)),
        'w2':     nrm(keys[13], (mlp_hidden, D)),     'b2': nrm(keys[14], (1, D)),
    }

    x = jax.random.normal(keys[15], (B, L, D), dtype=jnp.float32)
    c = jax.random.normal(keys[16], (B, D), dtype=jnp.float32)

    out = dit_block_forward(x, c, params, num_heads=num_heads, slice_size=slice_size)
    out = jax.block_until_ready(out)

    ref = jax.block_until_ready(
        ref_forward(x, c, params, num_heads=num_heads, slice_size=slice_size))

    assert out.shape == (B, L, D), out.shape
    np.testing.assert_allclose(np.asarray(out), np.asarray(ref), atol=1e-2, rtol=1e-2)

    print("KERNEL_OK")
</pallas_src>

<mosaic_0001>
module attributes {stable_mosaic.version = 11 : i64} {
  func.func @kernel(%arg0: i32, %arg1: memref<1x16x32xf32, #tpu.memory_space<vmem>>, %arg2: memref<1x7x32xf32, #tpu.memory_space<vmem>>, %arg3: memref<1x4x32xf32, #tpu.memory_space<vmem>>, %arg4: memref<32x32xbf16, #tpu.memory_space<vmem>>, %arg5: memref<32x32xbf16, #tpu.memory_space<vmem>>, %arg6: memref<32x32xbf16, #tpu.memory_space<vmem>>, %arg7: memref<1x32xf32, #tpu.memory_space<vmem>>, %arg8: memref<1x32xf32, #tpu.memory_space<vmem>>, %arg9: memref<1x32xf32, #tpu.memory_space<vmem>>, %arg10: memref<32x32xbf16, #tpu.memory_space<vmem>>, %arg11: memref<1x32xf32, #tpu.memory_space<vmem>>, %arg12: memref<32x32xbf16, #tpu.memory_space<vmem>>, %arg13: memref<32x32xbf16, #tpu.memory_space<vmem>>, %arg14: memref<32x32xbf16, #tpu.memory_space<vmem>>, %arg15: memref<32x32xbf16, #tpu.memory_space<vmem>>, %arg16: memref<1x32xf32, #tpu.memory_space<vmem>>, %arg17: memref<32x64xbf16, #tpu.memory_space<vmem>>, %arg18: memref<32x64xbf16, #tpu.memory_space<vmem>>, %arg19: memref<1x64xf32, #tpu.memory_space<vmem>>, %arg20: memref<64x32xbf16, #tpu.memory_space<vmem>>, %arg21: memref<1x32xf32, #tpu.memory_space<vmem>>, %arg22: memref<1x16x32xf32, #tpu.memory_space<vmem>>) attributes {dimension_semantics = [#tpu.dimension_semantics<parallel>], iteration_bounds = array<i64: 2>, scalar_prefetch = 0 : i64, scratch_operands = 0 : i64, tpu.core_type = #tpu.core_type<tc>, window_params = [{transform_indices = @transform_0, window_bounds = array<i64: 1, 16, 32>}, {transform_indices = @transform_1, window_bounds = array<i64: 1, 7, 32>}, {transform_indices = @transform_2, window_bounds = array<i64: 1, 4, 32>}, {pipeline_mode = #tpu.pipeline_mode<synchronous>, transform_indices = @transform_3, window_bounds = array<i64: 32, 32>}, {pipeline_mode = #tpu.pipeline_mode<synchronous>, transform_indices = @transform_4, window_bounds = array<i64: 32, 32>}, {pipeline_mode = #tpu.pipeline_mode<synchronous>, transform_indices = @transform_5, window_bounds = array<i64: 32, 32>}, {pipeline_mode = #tpu.pipeline_mode<synchronous>, transform_indices = @transform_6, window_bounds = array<i64: 1, 32>}, {pipeline_mode = #tpu.pipeline_mode<synchronous>, transform_indices = @transform_7, window_bounds = array<i64: 1, 32>}, {pipeline_mode = #tpu.pipeline_mode<synchronous>, transform_indices = @transform_8, window_bounds = array<i64: 1, 32>}, {pipeline_mode = #tpu.pipeline_mode<synchronous>, transform_indices = @transform_9, window_bounds = array<i64: 32, 32>}, {pipeline_mode = #tpu.pipeline_mode<synchronous>, transform_indices = @transform_10, window_bounds = array<i64: 1, 32>}, {pipeline_mode = #tpu.pipeline_mode<synchronous>, transform_indices = @transform_11, window_bounds = array<i64: 32, 32>}, {pipeline_mode = #tpu.pipeline_mode<synchronous>, transform_indices = @transform_12, window_bounds = array<i64: 32, 32>}, {pipeline_mode = #tpu.pipeline_mode<synchronous>, transform_indices = @transform_13, window_bounds = array<i64: 32, 32>}, {pipeline_mode = #tpu.pipeline_mode<synchronous>, transform_indices = @transform_14, window_bounds = array<i64: 32, 32>}, {pipeline_mode = #tpu.pipeline_mode<synchronous>, transform_indices = @transform_15, window_bounds = array<i64: 1, 32>}, {pipeline_mode = #tpu.pipeline_mode<synchronous>, transform_indices = @transform_16, window_bounds = array<i64: 32, 64>}, {pipeline_mode = #tpu.pipeline_mode<synchronous>, transform_indices = @transform_17, window_bounds = array<i64: 32, 64>}, {pipeline_mode = #tpu.pipeline_mode<synchronous>, transform_indices = @transform_18, window_bounds = array<i64: 1, 64>}, {pipeline_mode = #tpu.pipeline_mode<synchronous>, transform_indices = @transform_19, window_bounds = array<i64: 64, 32>}, {pipeline_mode = #tpu.pipeline_mode<synchronous>, transform_indices = @transform_20, window_bounds = array<i64: 1, 32>}, {transform_indices = @transform_21, window_bounds = array<i64: 1, 16, 32>}]} {
    %c0 = arith.constant 0 : index
    %c0_0 = arith.constant 0 : index
    %c0_1 = arith.constant 0 : index
    %0 = vector.load %arg1[%c0, %c0_0, %c0_1] : memref<1x16x32xf32, #tpu.memory_space<vmem>>, vector<1x16x32xf32>
    %1 = vector.shape_cast %0 : vector<1x16x32xf32> to vector<16x32xf32>
    %c0_2 = arith.constant 0 : index
    %c0_3 = arith.constant 0 : index
    %c0_4 = arith.constant 0 : index
    %2 = vector.load %arg2[%c0_2, %c0_3, %c0_4] : memref<1x7x32xf32, #tpu.memory_space<vmem>>, vector<1x7x32xf32>
    %3 = vector.shape_cast %2 : vector<1x7x32xf32> to vector<7x32xf32>
    %c0_5 = arith.constant 0 : index
    %c0_6 = arith.constant 0 : index
    %c0_7 = arith.constant 0 : index
    %4 = vector.load %arg3[%c0_5, %c0_6, %c0_7] : memref<1x4x32xf32, #tpu.memory_space<vmem>>, vector<1x4x32xf32>
    %5 = vector.shape_cast %4 : vector<1x4x32xf32> to vector<4x32xf32>
    %6 = vector.extract_strided_slice %3 {offsets = [0, 0], sizes = [1, 32], strides = [1, 1]} : vector<7x32xf32> to vector<1x32xf32>
    %7 = vector.extract_strided_slice %3 {offsets = [1, 0], sizes = [1, 32], strides = [1, 1]} : vector<7x32xf32> to vector<1x32xf32>
    %8 = vector.extract_strided_slice %3 {offsets = [2, 0], sizes = [1, 32], strides = [1, 1]} : vector<7x32xf32> to vector<1x32xf32>
    %9 = vector.extract_strided_slice %3 {offsets = [3, 0], sizes = [1, 32], strides = [1, 1]} : vector<7x32xf32> to vector<1x32xf32>
    %10 = vector.extract_strided_slice %3 {offsets = [4, 0], sizes = [1, 32], strides = [1, 1]} : vector<7x32xf32> to vector<1x32xf32>
    %11 = vector.extract_strided_slice %3 {offsets = [5, 0], sizes = [1, 32], strides = [1, 1]} : vector<7x32xf32> to vector<1x32xf32>
    %12 = vector.extract_strided_slice %3 {offsets = [6, 0], sizes = [1, 32], strides = [1, 1]} : vector<7x32xf32> to vector<1x32xf32>
    %13 = vector.extract_strided_slice %5 {offsets = [0, 0], sizes = [1, 32], strides = [1, 1]} : vector<4x32xf32> to vector<1x32xf32>
    %14 = vector.extract_strided_slice %5 {offsets = [1, 0], sizes = [1, 32], strides = [1, 1]} : vector<4x32xf32> to vector<1x32xf32>
    %15 = vector.extract_strided_slice %5 {offsets = [2, 0], sizes = [1, 32], strides = [1, 1]} : vector<4x32xf32> to vector<1x32xf32>
    %16 = vector.extract_strided_slice %5 {offsets = [3, 0], sizes = [1, 32], strides = [1, 1]} : vector<4x32xf32> to vector<1x32xf32>
    %cst = arith.constant dense<0.000000e+00> : vector<16xf32>
    %17 = vector.multi_reduction <add>, %1, %cst [1] : vector<16x32xf32> to vector<16xf32>
    %18 = vector.shape_cast %17 : vector<16xf32> to vector<16x1xf32>
    %cst_8 = arith.constant 3.200000e+01 : f32
    %19 = vector.broadcast %cst_8 : f32 to vector<16x1xf32>
    %20 = arith.divf %18, %19 : vector<16x1xf32>
    %21 = vector.broadcast %20 : vector<16x1xf32> to vector<16x32xf32>
    %22 = arith.subf %1, %21 : vector<16x32xf32>
    %23 = arith.mulf %22, %22 : vector<16x32xf32>
    %cst_9 = arith.constant dense<0.000000e+00> : vector<16xf32>
    %24 = vector.multi_reduction <add>, %23, %cst_9 [1] : vector<16x32xf32> to vector<16xf32>
    %25 = vector.shape_cast %24 : vector<16xf32> to vector<16x1xf32>
    %cst_10 = arith.constant 3.200000e+01 : f32
    %26 = vector.broadcast %cst_10 : f32 to vector<16x1xf32>
    %27 = arith.divf %25, %26 : vector<16x1xf32>
    %cst_11 = arith.constant 9.99999997E-7 : f32
    %28 = vector.broadcast %cst_11 : f32 to vector<16x1xf32>
    %29 = arith.addf %27, %28 : vector<16x1xf32>
    %30 = math.rsqrt %29 : vector<16x1xf32>
    %31 = vector.broadcast %30 : vector<16x1xf32> to vector<16x32xf32>
    %32 = arith.mulf %22, %31 : vector<16x32xf32>
    %33 = arith.truncf %32 : vector<16x32xf32> to vector<16x32xbf16>
    %c0_12 = arith.constant 0 : index
    %c0_13 = arith.constant 0 : index
    %34 = vector.load %arg12[%c0_12, %c0_13] : memref<32x32xbf16, #tpu.memory_space<vmem>>, vector<32x32xbf16>
    %cst_14 = arith.constant dense<0.000000e+00> : vector<16x32xf32>
    %35 = tpu.matmul %33, %34, %cst_14 {dimension_numbers = #tpu.dot_dimension_numbers<[1], [0], [0], [1], [0, 0, 1, 1], [], []>} : vector<16x32xbf16>, vector<32x32xbf16>, vector<16x32xf32> -> vector<16x32xf32>
    %36 = arith.truncf %35 : vector<16x32xf32> to vector<16x32xbf16>
    %37 = vector.shape_cast %36 : vector<16x32xbf16> to vector<2x8x32xbf16>
    %c0_15 = arith.constant 0 : index
    %c0_16 = arith.constant 0 : index
    %38 = vector.load %arg13[%c0_15, %c0_16] : memref<32x32xbf16, #tpu.memory_space<vmem>>, vector<32x32xbf16>
    %cst_17 = arith.constant dense<0.000000e+00> : vector<16x32xf32>
    %39 = tpu.matmul %33, %38, %cst_17 {dimension_numbers = #tpu.dot_dimension_numbers<[1], [0], [0], [1], [0, 0, 1, 1], [], []>} : vector<16x32xbf16>, vector<32x32xbf16>, vector<16x32xf32> -> vector<16x32xf32>
    %40 = arith.truncf %39 : vector<16x32xf32> to vector<16x32xbf16>
    %41 = vector.shape_cast %40 : vector<16x32xbf16> to vector<2x8x32xbf16>
    %c0_18 = arith.constant 0 : index
    %c0_19 = arith.constant 0 : index
    %42 = vector.load %arg14[%c0_18, %c0_19] : memref<32x32xbf16, #tpu.memory_space<vmem>>, vector<32x32xbf16>
    %cst_20 = arith.constant dense<0.000000e+00> : vector<16x32xf32>
    %43 = tpu.matmul %33, %42, %cst_20 {dimension_numbers = #tpu.dot_dimension_numbers<[1], [0], [0], [1], [0, 0, 1, 1], [], []>} : vector<16x32xbf16>, vector<32x32xbf16>, vector<16x32xf32> -> vector<16x32xf32>
    %44 = arith.truncf %43 : vector<16x32xf32> to vector<16x32xbf16>
    %45 = vector.shape_cast %44 : vector<16x32xbf16> to vector<2x8x32xbf16>
    "tpu.trace_start"() <{level = 10 : i32, message = "sjd,skd->sjk"}> : () -> ()
    %cst_21 = arith.constant dense<0.000000e+00> : vector<2x8x8xf32>
    %46 = tpu.matmul %37, %41, %cst_21 {dimension_numbers = #tpu.dot_dimension_numbers<[2], [2], [1], [1], [0, 0, 0, 1, 1, 1], [0], [0]>} : vector<2x8x32xbf16>, vector<2x8x32xbf16>, vector<2x8x8xf32> -> vector<2x8x8xf32>
    "tpu.trace_stop"() : () -> ()
    %cst_22 = arith.constant 0.176776692 : f32
    %47 = vector.broadcast %cst_22 : f32 to vector<2x8x8xf32>
    %48 = arith.mulf %46, %47 : vector<2x8x8xf32>
    %cst_23 = arith.constant dense<0xFF800000> : vector<2x8xf32>
    %49 = vector.multi_reduction <maximumf>, %48, %cst_23 [2] : vector<2x8x8xf32> to vector<2x8xf32>
    %50 = vector.shape_cast %49 : vector<2x8xf32> to vector<2x8x1xf32>
    %51 = vector.broadcast %50 : vector<2x8x1xf32> to vector<2x8x8xf32>
    %52 = arith.subf %48, %51 : vector<2x8x8xf32>
    %53 = math.exp %52 : vector<2x8x8xf32>
    %cst_24 = arith.constant dense<0.000000e+00> : vector<2x8xf32>
    %54 = vector.multi_reduction <add>, %53, %cst_24 [2] : vector<2x8x8xf32> to vector<2x8xf32>
    %55 = vector.shape_cast %54 : vector<2x8xf32> to vector<2x8x1xf32>
    %56 = tpu.reciprocal %55 {approx = true} : vector<2x8x1xf32> -> vector<2x8x1xf32>
    %57 = vector.broadcast %56 : vector<2x8x1xf32> to vector<2x8x8xf32>
    %58 = arith.mulf %53, %57 : vector<2x8x8xf32>
    %59 = arith.truncf %58 : vector<2x8x8xf32> to vector<2x8x8xbf16>
    "tpu.trace_start"() <{level = 10 : i32, message = "sjk,skd->sjd"}> : () -> ()
    %cst_25 = arith.constant dense<0.000000e+00> : vector<2x8x32xf32>
    %60 = tpu.matmul %59, %45, %cst_25 {dimension_numbers = #tpu.dot_dimension_numbers<[2], [1], [1], [2], [0, 0, 0, 1, 1, 2], [0], [0]>} : vector<2x8x8xbf16>, vector<2x8x32xbf16>, vector<2x8x32xf32> -> vector<2x8x32xf32>
    "tpu.trace_stop"() : () -> ()
    %61 = vector.shape_cast %60 : vector<2x8x32xf32> to vector<16x32xf32>
    %62 = arith.truncf %61 : vector<16x32xf32> to vector<16x32xbf16>
    %c0_26 = arith.constant 0 : index
    %c0_27 = arith.constant 0 : index
    %63 = vector.load %arg15[%c0_26, %c0_27] : memref<32x32xbf16, #tpu.memory_space<vmem>>, vector<32x32xbf16>
    %cst_28 = arith.constant dense<0.000000e+00> : vector<16x32xf32>
    %64 = tpu.matmul %62, %63, %cst_28 {dimension_numbers = #tpu.dot_dimension_numbers<[1], [0], [0], [1], [0, 0, 1, 1], [], []>} : vector<16x32xbf16>, vector<32x32xbf16>, vector<16x32xf32> -> vector<16x32xf32>
    %c0_29 = arith.constant 0 : index
    %c0_30 = arith.constant 0 : index
    %65 = vector.load %arg16[%c0_29, %c0_30] : memref<1x32xf32, #tpu.memory_space<vmem>>, vector<1x32xf32>
    %66 = vector.broadcast %65 : vector<1x32xf32> to vector<16x32xf32>
    %67 = arith.addf %64, %66 : vector<16x32xf32>
    %cst_31 = arith.constant dense<0.000000e+00> : vector<16xf32>
    %68 = vector.multi_reduction <add>, %67, %cst_31 [1] : vector<16x32xf32> to vector<16xf32>
    %69 = vector.shape_cast %68 : vector<16xf32> to vector<16x1xf32>
    %cst_32 = arith.constant 3.200000e+01 : f32
    %70 = vector.broadcast %cst_32 : f32 to vector<16x1xf32>
    %71 = arith.divf %69, %70 : vector<16x1xf32>
    %72 = vector.broadcast %71 : vector<16x1xf32> to vector<16x32xf32>
    %73 = arith.subf %67, %72 : vector<16x32xf32>
    %74 = arith.mulf %73, %73 : vector<16x32xf32>
    %cst_33 = arith.constant dense<0.000000e+00> : vector<16xf32>
    %75 = vector.multi_reduction <add>, %74, %cst_33 [1] : vector<16x32xf32> to vector<16xf32>
    %76 = vector.shape_cast %75 : vector<16xf32> to vector<16x1xf32>
    %cst_34 = arith.constant 3.200000e+01 : f32
    %77 = vector.broadcast %cst_34 : f32 to vector<16x1xf32>
    %78 = arith.divf %76, %77 : vector<16x1xf32>
    %cst_35 = arith.constant 9.99999997E-7 : f32
    %79 = vector.broadcast %cst_35 : f32 to vector<16x1xf32>
    %80 = arith.addf %78, %79 : vector<16x1xf32>
    %81 = math.rsqrt %80 : vector<16x1xf32>
    %82 = vector.broadcast %81 : vector<16x1xf32> to vector<16x32xf32>
    %83 = arith.mulf %73, %82 : vector<16x32xf32>
    %cst_36 = arith.constant 1.000000e+00 : f32
    %84 = vector.broadcast %cst_36 : f32 to vector<1x32xf32>
    %85 = arith.addf %84, %11 : vector<1x32xf32>
    %86 = vector.broadcast %85 : vector<1x32xf32> to vector<16x32xf32>
    %87 = arith.mulf %83, %86 : vector<16x32xf32>
    %88 = vector.broadcast %10 : vector<1x32xf32> to vector<16x32xf32>
    %89 = arith.addf %87, %88 : vector<16x32xf32>
    %90 = vector.broadcast %12 : vector<1x32xf32> to vector<16x32xf32>
    %91 = arith.mulf %90, %89 : vector<16x32xf32>
    %92 = arith.addf %32, %91 : vector<16x32xf32>
    %cst_37 = arith.constant dense<0.000000e+00> : vector<16xf32>
    %93 = vector.multi_reduction <add>, %32, %cst_37 [1] : vector<16x32xf32> to vector<16xf32>
    %94 = vector.shape_cast %93 : vector<16xf32> to vector<16x1xf32>
    %cst_38 = arith.constant 3.200000e+01 : f32
    %95 = vector.broadcast %cst_38 : f32 to vector<16x1xf32>
    %96 = arith.divf %94, %95 : vector<16x1xf32>
    %97 = vector.broadcast %96 : vector<16x1xf32> to vector<16x32xf32>
    %98 = arith.subf %32, %97 : vector<16x32xf32>
    %99 = arith.mulf %98, %98 : vector<16x32xf32>
    %cst_39 = arith.constant dense<0.000000e+00> : vector<16xf32>
    %100 = vector.multi_reduction <add>, %99, %cst_39 [1] : vector<16x32xf32> to vector<16xf32>
    %101 = vector.shape_cast %100 : vector<16xf32> to vector<16x1xf32>
    %cst_40 = arith.constant 3.200000e+01 : f32
    %102 = vector.broadcast %cst_40 : f32 to vector<16x1xf32>
    %103 = arith.divf %101, %102 : vector<16x1xf32>
    %cst_41 = arith.constant 9.99999997E-7 : f32
    %104 = vector.broadcast %cst_41 : f32 to vector<16x1xf32>
    %105 = arith.addf %103, %104 : vector<16x1xf32>
    %106 = math.rsqrt %105 : vector<16x1xf32>
    %107 = vector.broadcast %106 : vector<16x1xf32> to vector<16x32xf32>
    %108 = arith.mulf %98, %107 : vector<16x32xf32>
    %cst_42 = arith.constant 1.000000e+00 : f32
    %109 = vector.broadcast %cst_42 : f32 to vector<1x32xf32>
    %110 = arith.addf %109, %7 : vector<1x32xf32>
    %111 = vector.broadcast %110 : vector<1x32xf32> to vector<16x32xf32>
    %112 = arith.mulf %108, %111 : vector<16x32xf32>
    %113 = vector.broadcast %6 : vector<1x32xf32> to vector<16x32xf32>
    %114 = arith.addf %112, %113 : vector<16x32xf32>
    %115 = arith.truncf %114 : vector<16x32xf32> to vector<16x32xbf16>
    %c0_43 = arith.constant 0 : index
    %c0_44 = arith.constant 0 : index
    %116 = vector.load %arg4[%c0_43, %c0_44] : memref<32x32xbf16, #tpu.memory_space<vmem>>, vector<32x32xbf16>
    %cst_45 = arith.constant dense<0.000000e+00> : vector<16x32xf32>
    %117 = tpu.matmul %115, %116, %cst_45 {dimension_numbers = #tpu.dot_dimension_numbers<[1], [0], [0], [1], [0, 0, 1, 1], [], []>} : vector<16x32xbf16>, vector<32x32xbf16>, vector<16x32xf32> -> vector<16x32xf32>
    %c0_46 = arith.constant 0 : index
    %c0_47 = arith.constant 0 : index
    %118 = vector.load %arg7[%c0_46, %c0_47] : memref<1x32xf32, #tpu.memory_space<vmem>>, vector<1x32xf32>
    %119 = vector.broadcast %118 : vector<1x32xf32> to vector<16x32xf32>
    %120 = arith.addf %117, %119 : vector<16x32xf32>
    %c0_48 = arith.constant 0 : index
    %c0_49 = arith.constant 0 : index
    %121 = vector.load %arg5[%c0_48, %c0_49] : memref<32x32xbf16, #tpu.memory_space<vmem>>, vector<32x32xbf16>
    %cst_50 = arith.constant dense<0.000000e+00> : vector<16x32xf32>
    %122 = tpu.matmul %115, %121, %cst_50 {dimension_numbers = #tpu.dot_dimension_numbers<[1], [0], [0], [1], [0, 0, 1, 1], [], []>} : vector<16x32xbf16>, vector<32x32xbf16>, vector<16x32xf32> -> vector<16x32xf32>
    %c0_51 = arith.constant 0 : index
    %c0_52 = arith.constant 0 : index
    %123 = vector.load %arg8[%c0_51, %c0_52] : memref<1x32xf32, #tpu.memory_space<vmem>>, vector<1x32xf32>
    %124 = vector.broadcast %123 : vector<1x32xf32> to vector<16x32xf32>
    %125 = arith.addf %122, %124 : vector<16x32xf32>
    %c0_53 = arith.constant 0 : index
    %c0_54 = arith.constant 0 : index
    %126 = vector.load %arg6[%c0_53, %c0_54] : memref<32x32xbf16, #tpu.memory_space<vmem>>, vector<32x32xbf16>
    %cst_55 = arith.constant dense<0.000000e+00> : vector<16x32xf32>
    %127 = tpu.matmul %115, %126, %cst_55 {dimension_numbers = #tpu.dot_dimension_numbers<[1], [0], [0], [1], [0, 0, 1, 1], [], []>} : vector<16x32xbf16>, vector<32x32xbf16>, vector<16x32xf32> -> vector<16x32xf32>
    %c0_56 = arith.constant 0 : index
    %c0_57 = arith.constant 0 : index
    %128 = vector.load %arg9[%c0_56, %c0_57] : memref<1x32xf32, #tpu.memory_space<vmem>>, vector<1x32xf32>
    %129 = vector.broadcast %128 : vector<1x32xf32> to vector<16x32xf32>
    %130 = arith.addf %127, %129 : vector<16x32xf32>
    %131 = vector.shape_cast %120 : vector<16x32xf32> to vector<16x4x8xf32>
    %132 = tpu.transpose %131, [1, 0, 2] : vector<16x4x8xf32> -> vector<4x16x8xf32>
    %133 = arith.truncf %132 : vector<4x16x8xf32> to vector<4x16x8xbf16>
    %134 = vector.shape_cast %125 : vector<16x32xf32> to vector<16x4x8xf32>
    %135 = tpu.transpose %134, [1, 0, 2] : vector<16x4x8xf32> -> vector<4x16x8xf32>
    %136 = arith.truncf %135 : vector<4x16x8xf32> to vector<4x16x8xbf16>
    %137 = vector.shape_cast %130 : vector<16x32xf32> to vector<16x4x8xf32>
    %138 = tpu.transpose %137, [1, 0, 2] : vector<16x4x8xf32> -> vector<4x16x8xf32>
    %139 = arith.truncf %138 : vector<4x16x8xf32> to vector<4x16x8xbf16>
    "tpu.trace_start"() <{level = 10 : i32, message = "hqd,hkd->hqk"}> : () -> ()
    %cst_58 = arith.constant dense<0.000000e+00> : vector<4x16x16xf32>
    %140 = tpu.matmul %133, %136, %cst_58 {dimension_numbers = #tpu.dot_dimension_numbers<[2], [2], [1], [1], [0, 0, 0, 1, 1, 1], [0], [0]>} : vector<4x16x8xbf16>, vector<4x16x8xbf16>, vector<4x16x16xf32> -> vector<4x16x16xf32>
    "tpu.trace_stop"() : () -> ()
    %cst_59 = arith.constant 0.353553385 : f32
    %141 = vector.broadcast %cst_59 : f32 to vector<4x16x16xf32>
    %142 = arith.mulf %140, %141 : vector<4x16x16xf32>
    %cst_60 = arith.constant dense<0xFF800000> : vector<4x16xf32>
    %143 = vector.multi_reduction <maximumf>, %142, %cst_60 [2] : vector<4x16x16xf32> to vector<4x16xf32>
    %144 = vector.shape_cast %143 : vector<4x16xf32> to vector<4x16x1xf32>
    %145 = vector.broadcast %144 : vector<4x16x1xf32> to vector<4x16x16xf32>
    %146 = arith.subf %142, %145 : vector<4x16x16xf32>
    %147 = math.exp %146 : vector<4x16x16xf32>
    %cst_61 = arith.constant dense<0.000000e+00> : vector<4x16xf32>
    %148 = vector.multi_reduction <add>, %147, %cst_61 [2] : vector<4x16x16xf32> to vector<4x16xf32>
    %149 = vector.shape_cast %148 : vector<4x16xf32> to vector<4x16x1xf32>
    %150 = vector.broadcast %149 : vector<4x16x1xf32> to vector<4x16x16xf32>
    %151 = arith.divf %147, %150 : vector<4x16x16xf32>
    %152 = arith.truncf %151 : vector<4x16x16xf32> to vector<4x16x16xbf16>
    "tpu.trace_start"() <{level = 10 : i32, message = "hqk,hkd->hqd"}> : () -> ()
    %cst_62 = arith.constant dense<0.000000e+00> : vector<4x16x8xf32>
    %153 = tpu.matmul %152, %139, %cst_62 {dimension_numbers = #tpu.dot_dimension_numbers<[2], [1], [1], [2], [0, 0, 0, 1, 1, 2], [0], [0]>} : vector<4x16x16xbf16>, vector<4x16x8xbf16>, vector<4x16x8xf32> -> vector<4x16x8xf32>
    "tpu.trace_stop"() : () -> ()
    %154 = tpu.transpose %153, [1, 0, 2] : vector<4x16x8xf32> -> vector<16x4x8xf32>
    %155 = vector.shape_cast %154 : vector<16x4x8xf32> to vector<16x32xf32>
    %156 = arith.truncf %155 : vector<16x32xf32> to vector<16x32xbf16>
    %c0_63 = arith.constant 0 : index
    %c0_64 = arith.constant 0 : index
    %157 = vector.load %arg10[%c0_63, %c0_64] : memref<32x32xbf16, #tpu.memory_space<vmem>>, vector<32x32xbf16>
    %cst_65 = arith.constant dense<0.000000e+00> : vector<16x32xf32>
    %158 = tpu.matmul %156, %157, %cst_65 {dimension_numbers = #tpu.dot_dimension_numbers<[1], [0], [0], [1], [0, 0, 1, 1], [], []>} : vector<16x32xbf16>, vector<32x32xbf16>, vector<16x32xf32> -> vector<16x32xf32>
    %c0_66 = arith.constant 0 : index
    %c0_67 = arith.constant 0 : index
    %159 = vector.load %arg11[%c0_66, %c0_67] : memref<1x32xf32, #tpu.memory_space<vmem>>, vector<1x32xf32>
    %160 = vector.broadcast %159 : vector<1x32xf32> to vector<16x32xf32>
    %161 = arith.addf %158, %160 : vector<16x32xf32>
    %162 = vector.broadcast %8 : vector<1x32xf32> to vector<16x32xf32>
    %163 = arith.mulf %162, %161 : vector<16x32xf32>
    %164 = arith.addf %32, %163 : vector<16x32xf32>
    %cst_68 = arith.constant dense<0.000000e+00> : vector<16xf32>
    %165 = vector.multi_reduction <add>, %92, %cst_68 [1] : vector<16x32xf32> to vector<16xf32>
    %166 = vector.shape_cast %165 : vector<16xf32> to vector<16x1xf32>
    %cst_69 = arith.constant dense<0.000000e+00> : vector<16xf32>
    %167 = vector.multi_reduction <add>, %164, %cst_69 [1] : vector<16x32xf32> to vector<16xf32>
    %168 = vector.shape_cast %167 : vector<16xf32> to vector<16x1xf32>
    %169 = arith.addf %166, %168 : vector<16x1xf32>
    %cst_70 = arith.constant 6.400000e+01 : f32
    %170 = vector.broadcast %cst_70 : f32 to vector<16x1xf32>
    %171 = arith.divf %169, %170 : vector<16x1xf32>
    %172 = vector.broadcast %171 : vector<16x1xf32> to vector<16x32xf32>
    %173 = arith.subf %92, %172 : vector<16x32xf32>
    %174 = vector.broadcast %171 : vector<16x1xf32> to vector<16x32xf32>
    %175 = arith.subf %164, %174 : vector<16x32xf32>
    %176 = arith.mulf %173, %173 : vector<16x32xf32>
    %cst_71 = arith.constant dense<0.000000e+00> : vector<16xf32>
    %177 = vector.multi_reduction <add>, %176, %cst_71 [1] : vector<16x32xf32> to vector<16xf32>
    %178 = vector.shape_cast %177 : vector<16xf32> to vector<16x1xf32>
    %179 = arith.mulf %175, %175 : vector<16x32xf32>
    %cst_72 = arith.constant dense<0.000000e+00> : vector<16xf32>
    %180 = vector.multi_reduction <add>, %179, %cst_72 [1] : vector<16x32xf32> to vector<16xf32>
    %181 = vector.shape_cast %180 : vector<16xf32> to vector<16x1xf32>
    %182 = arith.addf %178, %181 : vector<16x1xf32>
    %cst_73 = arith.constant 6.400000e+01 : f32
    %183 = vector.broadcast %cst_73 : f32 to vector<16x1xf32>
    %184 = arith.divf %182, %183 : vector<16x1xf32>
    %cst_74 = arith.constant 9.99999997E-7 : f32
    %185 = vector.broadcast %cst_74 : f32 to vector<16x1xf32>
    %186 = arith.addf %184, %185 : vector<16x1xf32>
    %187 = math.rsqrt %186 : vector<16x1xf32>
    %188 = vector.broadcast %187 : vector<16x1xf32> to vector<16x32xf32>
    %189 = arith.mulf %173, %188 : vector<16x32xf32>
    %cst_75 = arith.constant 1.000000e+00 : f32
    %190 = vector.broadcast %cst_75 : f32 to vector<1x32xf32>
    %191 = arith.addf %190, %15 : vector<1x32xf32>
    %192 = vector.broadcast %191 : vector<1x32xf32> to vector<16x32xf32>
    %193 = arith.mulf %189, %192 : vector<16x32xf32>
    %194 = vector.broadcast %13 : vector<1x32xf32> to vector<16x32xf32>
    %195 = arith.addf %193, %194 : vector<16x32xf32>
    %196 = vector.broadcast %187 : vector<16x1xf32> to vector<16x32xf32>
    %197 = arith.mulf %175, %196 : vector<16x32xf32>
    %cst_76 = arith.constant 1.000000e+00 : f32
    %198 = vector.broadcast %cst_76 : f32 to vector<1x32xf32>
    %199 = arith.addf %198, %16 : vector<1x32xf32>
    %200 = vector.broadcast %199 : vector<1x32xf32> to vector<16x32xf32>
    %201 = arith.mulf %197, %200 : vector<16x32xf32>
    %202 = vector.broadcast %14 : vector<1x32xf32> to vector<16x32xf32>
    %203 = arith.addf %201, %202 : vector<16x32xf32>
    %204 = arith.truncf %195 : vector<16x32xf32> to vector<16x32xbf16>
    %c0_77 = arith.constant 0 : index
    %c0_78 = arith.constant 0 : index
    %205 = vector.load %arg17[%c0_77, %c0_78] : memref<32x64xbf16, #tpu.memory_space<vmem>>, vector<32x64xbf16>
    %cst_79 = arith.constant dense<0.000000e+00> : vector<16x64xf32>
    %206 = tpu.matmul %204, %205, %cst_79 {dimension_numbers = #tpu.dot_dimension_numbers<[1], [0], [0], [1], [0, 0, 1, 1], [], []>} : vector<16x32xbf16>, vector<32x64xbf16>, vector<16x64xf32> -> vector<16x64xf32>
    %207 = arith.truncf %203 : vector<16x32xf32> to vector<16x32xbf16>
    %c0_80 = arith.constant 0 : index
    %c0_81 = arith.constant 0 : index
    %208 = vector.load %arg18[%c0_80, %c0_81] : memref<32x64xbf16, #tpu.memory_space<vmem>>, vector<32x64xbf16>
    %cst_82 = arith.constant dense<0.000000e+00> : vector<16x64xf32>
    %209 = tpu.matmul %207, %208, %cst_82 {dimension_numbers = #tpu.dot_dimension_numbers<[1], [0], [0], [1], [0, 0, 1, 1], [], []>} : vector<16x32xbf16>, vector<32x64xbf16>, vector<16x64xf32> -> vector<16x64xf32>
    %210 = arith.addf %206, %209 : vector<16x64xf32>
    %c0_83 = arith.constant 0 : index
    %c0_84 = arith.constant 0 : index
    %211 = vector.load %arg19[%c0_83, %c0_84] : memref<1x64xf32, #tpu.memory_space<vmem>>, vector<1x64xf32>
    %212 = vector.broadcast %211 : vector<1x64xf32> to vector<16x64xf32>
    %213 = arith.addf %210, %212 : vector<16x64xf32>
    %cst_85 = arith.constant 5.000000e-01 : f32
    %214 = vector.broadcast %cst_85 : f32 to vector<16x64xf32>
    %215 = arith.mulf %214, %213 : vector<16x64xf32>
    %cst_86 = arith.constant 4.471500e-02 : f32
    %216 = vector.broadcast %cst_86 : f32 to vector<16x64xf32>
    %217 = arith.mulf %216, %213 : vector<16x64xf32>
    %218 = arith.mulf %217, %213 : vector<16x64xf32>
    %219 = arith.mulf %218, %213 : vector<16x64xf32>
    %220 = arith.addf %213, %219 : vector<16x64xf32>
    %cst_87 = arith.constant 0.797884583 : f32
    %221 = vector.broadcast %cst_87 : f32 to vector<16x64xf32>
    %222 = arith.mulf %221, %220 : vector<16x64xf32>
    %223 = math.tanh %222 : vector<16x64xf32>
    %cst_88 = arith.constant 1.000000e+00 : f32
    %224 = vector.broadcast %cst_88 : f32 to vector<16x64xf32>
    %225 = arith.addf %224, %223 : vector<16x64xf32>
    %226 = arith.mulf %215, %225 : vector<16x64xf32>
    %227 = arith.truncf %226 : vector<16x64xf32> to vector<16x64xbf16>
    %c0_89 = arith.constant 0 : index
    %c0_90 = arith.constant 0 : index
    %228 = vector.load %arg20[%c0_89, %c0_90] : memref<64x32xbf16, #tpu.memory_space<vmem>>, vector<64x32xbf16>
    %cst_91 = arith.constant dense<0.000000e+00> : vector<16x32xf32>
    %229 = tpu.matmul %227, %228, %cst_91 {dimension_numbers = #tpu.dot_dimension_numbers<[1], [0], [0], [1], [0, 0, 1, 1], [], []>} : vector<16x64xbf16>, vector<64x32xbf16>, vector<16x32xf32> -> vector<16x32xf32>
    %c0_92 = arith.constant 0 : index
    %c0_93 = arith.constant 0 : index
    %230 = vector.load %arg21[%c0_92, %c0_93] : memref<1x32xf32, #tpu.memory_space<vmem>>, vector<1x32xf32>
    %231 = vector.broadcast %230 : vector<1x32xf32> to vector<16x32xf32>
    %232 = arith.addf %229, %231 : vector<16x32xf32>
    %233 = vector.broadcast %9 : vector<1x32xf32> to vector<16x32xf32>
    %234 = arith.mulf %233, %232 : vector<16x32xf32>
    %235 = arith.addf %32, %234 : vector<16x32xf32>
    %c0_94 = arith.constant 0 : index
    %c0_95 = arith.constant 0 : index
    %c0_96 = arith.constant 0 : index
    %236 = vector.load %arg22[%c0_94, %c0_95, %c0_96] : memref<1x16x32xf32, #tpu.memory_space<vmem>>, vector<1x16x32xf32>
    %237 = vector.shape_cast %236 : vector<1x16x32xf32> to vector<16x32xf32>
    %238 = vector.shape_cast %235 : vector<16x32xf32> to vector<1x16x32xf32>
    tpu.vector_store %arg22[%c0_94, %c0_95, %c0_96], %238 {strides = array<i32>} : memref<1x16x32xf32, #tpu.memory_space<vmem>>, vector<1x16x32xf32>,
    return
  }
  func.func @transform_0(%arg0: i32) -> (i32, i32, i32) {
    %c0_i32 = arith.constant 0 : i32
    %c0_i32_0 = arith.constant 0 : i32
    %c0_i32_1 = arith.constant 0 : i32
    return %arg0, %c0_i32, %c0_i32_0 : i32, i32, i32
  }
  func.func @transform_1(%arg0: i32) -> (i32, i32, i32) {
    %c0_i32 = arith.constant 0 : i32
    %c0_i32_0 = arith.constant 0 : i32
    %c0_i32_1 = arith.constant 0 : i32
    return %arg0, %c0_i32, %c0_i32_0 : i32, i32, i32
  }
  func.func @transform_2(%arg0: i32) -> (i32, i32, i32) {
    %c0_i32 = arith.constant 0 : i32
    %c0_i32_0 = arith.constant 0 : i32
    %c0_i32_1 = arith.constant 0 : i32
    return %arg0, %c0_i32, %c0_i32_0 : i32, i32, i32
  }
  func.func @transform_3(%arg0: i32) -> (i32, i32) {
    %c0_i32 = arith.constant 0 : i32
    %c0_i32_0 = arith.constant 0 : i32
    %c0_i32_1 = arith.constant 0 : i32
    return %c0_i32, %c0_i32_0 : i32, i32
  }
  func.func @transform_4(%arg0: i32) -> (i32, i32) {
    %c0_i32 = arith.constant 0 : i32
    %c0_i32_0 = arith.constant 0 : i32
    %c0_i32_1 = arith.constant 0 : i32
    return %c0_i32, %c0_i32_0 : i32, i32
  }
  func.func @transform_5(%arg0: i32) -> (i32, i32) {
    %c0_i32 = arith.constant 0 : i32
    %c0_i32_0 = arith.constant 0 : i32
    %c0_i32_1 = arith.constant 0 : i32
    return %c0_i32, %c0_i32_0 : i32, i32
  }
  func.func @transform_6(%arg0: i32) -> (i32, i32) {
    %c0_i32 = arith.constant 0 : i32
    %c0_i32_0 = arith.constant 0 : i32
    %c0_i32_1 = arith.constant 0 : i32
    return %c0_i32, %c0_i32_0 : i32, i32
  }
  func.func @transform_7(%arg0: i32) -> (i32, i32) {
    %c0_i32 = arith.constant 0 : i32
    %c0_i32_0 = arith.constant 0 : i32
    %c0_i32_1 = arith.constant 0 : i32
    return %c0_i32, %c0_i32_0 : i32, i32
  }
  func.func @transform_8(%arg0: i32) -> (i32, i32) {
    %c0_i32 = arith.constant 0 : i32
    %c0_i32_0 = arith.constant 0 : i32
    %c0_i32_1 = arith.constant 0 : i32
    return %c0_i32, %c0_i32_0 : i32, i32
  }
  func.func @transform_9(%arg0: i32) -> (i32, i32) {
    %c0_i32 = arith.constant 0 : i32
    %c0_i32_0 = arith.constant 0 : i32
    %c0_i32_1 = arith.constant 0 : i32
    return %c0_i32, %c0_i32_0 : i32, i32
  }
  func.func @transform_10(%arg0: i32) -> (i32, i32) {
    %c0_i32 = arith.constant 0 : i32
    %c0_i32_0 = arith.constant 0 : i32
    %c0_i32_1 = arith.constant 0 : i32
    return %c0_i32, %c0_i32_0 : i32, i32
  }
  func.func @transform_11(%arg0: i32) -> (i32, i32) {
    %c0_i32 = arith.constant 0 : i32
    %c0_i32_0 = arith.constant 0 : i32
    %c0_i32_1 = arith.constant 0 : i32
    return %c0_i32, %c0_i32_0 : i32, i32
  }
  func.func @transform_12(%arg0: i32) -> (i32, i32) {
    %c0_i32 = arith.constant 0 : i32
    %c0_i32_0 = arith.constant 0 : i32
    %c0_i32_1 = arith.constant 0 : i32
    return %c0_i32, %c0_i32_0 : i32, i32
  }
  func.func @transform_13(%arg0: i32) -> (i32, i32) {
    %c0_i32 = arith.constant 0 : i32
    %c0_i32_0 = arith.constant 0 : i32
    %c0_i32_1 = arith.constant 0 : i32
    return %c0_i32, %c0_i32_0 : i32, i32
  }
  func.func @transform_14(%arg0: i32) -> (i32, i32) {
    %c0_i32 = arith.constant 0 : i32
    %c0_i32_0 = arith.constant 0 : i32
    %c0_i32_1 = arith.constant 0 : i32
    return %c0_i32, %c0_i32_0 : i32, i32
  }
  func.func @transform_15(%arg0: i32) -> (i32, i32) {
    %c0_i32 = arith.constant 0 : i32
    %c0_i32_0 = arith.constant 0 : i32
    %c0_i32_1 = arith.constant 0 : i32
    return %c0_i32, %c0_i32_0 : i32, i32
  }
  func.func @transform_16(%arg0: i32) -> (i32, i32) {
    %c0_i32 = arith.constant 0 : i32
    %c0_i32_0 = arith.constant 0 : i32
    %c0_i32_1 = arith.constant 0 : i32
    return %c0_i32, %c0_i32_0 : i32, i32
  }
  func.func @transform_17(%arg0: i32) -> (i32, i32) {
    %c0_i32 = arith.constant 0 : i32
    %c0_i32_0 = arith.constant 0 : i32
    %c0_i32_1 = arith.constant 0 : i32
    return %c0_i32, %c0_i32_0 : i32, i32
  }
  func.func @transform_18(%arg0: i32) -> (i32, i32) {
    %c0_i32 = arith.constant 0 : i32
    %c0_i32_0 = arith.constant 0 : i32
    %c0_i32_1 = arith.constant 0 : i32
    return %c0_i32, %c0_i32_0 : i32, i32
  }
  func.func @transform_19(%arg0: i32) -> (i32, i32) {
    %c0_i32 = arith.constant 0 : i32
    %c0_i32_0 = arith.constant 0 : i32
    %c0_i32_1 = arith.constant 0 : i32
    return %c0_i32, %c0_i32_0 : i32, i32
  }
  func.func @transform_20(%arg0: i32) -> (i32, i32) {
    %c0_i32 = arith.constant 0 : i32
    %c0_i32_0 = arith.constant 0 : i32
    %c0_i32_1 = arith.constant 0 : i32
    return %c0_i32, %c0_i32_0 : i32, i32
  }
  func.func @transform_21(%arg0: i32) -> (i32, i32, i32) {
    %c0_i32 = arith.constant 0 : i32
    %c0_i32_0 = arith.constant 0 : i32
    %c0_i32_1 = arith.constant 0 : i32
    return %arg0, %c0_i32, %c0_i32_0 : i32, i32, i32
  }
}

</mosaic_0001>

<bundles_post_ra>
// kernel: tpu_custom_call.1
= control target key start
LH: loop header
LB: loop body
LE: loop exit
PB: predicated region body
PF: predicated region fallthrough
CT: control target
= control target key end

     0   :  { %s5524_s0 = inlined_call_operand.vmem [shape: f32[2,16,32], index: 0, kind: input, shape index: {}]   ;;  %s5525_s1 = inlined_call_operand.vmem [shape: f32[2,7,32], index: 1, kind: input, shape index: {}]   ;;  %s5526_s2 = inlined_call_operand.hbm [shape: f32[2,4,32], index: 2, kind: input, shape index: {}]   ;;  %s5527_s3 = inlined_call_operand.vmem [shape: bf16[32,32], index: 3, kind: input, shape index: {}]   ;;  %s5528_s4 = inlined_call_operand.vmem [shape: bf16[32,32], index: 4, kind: input, shape index: {}]   ;;  %s5529_s5 = inlined_call_operand.vmem [shape: bf16[32,32], index: 5, kind: input, shape index: {}]   ;;  %s5530_s6 = inlined_call_operand.hbm [shape: f32[1,32], index: 6, kind: input, shape index: {}]   ;;  %s5531_s7 = inlined_call_operand.hbm [shape: f32[1,32], index: 7, kind: input, shape index: {}]   ;;  %s5532_s8 = inlined_call_operand.hbm [shape: f32[1,32], index: 8, kind: input, shape index: {}]   ;;  %s5533_s9 = inlined_call_operand.hbm [shape: bf16[32,32], index: 9, kind: input, shape index: {}]   ;;  %s5534_s10 = inlined_call_operand.hbm [shape: f32[1,32], index: 10, kind: input, shape index: {}]   ;;  %s5535_s11 = inlined_call_operand.hbm [shape: bf16[32,32], index: 11, kind: input, shape index: {}]   ;;  %s5536_s12 = inlined_call_operand.hbm [shape: bf16[32,32], index: 12, kind: input, shape index: {}]   ;;  %s5537_s13 = inlined_call_operand.hbm [shape: bf16[32,32], index: 13, kind: input, shape index: {}]   ;;  %s5538_s14 = inlined_call_operand.hbm [shape: bf16[32,32], index: 14, kind: input, shape index: {}]   ;;  %s5539_s15 = inlined_call_operand.hbm [shape: f32[1,32], index: 15, kind: input, shape index: {}]   ;;  %s5540_s16 = inlined_call_operand.hbm [shape: bf16[32,64], index: 16, kind: input, shape index: {}]   ;;  %s5541_s17 = inlined_call_operand.hbm [shape: bf16[32,64], index: 17, kind: input, shape index: {}]   ;;  %s5542_s18 = inlined_call_operand.hbm [shape: f32[1,64], index: 18, kind: input, shape index: {}]   ;;  %s5543_s19 = inlined_call_operand.vmem [shape: bf16[64,32], index: 19, kind: input, shape index: {}]   ;;  %s5544_s20 = inlined_call_operand.vmem [shape: f32[1,32], index: 20, kind: input, shape index: {}]   ;;  %s5545_s21 = inlined_call_operand.hbm [shape: f32[2,16,32], index: 21, kind: output, shape index: {}]  }
   0x1   :  { %5557 = sst [smem:[#allocation36_spill]] %s5524_s0 }
   0x2   :  { %5558 = sst [smem:[#allocation37_spill]] %s5525_s1 }
   0x3   :  { %5559 = sst [smem:[#allocation38_spill]] %s5526_s2 }
   0x4   :  { %5560 = sst [smem:[#allocation39_spill]] %s5527_s3 }
   0x5   :  { %5561 = sst [smem:[#allocation40_spill]] %s5528_s4 }
   0x6   :  { %5562 = sst [smem:[#allocation41_spill]] %s5529_s5 }
   0x7   :  { %5563 = sst [smem:[#allocation42_spill]] %s5530_s6 }
   0x8   :  { %5564 = sst [smem:[#allocation43_spill]] %s5531_s7 }
   0x9   :  { %5565 = sst [smem:[#allocation44_spill]] %s5532_s8 }
   0xa   :  { %5566 = sst [smem:[#allocation45_spill]] %s5533_s9 }
   0xb   :  { %5567 = sst [smem:[#allocation46_spill]] %s5534_s10 }
   0xc   :  { %5568 = sst [smem:[#allocation47_spill]] %s5535_s11 }
   0xd   :  { %5569 = sst [smem:[#allocation48_spill]] %s5543_s19 }
   0xe   :  { %5570 = sst [smem:[#allocation49_spill]] %s5544_s20 }
   0xf   :  { %5571 = sst [smem:[#allocation50_spill]] %s5545_s21 }
  0x10   :  { %26 = vsyncpa [#allocation3], 0 }
  0x11   :  { %28 = vsyncpa [#allocation3 + $0x1], 0 }
  0x12   :  { %29 = vsyncpa [#allocation6], 0 }
  0x13   :  { %30 = vsyncpa [#allocation9], 0 }
  0x14   :  { %31 = vsyncpa [#allocation12], 0 }
  0x15   :  { %32 = vsyncpa [#allocation15], 0 }
  0x16   :  { %33 = vsyncpa [#allocation18], 0 }
  0x17   :  { %34 = vsyncpa [#allocation21], 0 }
  0x18   :  { %35 = vsyncpa [#allocation24], 0 }
  0x19   :  { %36 = vsyncpa [#allocation4], 0 }
  0x1a   :  { %38 = vsyncpa [#allocation4 + $0x1], 0  ;;  %s4543_s2 = smov 0   ;;  %s4545_s25 = smov 0  }
  0x1b   :  { %s4547_s26 = smov 0   ;;  %s4549_s27 = smov 0  }
  0x1c LB: > { %s5572_s6 = sld [smem:[#allocation42_spill]]  ;;  %s4567_s0 = sadd.s32 4294967295, %s4405_s27   ;;  %s4405_s27 = sphi %s4549_s27, %s5608_s27   ;;  %s4401_s26 = sphi %s4547_s26, %s5607_s26   ;;  %s4397_s25 = sphi %s4545_s25, %s5606_s25   ;;  %s4393_s2 = sphi %s4543_s2, %s5605_s2  }
  0x1d   : > { %p3383_p0 = scmp.ge.s32.totalorder %s4405_s27, 1  ;;  %p117_p1 = scmp.eq.s32.totalorder %s4567_s0, 0 }
  0x1e   : > { %p531_p2 = scmp.lt.s32.totalorder %s4405_s27, 3  ;;  %s4407_s30 = smov [#allocation5]  }
  0x1f   : > { %s554_s5 = sshll.u32 %s4407_s30, 4  ;;  %s5575_s8 = sld [smem:[#allocation44_spill]]  ;;  %s555_s5 = int_to_ptr.vmem [resolvable:$true] %s554_s5 }
  0x20   : > { %p4572_p3 = pnand %p3383_p0, %p531_p2  ;;  %s4408_s3 = smov [#allocation8]  }
  0x21   : > { %s578_s28 = sshll.u32 %s4408_s3, 4  ;;  %s5577_s10 = sld [smem:[#allocation46_spill]]  ;;  %s579_s28 = int_to_ptr.vmem [resolvable:$true] %s578_s28 }
  0x22   : > { %s552_s29 = sshll.u32 %s5572_s6, 4  ;;  %p3625_p5 = pneg %p4572_p3  ;;  %s553_s29 = int_to_ptr.hbm [resolvable:$true] %s552_s29 }
  0x23   : > { %s5573_s4 = scalar_select %p4572_p3, 1, 0 }
  0x24   : > { %p4584_p6 = pnand %p3625_p5, %p117_p1  ;;  %s4409_s22 = smov [#allocation11]  }
  0x25   : > { %5574 = sst [smem:[#allocation35_spill]] %s5573_s4  ;;  %s576_s1 = sshll.u32 %s5575_s8, 4  ;;  %s577_s1 = int_to_ptr.hbm [resolvable:$true] %s576_s1 }
  0x26   : > { %3628 = dma.hbm_to_vmem [thread:$0]  (!%p4584_p6), %s553_s29, 16, %s555_s5, [#allocation6]  }
  0x27   : > { %s602_s21 = sshll.u32 %s5577_s10, 4  ;;  %s604_s23 = sshll.u32 %s4409_s22, 4  ;;  %s603_s21 = int_to_ptr.hbm [resolvable:$true] %s602_s21  ;;  %s605_s23 = int_to_ptr.vmem [resolvable:$true] %s604_s23 }
  0x28   : > { %3634 = dma.hbm_to_vmem [thread:$0]  (!%p4584_p6), %s577_s1, 16, %s579_s28, [#allocation9]  }
  0x29   : > { %s627_s19 = sshll.u32 %s5536_s12, 4  ;;  %s4410_s3 = smov [#allocation14]   ;;  %s628_s19 = int_to_ptr.hbm [resolvable:$true] %s627_s19 }
  0x2a   : > { %3640 = dma.hbm_to_vmem [thread:$0]  (!%p4584_p6), %s603_s21, 16, %s605_s23, [#allocation12]  }
  0x2b   : > { %s629_s6 = sshll.u32 %s4410_s3, 4  ;;  %s655_s4 = sshll.u32 %s5538_s14, 4  ;;  %s630_s6 = int_to_ptr.vmem [resolvable:$true] %s629_s6  ;;  %s656_s4 = int_to_ptr.hbm [resolvable:$true] %s655_s4 }
  0x2c   : > { %s4411_s29 = smov 64   ;;  %s4412_s5 = smov 4  }
  0x2d   : > { %3646 = dma.hbm_to_vmem [thread:$0]  (!%p4584_p6), %s628_s19, 256, %s630_s6, [#allocation15], %s4411_s29, %s4411_s29, %s4412_s5  }
  0x2e   : > { %s681_s21 = sshll.u32 %s5540_s16, 4  ;;  %s4413_s1 = smov [#allocation17]   ;;  %s682_s21 = int_to_ptr.hbm [resolvable:$true] %s681_s21 }
  0x2f   : > { %s657_s28 = sshll.u32 %s4413_s1, 4  ;;  %s4414_s10 = smov [#allocation20]   ;;  %s658_s28 = int_to_ptr.vmem [resolvable:$true] %s657_s28 }
  0x30   : > { %3652 = dma.hbm_to_vmem [thread:$0]  (!%p4584_p6), %s656_s4, 256, %s658_s28, [#allocation18], %s4411_s29, %s4411_s29, %s4412_s5  }
  0x31   : > { %s683_s22 = sshll.u32 %s4414_s10, 4  ;;  %s5578_s7 = sld [smem:[#allocation43_spill]]  ;;  %s684_s22 = int_to_ptr.vmem [resolvable:$true] %s683_s22 }
  0x32   : > { %3658 = dma.hbm_to_vmem [thread:$0]  (!%p4584_p6), %s682_s21, 256, %s684_s22, [#allocation21], %s4411_s29, %s4411_s29, %s4412_s5  }
  0x33   : > { %s5579_s9 = sld [smem:[#allocation45_spill]]  ;;  %s4415_s20 = smov [#allocation7]  }
  0x34   : > { %s566_s4 = sshll.u32 %s4415_s20, 4  ;;  %s4416_s1 = smov [#allocation10]   ;;  %s567_s4 = int_to_ptr.vmem [resolvable:$true] %s566_s4 }
  0x35   : > { %s589_s28 = sshll.u32 %s4416_s1, 4  ;;  %s5580_s11 = sld [smem:[#allocation47_spill]]  ;;  %s590_s28 = int_to_ptr.vmem [resolvable:$true] %s589_s28 }
  0x36   : > { %s641_s6 = sshll.u32 %s5537_s13, 4  ;;  %s4417_s30 = smov [#allocation13]   ;;  %s642_s6 = int_to_ptr.hbm [resolvable:$true] %s641_s6 }
  0x37   : > { %s564_s19 = sshll.u32 %s5578_s7, 4  ;;  %s4418_s20 = smov [#allocation16]   ;;  %s565_s19 = int_to_ptr.hbm [resolvable:$true] %s564_s19 }
  0x38   : > { %3631 = dma.hbm_to_vmem [thread:$0]  (!%p4584_p6), %s565_s19, 16, %s567_s4, [#allocation6]  }
  0x39   : > { %s587_s8 = sshll.u32 %s5579_s9, 4  ;;  %s615_s19 = sshll.u32 %s4417_s30, 4  ;;  %s588_s8 = int_to_ptr.hbm [resolvable:$true] %s587_s8  ;;  %s616_s19 = int_to_ptr.vmem [resolvable:$true] %s615_s19 }
  0x3a   : > { %3637 = dma.hbm_to_vmem [thread:$0]  (!%p4584_p6), %s588_s8, 256, %s590_s28, [#allocation9], %s4411_s29, %s4411_s29, %s4412_s5  }
  0x3b   : > { %s613_s3 = sshll.u32 %s5580_s11, 4  ;;  %s643_s4 = sshll.u32 %s4418_s20, 4  ;;  %s614_s3 = int_to_ptr.hbm [resolvable:$true] %s613_s3  ;;  %s644_s4 = int_to_ptr.vmem [resolvable:$true] %s643_s4 }
  0x3c   : > { %3643 = dma.hbm_to_vmem [thread:$0]  (!%p4584_p6), %s614_s3, 256, %s616_s19, [#allocation12], %s4411_s29, %s4411_s29, %s4412_s5  }
  0x3d   : > { %s670_s8 = sshll.u32 %s5539_s15, 4  ;;  %s695_s21 = sshll.u32 %s5541_s17, 4  ;;  %s671_s8 = int_to_ptr.hbm [resolvable:$true] %s670_s8  ;;  %s696_s21 = int_to_ptr.hbm [resolvable:$true] %s695_s21 }
  0x3e   : > { %3649 = dma.hbm_to_vmem [thread:$0]  (!%p4584_p6), %s642_s6, 256, %s644_s4, [#allocation15], %s4411_s29, %s4411_s29, %s4412_s5  }
  0x3f   : > { %s4419_s3 = smov [#allocation19]   ;;  %s4420_s30 = smov [#allocation22]  }
  0x40   : > { %s672_s22 = sshll.u32 %s4419_s3, 4  ;;  %s697_s6 = sshll.u32 %s4420_s30, 4  ;;  %s673_s22 = int_to_ptr.vmem [resolvable:$true] %s672_s22  ;;  %s698_s6 = int_to_ptr.vmem [resolvable:$true] %s697_s6 }
  0x41   : > { %3655 = dma.hbm_to_vmem [thread:$0]  (!%p4584_p6), %s671_s8, 16, %s673_s22, [#allocation18]  }
  0x42   : > { %s710_s4 = sshll.u32 %s5542_s18, 4  ;;  %s4421_s1 = smov [#allocation23]   ;;  %s711_s4 = int_to_ptr.hbm [resolvable:$true] %s710_s4 }
  0x43   : > { %3661 = dma.hbm_to_vmem [thread:$0]  (!%p4584_p6), %s696_s21, 256, %s698_s6, [#allocation21], %s4411_s29, %s4411_s29, %s4412_s5  }
  0x44   : > { %s712_s10 = sshll.u32 %s4421_s1, 4  ;;  %s3382_s8 = sadd.s32 4294967294, %s4405_s27   ;;  %s713_s10 = int_to_ptr.vmem [resolvable:$true] %s712_s10 }
  0x45   : > { %3664 = dma.hbm_to_vmem [thread:$0]  (!%p4584_p6), %s711_s4, 16, %s713_s10, [#allocation24]  }
  0x46   : > { %s4670_s28 = sadd.s32 1, %s4405_s27   ;;  %s103_s23 = sadd.s32 1, %s4401_s26 }
  0x47   : > { %s100_s3 = ssub.s32 %s4405_s27, %s4670_s28  ;;  %p110_p7 = scmp.ne.s32.totalorder %s4401_s26, %s4397_s25 }
  0x48   : > { %p101_p8 = scmp.eq.s32.totalorder %s100_s3, 0  ;;  %p111_p9 = scmp.eq.s32.totalorder %s4405_s27, 0 }
  0x49   : > { %p116_p10 = scmp.ne.s32.totalorder %s4397_s25, %s4393_s2  ;;  %p518_p11 = scmp.eq.s32.totalorder %s4567_s0, 1 }
  0x4a   : > { %s4682_s29 = scalar_select %p101_p8, %s4401_s26, %s103_s23  }
  0x4b   : > { %p4686_p12 = por %p117_p1, %p116_p10  ;;  %p4690_p13 = por %p518_p11, %p110_p7 }
  0x4c   : > { %p524_p0 = scmp.eq.s32.totalorder %s3382_s8, 1  ;;  %p112_p2 = por %p111_p9, %p110_p7 }
  0x4d   : > { %s744_s21 = sand.u32 1, %s4401_s26   ;;  %p3686_p6 = scmp.lt.s32.totalorder %s4405_s27, 2 }
  0x4e   : > { %p4695_p5 = por %p524_p0, %p116_p10  ;;  %s3398_s30 = sshll.u32 %s744_s21, 2 }
  0x4f   : > { %s3399_s6 = sshll.u32 %s4405_s27, 2  ;;  %s5584_s4 = sld [smem:[#allocation38_spill]] }
  0x50   : > { %s748_s23 = scalar_lea.vmem [#allocation2], %s3398_s30  ;;  %p4704_p8 = pnand %p3686_p6, %p112_p2 }
  0x51   : > { %s756_s3 = sshll.u32 %s748_s23, 4  ;;  %s745_s7 = scalar_lea.sflag [#allocation3], %s744_s21  ;;  %s757_s3 = int_to_ptr.vmem [resolvable:$true] %s756_s3 }
  0x52   : > { %p4285_p9 = pneg %p4704_p8 }
  0x55   : > { %s752_s1 = scalar_lea.hbm %s5584_s4, %s3399_s6  ;;  %s4288_s30 = scalar_lea.hbm %s5584_s4, 8 }
  0x56   : > { %s754_s10 = sshll.u32 %s752_s1, 4  ;;  %s755_s10 = int_to_ptr.hbm [resolvable:$true] %s754_s10 }
  0x57   : > { %s4281_s9 = sshra.s32 %s755_s10, 4  ;;  %s4282_s9 = int_to_ptr.hbm [resolvable:$true] %s4281_s9 }
  0x58   : > { %s4283_s11 = scalar_lea.hbm %s4282_s9, 4  ;;  %p4289_p0 = scmp.lt.s32.totalorder %s4282_s9, %s5584_s4 }
  0x59   : > { %p4284_p7 = scmp.ne.s32.totalorder %s4282_s9, %s4283_s11  ;;  %p4290_p2 = scmp.lt.s32.totalorder %s4288_s30, %s4283_s11 }
  0x5b   : > { %p4286_p10 = pnand %p4285_p9, %p4284_p7  ;;  %p4291_p6 = por %p4290_p2, %p4289_p0 }
  0x5d   : > { %p4287_p11 = pneg %p4286_p10 }
  0x5f   : > { %p4292_p4 = pnand %p4291_p6, %p4287_p11 }
  0x61   : > { %4295 = shalt.err (!%p4292_p4)
}
  0x62   : > { %3668 = dma.hbm_to_vmem [thread:$0]  (!%p4704_p8), %s755_s10, 64, %s757_s3, %s745_s7  }
  0x63   : > { %765 = sbr.rel (%p4572_p3) target bundleno = 2768 (0xad0), region = 104  ;;  %s4721_s23 = sand.u32 (!%p4572_p3), 1, %s4397_s25  }
  0x64   : > { %s3401_s6 = sshll.u32 (!%p4572_p3), %s4721_s23, 2  ;;  %s768_s19 = scalar_lea.sflag (!%p4572_p3), [#allocation3], %s4721_s23 }
  0x65   : > { %s4725_s20 = scalar_lea.vmem (!%p4572_p3), [#allocation2], %s3401_s6 }
  0x68   : > { %4356 = dma.done.wait (%p4686_p12), %s768_s19, 64  }
  0x69   : > { %4358 = vsyncadd (%p4686_p12), %s768_s19, 4294967232 }
  0x6a   : > { %4360 = dma.done.wait (%p117_p1), [#allocation6], 32  }
  0x6b   : > { %4362 = vsyncadd (%p117_p1), [#allocation6], 4294967264 }
  0x6c   : > { %4364 = dma.done.wait (%p117_p1), [#allocation9], 272  }
  0x6d   : > { %4366 = vsyncadd (%p117_p1), [#allocation9], 4294967024 }
  0x6e   : > { %4368 = dma.done.wait (%p117_p1), [#allocation12], 272  }
  0x6f   : > { %4370 = vsyncadd (%p117_p1), [#allocation12], 4294967024 }
  0x70   : > { %4372 = dma.done.wait (%p117_p1), [#allocation15], 512  }
  0x71   : > { %4374 = vsyncadd (%p117_p1), [#allocation15], 4294966784 }
  0x72   : > { %4376 = dma.done.wait (%p117_p1), [#allocation18], 272  }
  0x73   : > { %4378 = vsyncadd (%p117_p1), [#allocation18], 4294967024 }
  0x74   : > { %4380 = dma.done.wait (%p117_p1), [#allocation21], 512  }
  0x75   : > { %4382 = vsyncadd (%p117_p1), [#allocation21], 4294966784 }
  0x76   : > { %4384 = dma.done.wait (%p117_p1), [#allocation24], 16  }
  0x77   : > { %4386 = vsyncadd (%p117_p1), [#allocation24], 4294967280  ;;  %p905_p3 = scmp.lt.s32.totalorder %s4567_s0, 1  ;;  %s5587_s10 = sld [smem:[#allocation36_spill]]  ;;  %vm919_vm0 = vcmask 261120   ;;  %v4422_v4 = vmov 32.0  }
  0x78   : > { %3826 = vrcp.f32 %v4422_v4  ;;  %v3545_v21 = vld [vmem:[#allocation13 + $0x8] sm:$0xff]  ;;  %v3547_v22 = vld [vmem:[#allocation14 + $0x8] sm:$0xff]  ;;  %v3544_v24 = vld [vmem:[#allocation13] sm:$0xff]  ;;  %vm1139_vm8 = vcmask 1043456   ;;  %vm1111_vm9 = vcmask 64512   ;;  %s5588_s1 = sld [smem:[#allocation39_spill]] }
  0x79   : > { %s4761_s7 = scalar_select %p905_p3, %s4567_s0, 1  ;;  %v3549_v23 = vld [vmem:[#allocation16 + $0x8] sm:$0xff]  ;;  %997 = vmatpush.bf16.msra.mxu0 %v3545_v21  ;;  %1029 = vmatpush.bf16.msra.mxu1 %v3547_v22  ;;  %v3546_v25 = vld [vmem:[#allocation14] sm:$0xff]  ;;  %v3548_v26 = vld [vmem:[#allocation16] sm:$0xff] }
  0x7a   : > { %1061 = vmatpush.bf16.msra.mxu2 %v3549_v23  ;;  %s5589_s19 = sld [smem:[#allocation40_spill]]  ;;  %s4424_s8 = smov 112  }
  0x7b   : > { %s3543_s9 = sshll.u32 %s4761_s7, 4  ;;  %s5590_s21 = sld [smem:[#allocation37_spill]] }
  0x7c   : > { %s5591_s11 = sld [smem:[#allocation41_spill]]  ;;  %s4425_s30 = smov 104  }
  0x7d   : > { %s909_s3 = scalar_lea.vmem %s5587_s10, %s3543_s9  ;;  %998 = vmatpush.bf16.msra.mxu0 %v3544_v24  ;;  %1030 = vmatpush.bf16.msra.mxu1 %v3546_v25  ;;  %s5553_s9 = smov 8  }
  0x7e   : > { %v915_v0 = vld [vmem:[%s909_s3] sm:$0xff]  ;;  %v916_v2 = vld [vmem:[%s909_s3 + $0x8] sm:$0xff]  ;;  %v3827_v5 = vpop.eup %3826  ;;  %1062 = vmatpush.bf16.msra.mxu2 %v3548_v26  ;;  %s3418_s3 = sshll.u32 %s4761_s7, 3  ;;  %s4429_s7 = smov 16  }
  0x7f   : > { %v920_v1 = vsel %vm919_vm0, %v915_v0, 0.0  ;;  %v923_v3 = vsel %vm919_vm0, %v916_v2, 0.0  ;;  %v927_v6 = vmul.f32 32.0, %v3827_v5  ;;  %vm931_vm1 = vweird.f32 %v3827_v5  ;;  %s5600_s24 = sld [smem:[#allocation48_spill]] }
  0x80   : > { %921 = vadd.xlane.f32.xlu0 %v920_v1  ;;  %s5601_s10 = sld [smem:[#allocation49_spill]] }
  0x81   : > { %v928_v7 = vsub.f32 1.0, %v927_v6  ;;  %s4829_s6 = scalar_lea.vmem %s5590_s21, %s3418_s3  ;;  %s4423_s3 = smov 120  }
  0x82   : > { %s4428_s21 = smov 24  }
  0x83   : > { %v929_v8 = vmul.f32 %v3827_v5, %v928_v7 }
  0x85   : > { %v930_v9 = vadd.f32 %v3827_v5, %v929_v8 }
  0x87   : > { %v4769_v10 = vsel %vm931_vm1, %v3827_v5, %v930_v9  ;;  %vm1446_vm1 = vcmask 1047556  }
  0x88   : > { %924 = vadd.xlane.f32.xlu0 %v923_v3 }
  0xf3   : > { %v922_v11 = vpop.xlane.xlu0 %921 }
  0xf4   : > { %v933_v12 = vmul.f32 %v4769_v10, %v922_v11 }
  0xf6   : > { %v935_v13 = vsub.f32 %v915_v0, %v933_v12 }
  0xf8   : > { %v937_v14 = vmul.f32 %v935_v13, %v935_v13 }
  0xfa   : > { %v939_v15 = vsel %vm919_vm0, %v937_v14, 0.0 }
  0xfb   : > { %940 = vadd.xlane.f32.xlu1 %v939_v15  ;;  %v925_v16 = vpop.xlane.xlu0 %924 }
  0xfc   : > { %v934_v17 = vmul.f32 %v4769_v10, %v925_v16 }
  0xfe   : > { %v936_v18 = vsub.f32 %v916_v2, %v934_v17 }
 0x100   : > { %v938_v19 = vmul.f32 %v936_v18, %v936_v18 }
 0x102   : > { %v942_v20 = vsel %vm919_vm0, %v938_v19, 0.0 }
 0x103   : > { %943 = vadd.xlane.f32.xlu1 %v942_v20 }
 0x16e   : > { %v941_v27 = vpop.xlane.xlu1 %940 }
 0x16f   : > { %v945_v28 = vmul.f32 %v941_v27, %v4769_v10 }
 0x171   : > { %v947_v29 = vadd.f32 1e-06, %v945_v28 }
 0x173   : > { %3828 = vrsqrt.f32 %v947_v29  ;;  %vm955_vm3 = vweird.f32 %v947_v29 }
 0x176   : > { %v944_v30 = vpop.xlane.xlu1 %943 }
 0x177   : > { %v946_v31 = vmul.f32 %v944_v30, %v4769_v10 }
 0x179   : > { %v3829_v32 = vpop.eup %3828  ;;  %v948_v33 = vadd.f32 1e-06, %v946_v31  ;;  %v3553_v31 = vld [vmem:[%s5588_s1 + $0x8] sm:$0xff] }
 0x17a   : > { %v950_v34 = vmul.f32 %v3829_v32, %v947_v29  ;;  %vm956_vm2 = vweird.f32 %v3829_v32 }
 0x17b   : > { %3830 = vrsqrt.f32 %v948_v33  ;;  %vm957_vm5 = vmor %vm955_vm3, %vm956_vm2  ;;  %vm965_vm6 = vweird.f32 %v948_v33  ;;  %vm2298_vm2 = vcmask 130048  }
 0x17c   : > { %v951_v35 = vmul.f32 %v3829_v32, %v950_v34  ;;  %v3552_v34 = vld [vmem:[%s5588_s1] sm:$0xff] }
 0x17e   : > { %v952_v36 = vmul.f32 0.5, %v951_v35  ;;  %v3554_v35 = vld [vmem:[%s5589_s19] sm:$0xff] }
 0x180   : > { %v953_v38 = vsub.f32 1.5, %v952_v36 }
 0x181   : > { %v3831_v37 = vpop.eup %3830 }
 0x182   : > { %v960_v39 = vmul.f32 %v3831_v37, %v948_v33  ;;  %v954_v41 = vmul.f32 %v3829_v32, %v953_v38  ;;  %vm966_vm4 = vweird.f32 %v3831_v37 }
 0x183   : > { %vm967_vm7 = vmor %vm965_vm6, %vm966_vm4 }
 0x184   : > { %v961_v40 = vmul.f32 %v3831_v37, %v960_v39  ;;  %v958_v44 = vsel %vm957_vm5, %v3829_v32, %v954_v41  ;;  %v3555_v32 = vld [vmem:[%s5589_s19 + $0x8] sm:$0xff] }
 0x185   : > { %v4777_v47 = vmul.f32 %v958_v44, %v935_v13 }
 0x186   : > { %v962_v42 = vmul.f32 0.5, %v961_v40 }
 0x187   : > { %v1269_v13 = vsel %vm919_vm0, %v4777_v47, 0.0 }
 0x188   : > { %v963_v43 = vsub.f32 1.5, %v962_v42 }
 0x18a   : > { %v964_v45 = vmul.f32 %v3831_v37, %v963_v43 }
 0x18c   : > { %v968_v46 = vsel %vm967_vm7, %v3831_v37, %v964_v45 }
 0x18d   : > { %v4779_v48 = vmul.f32 %v968_v46, %v936_v18 }
 0x18f   : > { %v1272_v49 = vsel %vm919_vm0, %v4779_v48, 0.0  ;;  %v971_v50 = vpack.c.bf16 %v4779_v48, %v4777_v47 }
 0x190   : > { %1273 = vadd.xlane.f32.xlu0 %v1272_v49 }
 0x191   : > { %3427 = vmatmul.msk.bf16.vlgmr.msra.gmra.mxu0 %vm919_vm0, %v971_v50  ;;  %3436 = vmatmul.msk.bf16.vlgmr.msra.gmra.mxu1 %vm919_vm0, %v971_v50 }
 0x192   : > { %3445 = vmatmul.msk.bf16.vlgmr.msra.gmra.mxu2 %vm919_vm0, %v971_v50 }
 0x203   : > { %v1274_v7 = vpop.xlane.xlu0 %1273 }
 0x204   : > { %v1276_v8 = vmul.f32 %v1274_v7, %v4769_v10 }
 0x206   : > { %v4795_v12 = vsub.f32 %v4779_v48, %v1276_v8 }
 0x208   : > { %v1280_v14 = vmul.f32 %v4795_v12, %v4795_v12 }
 0x20a   : > { %v1284_v15 = vsel %vm919_vm0, %v1280_v14, 0.0 }
 0x20e   : > { %v1032_v51 = vpop.f32.mrf.mxu1  ;;  %v1000_v54 = vpop.f32.mrf.mxu0 }
 0x20f   : > { %v1037_v52 = vpack.c.bf16 %v1032_v51, %v1032_v51  ;;  %v1005_v58 = vpack.c.bf16 %v1000_v54, %v1000_v54 }
 0x211   : > { %v1075_v53 = vsel %vm919_vm0, %v1037_v52, 0 }
 0x212   : > { %1084 = vmatpush.bf16.xpose.msra.mxu3 %v1075_v53  ;;  %v917_v53 = vld [vmem:[%s4829_s6] sm:$0x7f] }
 0x215   : > { %v1064_v55 = vpop.f32.mrf.mxu2 }
 0x216   : > { %v1069_v56 = vpack.c.bf16 %v1064_v55, %v1064_v55  ;;  %v1034_v57 = vpop.f32.mrf.mxu1  ;;  %v1002_v62 = vpop.f32.mrf.mxu0 }
 0x217   : > { %v1038_v59 = vpack.c.bf16 %v1034_v57, %v1034_v57  ;;  %v1006_v1 = vpack.c.bf16 %v1002_v62, %v1002_v62  ;;  %v4833_v57 = vadd.f32 1.0, %v917_v53 }
 0x218   : > { %v1141_v60 = vsel %vm1139_vm8, %v1069_v56, 0 }
 0x219   : > { %1150 = vmatpush.bf16.msrb.mxu1 %v1141_v60  ;;  %3446 = vmatmul.msk.bf16.vlgmr.msra.gmra.mxu3 %vm919_vm0, %v1005_v58  ;;  %v1094_v61 = vsel %vm919_vm0, %v1038_v59, 0  ;;  %v1313_v62 = vperm.slane %v4833_v57, 1 }
 0x21a   : > { %1103 = vmatpush.bf16.xpose.msrb.mxu0 %v1094_v61 }
 0x21d   : > { %v1066_v63 = vpop.f32.mrf.mxu2  ;;  %1383 = vmatpush.bf16.msra.mxu1 %v3555_v32  ;;  %v3550_v32 = vld [vmem:[#allocation17] sm:$0xff] }
 0x21e   : > { %v1070_v0 = vpack.c.bf16 %v1066_v63, %v1066_v63 }
 0x220   : > { %v1160_v2 = vsel %vm1139_vm8, %v1070_v0, 0 }
 0x221   : > { %1169 = vmatpush.bf16.msrb.mxu2 %v1160_v2  ;;  %3447 = vmatmul.msk.bf16.vlgmr.msrb.gmra.mxu0 %vm919_vm0, %v1006_v1 }
 0x222   : > { %1349 = vmatpush.bf16.msra.mxu0 %v3553_v31  ;;  %1384 = vmatpush.bf16.msra.mxu1 %v3554_v35  ;;  %v3551_v31 = vld [vmem:[#allocation17 + $0x8] sm:$0xff]  ;;  %v4426_v35 = vmov 1983009808  }
 0x223   : > { %1205 = vmatpush.bf16.msrb.mxu3 %v3551_v31 }
 0x226   : > { %1350 = vmatpush.bf16.msra.mxu0 %v3552_v34 }
 0x227   : > { %1206 = vmatpush.bf16.msrb.mxu3 %v3550_v32 }
 0x29c   : > { %v1086_v3 = vpop.f32.mrf.mxu3 }
 0x29d   : > { %v1109_v4 = vmul.f32 0.17677669, %v1086_v3  ;;  %v1316_v3 = vperm.slane %v917_v53, 0 }
 0x29e   : > { %v1105_v5 = vpop.f32.mrf.mxu0 }
 0x29f   : > { %v1112_v6 = vsel %vm1111_vm9, %v1109_v4, -inf  ;;  %v1110_v26 = vmul.f32 0.17677669, %v1105_v5 }
 0x2a0   : > { %1113 = vmax.xlane.f32.xlu2 %v1112_v6 }
 0x2a1   : > { %v1115_v27 = vsel %vm1111_vm9, %v1110_v26, -inf }
 0x2a4   : > { %v1088_v9 = vpop.f32.mrf.mxu3 }
 0x2a6   : > { %v1107_v11 = vpop.f32.mrf.mxu0 }
 0x2a7   : > { %v3557_v11 = vld [vmem:[%s5591_s11 + $0x8] sm:$0xff] }
 0x2a8   : > { %1270 = vadd.xlane.f32.xlu2 %v1269_v13  ;;  %1417 = vmatpush.bf16.msra.mxu2 %v3557_v11 }
 0x2b0   : > { %1285 = vadd.xlane.f32.xlu2 %v1284_v15 }
 0x313   : > { %v1114_v16 = vpop.xlane.xlu2 %1113 }
 0x314   : > { %v1118_v17 = vsub.f32 %v1109_v4, %v1114_v16 }
 0x316   : > { %v1120_v18 = vmul.f32 1.442695, %v1118_v17 }
 0x318   : > { %3832 = vpow2.f32 %v1120_v18 }
 0x31b   : > { %v1271_v19 = vpop.xlane.xlu2 %1270 }
 0x31c   : > { %v1275_v20 = vmul.f32 %v1271_v19, %v4769_v10 }
 0x31e   : > { %v3833_v21 = vpop.eup %3832  ;;  %v4804_v22 = vsub.f32 %v4777_v47, %v1275_v20 }
 0x31f   : > { %v1124_v23 = vsel %vm1111_vm9, %v3833_v21, 0.0 }
 0x320   : > { %1125 = vadd.xlane.f32.xlu0 %v1124_v23  ;;  %v1279_v24 = vmul.f32 %v4804_v22, %v4804_v22 }
 0x322   : > { %v1281_v25 = vsel %vm919_vm0, %v1279_v24, 0.0 }
 0x323   : > { %1282 = vadd.xlane.f32.xlu1 %v1281_v25  ;;  %v1286_v28 = vpop.xlane.xlu2 %1285 }
 0x324   : > { %v1288_v29 = vmul.f32 %v1286_v28, %v4769_v10 }
 0x326   : > { %v1290_v30 = vadd.f32 1e-06, %v1288_v29 }
 0x328   : > { %3834 = vrsqrt.f32 %v1290_v30  ;;  %vm1307_vm11 = vweird.f32 %v1290_v30 }
 0x32b   : > { %1116 = vmax.xlane.f32.xlu1 %v1115_v27  ;;  %v3819_v27 = vld [vmem:[#allocation5] ss:$0 sm:$0xff] }
 0x32e   : > { %v3835_v33 = vpop.eup %3834 }
 0x32f   : > { %v1302_v36 = vmul.f32 %v3835_v33, %v1290_v30  ;;  %vm1308_vm10 = vweird.f32 %v3835_v33 }
 0x330   : > { %vm1309_vm12 = vmor %vm1307_vm11, %vm1308_vm10 }
 0x331   : > { %v1303_v38 = vmul.f32 %v3835_v33, %v1302_v36  ;;  %v1451_v36 = vunpack.c.l.s4 %v4426_v35 }
 0x333   : > { %v1304_v43 = vmul.f32 0.5, %v1303_v38 }
 0x335   : > { %v1305_v46 = vsub.f32 1.5, %v1304_v43 }
 0x337   : > { %v1306_v54 = vmul.f32 %v3835_v33, %v1305_v46 }
 0x339   : > { %v1310_v58 = vsel %vm1309_vm12, %v3835_v33, %v1306_v54 }
 0x33a   : > { %v1312_v63 = vmul.f32 %v1310_v58, %v4795_v12  ;;  %v3556_v12 = vld [vmem:[%s5591_s11] sm:$0xff] }
 0x33b   : > { %1418 = vmatpush.bf16.msra.mxu2 %v3556_v12 }
 0x33c   : > { %v1315_v4 = vmul.f32 %v1313_v62, %v1312_v63 }
 0x33e   : > { %v1318_v7 = vadd.f32 %v1316_v3, %v1315_v4 }
 0x393   : > { %v1126_v37 = vpop.xlane.xlu0 %1125 }
 0x394   : > { %3836 = vrcp.f32 %v1126_v37 }
 0x396   : > { %v1283_v39 = vpop.xlane.xlu1 %1282 }
 0x397   : > { %v1287_v40 = vmul.f32 %v1283_v39, %v4769_v10 }
 0x399   : > { %v1289_v41 = vadd.f32 1e-06, %v1287_v40 }
 0x39a   : > { %v3837_v42 = vpop.eup %3836 }
 0x39b   : > { %v1132_v44 = vmul.f32 %v3837_v42, %v3833_v21  ;;  %3838 = vrsqrt.f32 %v1289_v41  ;;  %vm1297_vm14 = vweird.f32 %v1289_v41  ;;  %v3820_v21 = vld [vmem:[#allocation7] ss:$0 sm:$0xff] }
 0x39d   : > { %v1134_v45 = vpack.c.bf16 %v1132_v44, %v1132_v44 }
 0x39e   : > { %v1117_v49 = vpop.xlane.xlu1 %1116 }
 0x39f   : > { %v1119_v50 = vsub.f32 %v1110_v26, %v1117_v49  ;;  %3448 = vmatmul.msk.bf16.vlgmr.msrb.gmra.mxu1 %vm1111_vm9, %v1134_v45 }
 0x3a1   : > { %v3839_v51 = vpop.eup %3838  ;;  %v1122_v52 = vmul.f32 1.442695, %v1119_v50 }
 0x3a2   : > { %v1292_v55 = vmul.f32 %v3839_v51, %v1289_v41  ;;  %vm1298_vm13 = vweird.f32 %v3839_v51  ;;  %v4861_v41 = vunpack.c.0.s8 %v1451_v36 }
 0x3a3   : > { %3840 = vpow2.f32 %v1122_v52  ;;  %vm1299_vm15 = vmor %vm1297_vm14, %vm1298_vm13 }
 0x3a4   : > { %v1293_v56 = vmul.f32 %v3839_v51, %v1292_v55 }
 0x3a6   : > { %v1294_v59 = vmul.f32 0.5, %v1293_v56 }
 0x3a8   : > { %v1295_v60 = vsub.f32 1.5, %v1294_v59 }
 0x3a9   : > { %v3841_v61 = vpop.eup %3840 }
 0x3aa   : > { %v1296_v0 = vmul.f32 %v3839_v51, %v1295_v60  ;;  %v1127_v1 = vsel %vm1111_vm9, %v3841_v61, 0.0 }
 0x3ab   : > { %1128 = vadd.xlane.f32.xlu2 %v1127_v1 }
 0x3ac   : > { %v1300_v2 = vsel %vm1299_vm15, %v3839_v51, %v1296_v0  ;;  %v4427_v51 = vmov 1934713408  }
 0x3ad   : > { %v1311_v5 = vmul.f32 %v1300_v2, %v4804_v22  ;;  %v1475_v52 = vunpack.c.l.s4 %v4427_v51 }
 0x3af   : > { %v1314_v6 = vmul.f32 %v1313_v62, %v1311_v5  ;;  %v4875_v63 = vunpack.c.0.s8 %v1475_v52 }
 0x3b1   : > { %v1317_v8 = vadd.f32 %v1316_v3, %v1314_v6 }
 0x3b3   : > { %v1319_v9 = vpack.c.bf16 %v1318_v7, %v1317_v8 }
 0x3b5   : > { %3467 = vmatmul.msk.bf16.vlgmr.msra.gmra.mxu0 %vm919_vm0, %v1319_v9  ;;  %3476 = vmatmul.msk.bf16.vlgmr.msra.gmra.mxu1 %vm919_vm0, %v1319_v9 }
 0x41c   : > { %v1152_v13 = vpop.f32.mrf.mxu1 }
 0x41e   : > { %v1129_v14 = vpop.xlane.xlu2 %1128 }
 0x41f   : > { %3842 = vrcp.f32 %v1129_v14 }
 0x424   : > { %v1154_v15 = vpop.f32.mrf.mxu1 }
 0x425   : > { %v3843_v16 = vpop.eup %3842 }
 0x426   : > { %v1133_v17 = vmul.f32 %v3843_v16, %v3841_v61 }
 0x428   : > { %v1135_v18 = vpack.c.bf16 %v1133_v17, %v1133_v17 }
 0x42a   : > { %3449 = vmatmul.msk.bf16.vlgmr.msrb.gmra.mxu2 %vm1111_vm9, %v1135_v18 }
 0x432   : > { %v1386_v19 = vpop.f32.mrf.mxu1  ;;  %v1352_v20 = vpop.f32.mrf.mxu0 }
 0x433   : > { %v4849_v23 = vadd.f32 %v3820_v21, %v1386_v19  ;;  %v1353_v29 = vadd.f32 %v3819_v27, %v1352_v20 }
 0x435   : > { %v1448_v40 = vrot.slane %v1353_v29, 4  ;;  %v1696_v59 = vrot.slane %v4849_v23, 4 }
 0x43a   : > { %v1388_v22 = vpop.f32.mrf.mxu1  ;;  %3485 = vmatmul.msk.bf16.vlgmr.msra.gmra.mxu2 %vm919_vm0, %v1319_v9  ;;  %v1354_v26 = vpop.f32.mrf.mxu0 }
 0x43b   : > { %v4851_v24 = vadd.f32 %v3820_v21, %v1388_v22  ;;  %v1355_v28 = vadd.f32 %v3819_v27, %v1354_v26 }
 0x43d   : > { %v3759_v25 = vpack.i.bf16 %v4851_v24, %v4849_v23  ;;  %v3784_v30 = vpack.i.bf16 %v1355_v28, %v1353_v29  ;;  %v1504_v39 = vrot.slane %v1355_v28, 4  ;;  %v1752_v0 = vrot.slane %v4851_v24, 4 }
 0x43f   : > { %3760 = vrot.lane.b32.xlu0 %v3759_v25, %s4423_s3  ;;  %3765 = vrot.lane.b32.xlu1 %v3759_v25, %s4424_s8 }
 0x440   : > { %3775 = vrot.lane.b32.xlu2 %v3759_v25, %s4425_s30 }
 0x447   : > { %3785 = vrot.lane.b32.xlu1 %v3784_v30, %s4425_s30  ;;  %3770 = vrot.lane.b32.xlu0 %v3784_v30, %s4423_s3 }
 0x448   : > { %3780 = vrot.lane.b32.xlu2 %v3784_v30, %s4424_s8 }
 0x49a   : > { %v3776_v33 = vpop.permute.xlu2 %3775 }
 0x49b   : > { %v3778_v46 = vunpack.i.h.bf16 %v3776_v33  ;;  %v3777_v49 = vunpack.i.l.bf16 %v3776_v33 }
 0x49d   : > { %v1762_v60 = vrot.slane %v3778_v46, 4  ;;  %v1706_v61 = vrot.slane %v3777_v49, 4 }
 0x4a2   : > { %v3781_v34 = vpop.permute.xlu2 %3780 }
 0x4a3   : > { %v3783_v37 = vunpack.i.h.bf16 %v3781_v34  ;;  %v3782_v38 = vunpack.i.l.bf16 %v3781_v34 }
 0x4a5   : > { %v1502_v42 = vrot.slane %v3783_v37, 4  ;;  %v1505_v43 = vsel %vm1446_vm1, %v3783_v37, %v1504_v39  ;;  %v1445_v44 = vrot.slane %v3782_v38, 4  ;;  %v1449_v45 = vsel %vm1446_vm1, %v3782_v38, %v1448_v40 }
 0x4a6   : > { %v4866_v54 = vperm.slane %v1505_v43, %v4861_v41  ;;  %v4869_v55 = vperm.slane %v1449_v45, %v4861_v41 }
 0x4a7   : > { %v1503_v56 = vsel %vm1446_vm1, %v1502_v42, %v1355_v28  ;;  %v1447_v58 = vsel %vm1446_vm1, %v1445_v44, %v1353_v29 }
 0x4a8   : > { %v4879_v6 = vperm.slane %v1503_v56, %v4861_v41  ;;  %v1540_v7 = vrot.slane %v4866_v54, 4  ;;  %v4883_v8 = vperm.slane %v1447_v58, %v4861_v41  ;;  %v1484_v9 = vrot.slane %v4869_v55, 4 }
 0x4aa   : > { %v1528_v38 = vrot.slane %v4879_v6, 4  ;;  %v1472_v39 = vrot.slane %v4883_v8, 4 }
 0x4ad   : > { %v1171_v50 = vpop.f32.mrf.mxu2 }
 0x4ae   : > { %v1175_v53 = vpack.c.bf16 %v1171_v50, %v1152_v13 }
 0x4b0   : > { %3458 = vmatmul.msk.bf16.vlgmr.msrb.gmra.mxu3 %vm919_vm0, %v1175_v53 }
 0x4b1   : > { %v3761_v62 = vpop.permute.xlu0 %3760  ;;  %v3766_v1 = vpop.permute.xlu1 %3765 }
 0x4b2   : > { %v3763_v2 = vunpack.i.h.bf16 %v3761_v62  ;;  %v3762_v3 = vunpack.i.l.bf16 %v3761_v62  ;;  %v3768_v4 = vunpack.i.h.bf16 %v3766_v1  ;;  %v3767_v5 = vunpack.i.l.bf16 %v3766_v1 }
 0x4b4   : > { %v1764_v11 = vrot.slane %v3763_v2, 4  ;;  %v1707_v12 = vsel %vm1446_vm1, %v1706_v61, %v3762_v3  ;;  %v1708_v13 = vrot.slane %v3762_v3, 4  ;;  %v1763_v14 = vsel %vm1446_vm1, %v1762_v60, %v3763_v2 }
 0x4b5   : > { %v1713_v15 = vperm.slane %v1707_v12, %v4861_v41  ;;  %v1769_v16 = vperm.slane %v1763_v14, %v4861_v41  ;;  %v1750_v17 = vrot.slane %v3768_v4, 4  ;;  %v1753_v18 = vsel %vm1446_vm1, %v3768_v4, %v1752_v0  ;;  %v1173_v19 = vpop.f32.mrf.mxu2 }
 0x4b6   : > { %v1709_v20 = vsel %vm1446_vm1, %v3777_v49, %v1708_v13  ;;  %v1765_v21 = vsel %vm1446_vm1, %v3778_v46, %v1764_v11  ;;  %v1761_v22 = vperm.slane %v1753_v18, %v4861_v41  ;;  %v1694_v25 = vrot.slane %v3767_v5, 4 }
 0x4b7   : > { %v1717_v26 = vperm.slane %v1709_v20, %v4861_v41  ;;  %v1718_v27 = vrot.slane %v1713_v15, 4  ;;  %v1773_v28 = vperm.slane %v1765_v21, %v4861_v41  ;;  %v1774_v29 = vrot.slane %v1769_v16, 4 }
 0x4b8   : > { %v1751_v30 = vsel %vm1446_vm1, %v1750_v17, %v4851_v24  ;;  %v1788_v31 = vrot.slane %v1761_v22, 4  ;;  %v1695_v32 = vsel %vm1446_vm1, %v1694_v25, %v4849_v23  ;;  %v1697_v33 = vsel %vm1446_vm1, %v3767_v5, %v1696_v59 }
 0x4b9   : > { %v1730_v34 = vrot.slane %v1717_v26, 4  ;;  %v1786_v35 = vrot.slane %v1773_v28, 4  ;;  %v1757_v36 = vperm.slane %v1751_v30, %v4861_v41  ;;  %v1701_v37 = vperm.slane %v1695_v32, %v4861_v41  ;;  %v3786_v58 = vpop.permute.xlu1 %3785 }
 0x4ba   : > { %v1789_v40 = vsel %vm1446_vm1, %v1773_v28, %v1788_v31  ;;  %v1705_v24 = vperm.slane %v1697_v33, %v4861_v41  ;;  %v3788_v11 = vunpack.i.h.bf16 %v3786_v58  ;;  %v3787_v12 = vunpack.i.l.bf16 %v3786_v58  ;;  %v3771_v28 = vpop.permute.xlu0 %3770 }
 0x4bb   : > { %v1775_v42 = vsel %vm1446_vm1, %v1774_v29, %v1757_v36  ;;  %v1776_v43 = vrot.slane %v1757_v36, 4  ;;  %v1787_v23 = vsel %vm1446_vm1, %v1786_v35, %v1761_v22  ;;  %v1797_v44 = vperm.slane %v1789_v40, %v4875_v63 }
 0x4bc   : > { %v1781_v45 = vperm.slane %v1775_v42, %v4875_v63  ;;  %v1793_v46 = vperm.slane %v1787_v23, %v4875_v63  ;;  %v1719_v49 = vsel %vm1446_vm1, %v1718_v27, %v1701_v37  ;;  %v1720_v50 = vrot.slane %v1701_v37, 4 }
 0x4bd   : > { %v1777_v51 = vsel %vm1446_vm1, %v1769_v16, %v1776_v43  ;;  %v1804_v52 = vrot.slane %v1797_v44, 4  ;;  %v1725_v53 = vperm.slane %v1719_v49, %v4875_v63  ;;  %v1731_v56 = vsel %vm1446_vm1, %v1730_v34, %v1705_v24 }
 0x4be   : > { %v1785_v59 = vperm.slane %v1777_v51, %v4875_v63  ;;  %v1798_v60 = vrot.slane %v1781_v45, 4  ;;  %v1802_v61 = vrot.slane %v1793_v46, 4  ;;  %v1721_v62 = vsel %vm1446_vm1, %v1713_v15, %v1720_v50 }
 0x4bf   : > { %v1805_v0 = vsel %vm1446_vm1, 0.0, %v1804_v52  ;;  %v1871_v1 = vsel %vm1446_vm1, %v1804_v52, %v1793_v46  ;;  %v1729_v2 = vperm.slane %v1721_v62, %v4875_v63  ;;  %v1732_v3 = vrot.slane %v1705_v24, 4 }
 0x4c0   : > { %v4922_v4 = vsel %vm1446_vm1, 0.0, %v1798_v60  ;;  %v1800_v5 = vrot.slane %v1785_v59, 4  ;;  %v1803_v13 = vsel %vm1446_vm1, 0.0, %v1802_v61  ;;  %v1876_v14 = vrot.slane %v1805_v0, 4 }
 0x4c1   : > { %v1733_v16 = vsel %vm1446_vm1, %v1717_v26, %v1732_v3  ;;  %v1737_v15 = vperm.slane %v1731_v56, %v4875_v63  ;;  %v4931_v18 = vperm.slane %v1871_v1, %v4861_v41  ;;  %v1744_v20 = vrot.slane %v1729_v2, 4 }
 0x4c2   : > { %v4928_v17 = vsel %vm1446_vm1, 0.0, %v1800_v5  ;;  %v1741_v19 = vperm.slane %v1733_v16, %v4875_v63  ;;  %v4935_v21 = vsel %vm1446_vm1, %v1800_v5, %v1781_v45  ;;  %v1742_v25 = vrot.slane %v1725_v53, 4 }
 0x4c3   : > { %v1865_v22 = vrot.slane %v4928_v17, 4  ;;  %v1746_v27 = vrot.slane %v1737_v15, 4  ;;  %v1877_v26 = vsel %vm1446_vm1, %v1876_v14, %v1803_v13  ;;  %v1745_v29 = vsel %vm1446_vm1, 0.0, %v1744_v20 }
 0x4c4   : > { %v1748_v30 = vrot.slane %v1741_v19, 4  ;;  %v1806_v31 = vsel %vm1446_vm1, %v1744_v20, %v1725_v53  ;;  %v1811_v33 = vrot.slane %v1745_v29, 4  ;;  %v1514_v34 = vrot.slane %v3788_v11, 4 }
 0x4c5   : > { %v1747_v32 = vsel %vm1446_vm1, 0.0, %v1746_v27  ;;  %v1458_v35 = vrot.slane %v3787_v12, 4  ;;  %v3773_v40 = vunpack.i.h.bf16 %v3771_v28  ;;  %v3772_v24 = vunpack.i.l.bf16 %v3771_v28 }
 0x4c6   : > { %v1749_v36 = vsel %vm1446_vm1, 0.0, %v1748_v30  ;;  %v1817_v37 = vsel %vm1446_vm1, %v1748_v30, %v1737_v15  ;;  %v4945_v42 = vperm.slane %v1877_v26, %v4861_v41  ;;  %v1743_v43 = vsel %vm1446_vm1, 0.0, %v1742_v25 }
 0x4c7   : > { %v4949_v23 = vperm.slane %v1817_v37, %v4861_v41  ;;  %v1822_v44 = vrot.slane %v1749_v36, 4  ;;  %v1515_v45 = vsel %vm1446_vm1, %v1514_v34, %v3773_v40  ;;  %v1516_v46 = vrot.slane %v3773_v40, 4 }
 0x4c8   : > { %v1459_v49 = vsel %vm1446_vm1, %v1458_v35, %v3772_v24  ;;  %v1460_v50 = vrot.slane %v3772_v24, 4  ;;  %v1521_v52 = vperm.slane %v1515_v45, %v4861_v41  ;;  %v4957_v56 = vperm.slane %v1806_v31, %v4861_v41 }
 0x4c9   : > { %v1823_v51 = vsel %vm1446_vm1, %v1822_v44, %v1747_v32  ;;  %v1465_v53 = vperm.slane %v1459_v49, %v4861_v41  ;;  %v1517_v59 = vsel %vm1446_vm1, %v3788_v11, %v1516_v46  ;;  %v1812_v61 = vsel %vm1446_vm1, %v1811_v33, %v1743_v43 }
 0x4ca   : > { %v4960_v58 = vperm.slane %v1823_v51, %v4861_v41  ;;  %v1461_v60 = vsel %vm1446_vm1, %v3787_v12, %v1460_v50  ;;  %v1525_v62 = vperm.slane %v1517_v59, %v4861_v41  ;;  %v1526_v0 = vrot.slane %v1521_v52, 4 }
 0x4cb   : > { %v1529_v1 = vsel %vm1446_vm1, %v1521_v52, %v1528_v38  ;;  %v1469_v2 = vperm.slane %v1461_v60, %v4861_v41  ;;  %v1470_v5 = vrot.slane %v1465_v53, 4  ;;  %v1473_v11 = vsel %vm1446_vm1, %v1465_v53, %v1472_v39 }
 0x4cc   : > { %v1537_v3 = vperm.slane %v1529_v1, %v4875_v63  ;;  %v4975_v12 = vperm.slane %v1812_v61, %v4861_v41  ;;  %v1527_v13 = vsel %vm1446_vm1, %v1526_v0, %v4879_v6  ;;  %v1538_v14 = vrot.slane %v1525_v62, 4 }
 0x4cd   : > { %v1541_v38 = vsel %vm1446_vm1, %v1525_v62, %v1540_v7  ;;  %v1481_v16 = vperm.slane %v1473_v11, %v4875_v63  ;;  %v1533_v15 = vperm.slane %v1527_v13, %v4875_v63  ;;  %v1471_v39 = vsel %vm1446_vm1, %v1470_v5, %v4883_v8 }
 0x4ce   : > { %v1549_v19 = vperm.slane %v1541_v38, %v4875_v63  ;;  %v1552_v20 = vrot.slane %v1537_v3, 4  ;;  %v1539_v25 = vsel %vm1446_vm1, %v1538_v14, %v4866_v54  ;;  %v1477_v6 = vperm.slane %v1471_v39, %v4875_v63 }
 0x4cf   : > { %v1482_v27 = vrot.slane %v1469_v2, 4  ;;  %v1485_v7 = vsel %vm1446_vm1, %v1469_v2, %v1484_v9  ;;  %v1545_v28 = vperm.slane %v1539_v25, %v4875_v63  ;;  %v1550_v26 = vrot.slane %v1533_v15, 4 }
 0x4d0   : > { %v1553_v29 = vsel %vm1446_vm1, 0.0, %v1552_v20  ;;  %v1556_v30 = vrot.slane %v1549_v19, 4  ;;  %v1612_v31 = vsel %vm1446_vm1, %v1552_v20, %v1533_v15  ;;  %v1493_v54 = vperm.slane %v1485_v7, %v4875_v63 }
 0x4d1   : > { %v1617_v32 = vrot.slane %v1553_v29, 4  ;;  %v1483_v8 = vsel %vm1446_vm1, %v1482_v27, %v4869_v55  ;;  %v1551_v33 = vsel %vm1446_vm1, 0.0, %v1550_v26  ;;  %v1554_v34 = vrot.slane %v1545_v28, 4 }
 0x4d2   : > { %v1557_v35 = vsel %vm1446_vm1, 0.0, %v1556_v30  ;;  %v5002_v9 = vperm.slane %v1612_v31, %v4861_v41  ;;  %v1623_v37 = vsel %vm1446_vm1, %v1556_v30, %v1545_v28  ;;  %v1489_v24 = vperm.slane %v1483_v8, %v4875_v63 }
 0x4d3   : > { %v1618_v36 = vsel %vm1446_vm1, %v1617_v32, %v1551_v33  ;;  %v1628_v40 = vrot.slane %v1557_v35, 4  ;;  %v1555_v43 = vsel %vm1446_vm1, 0.0, %v1554_v34  ;;  %v5012_v44 = vperm.slane %v1623_v37, %v4861_v41 }
 0x4d4   : > { %v5009_v55 = vperm.slane %v1618_v36, %v4861_v41  ;;  %v1636_v45 = vrot.slane %v5002_v9, 4  ;;  %v1494_v49 = vrot.slane %v1477_v6, 4  ;;  %v1496_v50 = vrot.slane %v1481_v16, 4 }
 0x4d5   : > { %v1629_v46 = vsel %vm1446_vm1, %v1628_v40, %v1555_v43  ;;  %v1498_v51 = vrot.slane %v1489_v24, 4  ;;  %v1648_v59 = vrot.slane %v5012_v44, 4  ;;  %v1500_v60 = vrot.slane %v1493_v54, 4 }
 0x4d6   : > { %v5017_v52 = vperm.slane %v1629_v46, %v4861_v41  ;;  %v1634_v53 = vrot.slane %v5009_v55, 4  ;;  %v1495_v61 = vsel %vm1446_vm1, 0.0, %v1494_v49  ;;  %v1497_v62 = vsel %vm1446_vm1, 0.0, %v1496_v50 }
 0x4d7   : > { %v1499_v0 = vsel %vm1446_vm1, 0.0, %v1498_v51  ;;  %v1558_v1 = vsel %vm1446_vm1, %v1496_v50, %v1477_v6  ;;  %v1501_v3 = vsel %vm1446_vm1, 0.0, %v1500_v60  ;;  %v1563_v11 = vrot.slane %v1497_v62, 4 }
 0x4d8   : > { %v1646_v2 = vrot.slane %v5017_v52, 4  ;;  %v5028_v5 = vperm.slane %v1558_v1, %v4861_v41  ;;  %v1569_v13 = vsel %vm1446_vm1, %v1500_v60, %v1489_v24  ;;  %v1574_v14 = vrot.slane %v1501_v3, 4 }
 0x4d9   : > { %v1830_v38 = vrot.slane %v4957_v56, 4  ;;  %v1842_v16 = vrot.slane %v4949_v23, 4  ;;  %v1564_v15 = vsel %vm1446_vm1, %v1563_v11, %v1495_v61  ;;  %v5035_v19 = vperm.slane %v1569_v13, %v4861_v41 }
 0x4da   : > { %v1582_v20 = vrot.slane %v5028_v5, 4  ;;  %v1864_v39 = vperm.slane %v4935_v21, %v4861_v41  ;;  %v5041_v25 = vperm.slane %v1564_v15, %v4861_v41  ;;  %v1575_v6 = vsel %vm1446_vm1, %v1574_v14, %v1499_v0 }
 0x4db   : > { %v1831_v27 = vsel %vm1446_vm1, %v4975_v12, %v1830_v38  ;;  %v1843_v7 = vsel %vm1446_vm1, %v4960_v58, %v1842_v16  ;;  %v5049_v28 = vperm.slane %v1575_v6, %v4861_v41  ;;  %v1594_v26 = vrot.slane %v5035_v19, 4 }
 0x4dc   : > { %v1839_v29 = vperm.slane %v1831_v27, %v4875_v63  ;;  %v1851_v21 = vperm.slane %v1843_v7, %v4875_v63  ;;  %v1580_v30 = vrot.slane %v5041_v25, 4  ;;  %v1866_v31 = vsel %vm1446_vm1, %v1865_v22, %v4922_v4 }
 0x4dd   : > { %v1884_v32 = vrot.slane %v1864_v39, 4  ;;  %v1896_v8 = vrot.slane %v4931_v18, 4  ;;  %v1592_v54 = vrot.slane %v5049_v28, 4  ;;  %v1870_v34 = vperm.slane %v1866_v31, %v4861_v41 }
 0x4de   : > { %v1856_v33 = vrot.slane %v1851_v21, 4  ;;  %v1828_v35 = vrot.slane %v4975_v12, 4  ;;  %v1840_v37 = vrot.slane %v4960_v58, 4  ;;  %v1894_v40 = vrot.slane %v4945_v42, 4 }
 0x4df   : > { %v1897_v36 = vsel %vm1446_vm1, %v4945_v42, %v1896_v8  ;;  %v1858_v17 = vrot.slane %v1839_v29, 4  ;;  %v1885_v22 = vsel %vm1446_vm1, %v1870_v34, %v1884_v32  ;;  %v1882_v51 = vrot.slane %v1870_v34, 4 }
 0x4e0   : > { %v1857_v4 = vsel %vm1446_vm1, %v1856_v33, %v1839_v29  ;;  %v1905_v24 = vperm.slane %v1897_v36, %v4875_v63  ;;  %v1829_v43 = vsel %vm1446_vm1, %v1828_v35, %v4957_v56  ;;  %v1893_v46 = vperm.slane %v1885_v22, %v4875_v63 }
 0x4e1   : > { %v1918_v12 = vpack.c.bf16 %v1857_v4, %v1857_v4  ;;  %v1835_v49 = vperm.slane %v1829_v43, %v4875_v63  ;;  %v1841_v58 = vsel %vm1446_vm1, %v1840_v37, %v4949_v23  ;;  %v1895_v60 = vsel %vm1446_vm1, %v1894_v40, %v4931_v18 }
 0x4e2   : > { %v1910_v50 = vrot.slane %v1905_v24, 4  ;;  %v1847_v42 = vperm.slane %v1841_v58, %v4875_v63  ;;  %v1901_v62 = vperm.slane %v1895_v60, %v4875_v63  ;;  %v1859_v56 = vsel %vm1446_vm1, %v1851_v21, %v1858_v17 }
 0x4e3   : > { %v2237_v61 = vunpack.c.l.b16 %v1918_v12  ;;  %v1912_v0 = vrot.slane %v1893_v46, 4  ;;  %v1883_v11 = vsel %vm1446_vm1, %v1882_v51, %v1864_v39  ;;  %v1920_v13 = vpack.c.bf16 %v1859_v56, %v1859_v56 }
 0x4e4   : > { %v1911_v1 = vsel %vm1446_vm1, %v1910_v50, %v1893_v46  ;;  %v1852_v3 = vrot.slane %v1847_v42, 4  ;;  %v1889_v14 = vperm.slane %v1883_v11, %v4875_v63  ;;  %v1906_v38 = vrot.slane %v1901_v62, 4 }
 0x4e5   : > { %v1919_v23 = vpack.c.bf16 %v1911_v1, %v1911_v1  ;;  %v1913_v16 = vsel %vm1446_vm1, %v1905_v24, %v1912_v0  ;;  %v2267_v6 = vunpack.c.l.b16 %v1920_v13  ;;  %v1854_v27 = vrot.slane %v1835_v49, 4 }
 0x4e6   : > { %v1853_v18 = vsel %vm1446_vm1, %v1852_v3, %v1835_v49  ;;  %v1921_v15 = vpack.c.bf16 %v1913_v16, %v1913_v16  ;;  %v1907_v29 = vsel %vm1446_vm1, %v1906_v38, %v1889_v14  ;;  %v1908_v31 = vrot.slane %v1889_v14, 4 }
 0x4e7   : > { %v2238_v7 = vunpack.c.l.b16 %v1919_v23  ;;  %v1914_v21 = vpack.c.bf16 %v1853_v18, %v1853_v18  ;;  %v1915_v32 = vpack.c.bf16 %v1907_v29, %v1907_v29  ;;  %v1855_v39 = vsel %vm1446_vm1, %v1847_v42, %v1854_v27 }
 0x4e8   : > { %v2268_v8 = vunpack.c.l.b16 %v1921_v15  ;;  %v1583_v33 = vsel %vm1446_vm1, %v5041_v25, %v1582_v20  ;;  %v1909_v36 = vsel %vm1446_vm1, %v1901_v62, %v1908_v31  ;;  %v1916_v37 = vpack.c.bf16 %v1855_v39, %v1855_v39 }
 0x4e9   : > { %v2239_v34 = vpack.c.b16 %v2238_v7, %v2237_v61  ;;  %v2177_v35 = vunpack.c.l.b16 %v1914_v21  ;;  %v2178_v40 = vunpack.c.l.b16 %v1915_v32  ;;  %v1917_v4 = vpack.c.bf16 %v1909_v36, %v1909_v36 }
 0x4ea   : > { %v2269_v17 = vpack.c.b16 %v2268_v8, %v2267_v6  ;;  %v1591_v22 = vperm.slane %v1583_v33, %v4875_v63  ;;  %v2207_v43 = vunpack.c.l.b16 %v1916_v37  ;;  %v1595_v46 = vsel %vm1446_vm1, %v5049_v28, %v1594_v26 }
 0x4eb   : > { %v2244_v24 = vsel %vm1111_vm9, %v2239_v34, 0  ;;  %v1637_v20 = vsel %vm1446_vm1, %v5009_v55, %v1636_v45  ;;  %v2179_v12 = vpack.c.b16 %v2178_v40, %v2177_v35  ;;  %v2208_v58 = vunpack.c.l.b16 %v1917_v4 }
 0x4ec   : > { %2253 = vmatpush.bf16.xpose.msrb.mxu1 %v2244_v24  ;;  %v2274_v49 = vsel %vm1111_vm9, %v2269_v17, 0  ;;  %v1603_v50 = vperm.slane %v1595_v46, %v4875_v63  ;;  %v1645_v42 = vperm.slane %v1637_v20, %v4875_v63  ;;  %v1649_v26 = vsel %vm1446_vm1, %v5017_v52, %v1648_v59  ;;  %v1420_v24 = vpop.f32.mrf.mxu2 }
 0x4ed   : > { %2283 = vmatpush.bf16.xpose.msrb.mxu2 %v2274_v49  ;;  %v1581_v45 = vsel %vm1446_vm1, %v1580_v30, %v5028_v5  ;;  %v1593_v51 = vsel %vm1446_vm1, %v1592_v54, %v5035_v19  ;;  %v2184_v60 = vsel %vm1111_vm9, %v2179_v12, 0  ;;  %v2209_v61 = vpack.c.b16 %v2208_v58, %v2207_v43 }
 0x4ee   : > { %v1608_v62 = vrot.slane %v1603_v50, 4  ;;  %v1657_v56 = vperm.slane %v1649_v26, %v4875_v63  ;;  %2193 = vmatpush.bf16.xpose.msra.mxu3 %v2184_v60  ;;  %v1587_v0 = vperm.slane %v1581_v45, %v4875_v63  ;;  %v1599_v59 = vperm.slane %v1593_v51, %v4875_v63 }
 0x4ef   : > { %v1635_v5 = vsel %vm1446_vm1, %v1634_v53, %v5002_v9  ;;  %v1647_v19 = vsel %vm1446_vm1, %v1646_v2, %v5012_v44  ;;  %v2214_v25 = vsel %vm1111_vm9, %v2209_v61, 0  ;;  %v1610_v55 = vrot.slane %v1591_v22, 4 }
 0x4f0   : > { %v1609_v28 = vsel %vm1446_vm1, %v1608_v62, %v1591_v22  ;;  %v1662_v30 = vrot.slane %v1657_v56, 4  ;;  %v1641_v54 = vperm.slane %v1635_v5, %v4875_v63  ;;  %2223 = vmatpush.bf16.xpose.msrb.mxu0 %v2214_v25  ;;  %v1604_v3 = vrot.slane %v1599_v59, 4 }
 0x4f1   : > { %v1670_v1 = vpack.c.bf16 %v1609_v28, %v1609_v28  ;;  %v1653_v11 = vperm.slane %v1647_v19, %v4875_v63  ;;  %v1664_v53 = vrot.slane %v1645_v42, 4  ;;  %v1606_v13 = vrot.slane %v1587_v0, 4 }
 0x4f2   : > { %v1663_v9 = vsel %vm1446_vm1, %v1662_v30, %v1645_v42  ;;  %v1660_v52 = vrot.slane %v1641_v54, 4  ;;  %v1605_v2 = vsel %vm1446_vm1, %v1604_v3, %v1587_v0  ;;  %v1611_v16 = vsel %vm1446_vm1, %v1603_v50, %v1610_v55 }
 0x4f3   : > { %v1671_v23 = vpack.c.bf16 %v1663_v9, %v1663_v9  ;;  %v2232_v44 = vunpack.c.l.b16 %v1670_v1  ;;  %v1658_v14 = vrot.slane %v1653_v11, 4  ;;  %v1666_v38 = vpack.c.bf16 %v1605_v2, %v1605_v2  ;;  %v3821_v9 = vld [vmem:[#allocation8] ss:$0 sm:$0xff] }
 0x4f4   : > { %v1665_v18 = vsel %vm1446_vm1, %v1657_v56, %v1664_v53  ;;  %v1607_v15 = vsel %vm1446_vm1, %v1599_v59, %v1606_v13  ;;  %v1672_v7 = vpack.c.bf16 %v1611_v16, %v1611_v16  ;;  %v1661_v32 = vsel %vm1446_vm1, %v1653_v11, %v1660_v52  ;;  %v1422_v46 = vpop.f32.mrf.mxu2 }
 0x4f5   : > { %v2233_v6 = vunpack.c.l.b16 %v1671_v23  ;;  %v1659_v27 = vsel %vm1446_vm1, %v1658_v14, %v1641_v54  ;;  %v1673_v29 = vpack.c.bf16 %v1665_v18, %v1665_v18  ;;  %v2172_v31 = vunpack.c.l.b16 %v1666_v38 }
 0x4f6   : > { %v1667_v21 = vpack.c.bf16 %v1659_v27, %v1659_v27  ;;  %v1668_v8 = vpack.c.bf16 %v1607_v15, %v1607_v15  ;;  %v2262_v33 = vunpack.c.l.b16 %v1672_v7  ;;  %v1669_v35 = vpack.c.bf16 %v1661_v32, %v1661_v32 }
 0x4f7   : > { %v2234_v39 = vpack.c.b16 %v2233_v6, %v2232_v44  ;;  %v2263_v34 = vunpack.c.l.b16 %v1673_v29  ;;  %v5156_v53 = vadd.f32 %v3821_v9, %v1422_v46  ;;  %v5158_v13 = vadd.f32 %v3821_v9, %v1420_v24 }
 0x4f8   : > { %v2173_v36 = vunpack.c.l.b16 %v1667_v21  ;;  %v2202_v37 = vunpack.c.l.b16 %v1668_v8  ;;  %v2203_v17 = vunpack.c.l.b16 %v1669_v35 }
 0x4f9   : > { %3488 = vmatmul.msk.bf16.vlgmr.msrb.gmra.mxu1 %vm1111_vm9, %v2234_v39  ;;  %v2264_v40 = vpack.c.b16 %v2263_v34, %v2262_v33  ;;  %v3794_v52 = vpack.i.bf16 %v5156_v53, %v5158_v13 }
 0x4fa   : > { %v2174_v4 = vpack.c.b16 %v2173_v36, %v2172_v31  ;;  %v2204_v22 = vpack.c.b16 %v2203_v17, %v2202_v37 }
 0x4fb   : > { %3489 = vmatmul.msk.bf16.vlgmr.msrb.gmra.mxu2 %vm1111_vm9, %v2264_v40 }
 0x4fc   : > { %3486 = vmatmul.msk.bf16.vlgmr.msra.gmra.mxu3 %vm1111_vm9, %v2174_v4  ;;  %3487 = vmatmul.msk.bf16.vlgmr.msrb.gmra.mxu0 %vm1111_vm9, %v2204_v22 }
 0x533   : > { %v5141_v43 = vpop.f32.mrf.mxu3 }
 0x53b   : > { %v5143_v12 = vpop.f32.mrf.mxu3 }
 0x576   : > { %v2255_v20 = vpop.f32.mrf.mxu1 }
 0x577   : > { %v2294_v49 = vmul.f32 0.35355338, %v2255_v20 }
 0x579   : > { %v2311_v58 = vsel %vm2298_vm2, %v2294_v49, -inf  ;;  %v2225_v50 = vpop.f32.mrf.mxu0 }
 0x57a   : > { %2312 = vmax.xlane.f32.xlu2 %v2311_v58  ;;  %v5146_v42 = vmul.f32 0.35355338, %v2225_v50 }
 0x57c   : > { %v2305_v26 = vsel %vm2298_vm2, %v5146_v42, -inf }
 0x57d   : > { %2306 = vmax.xlane.f32.xlu0 %v2305_v26 }
 0x57e   : > { %v2285_v45 = vpop.f32.mrf.mxu2  ;;  %v2257_v56 = vpop.f32.mrf.mxu1 }
 0x57f   : > { %v2296_v51 = vmul.f32 0.35355338, %v2285_v45  ;;  %v2195_v60 = vpop.f32.mrf.mxu3  ;;  %v2295_v5 = vmul.f32 0.35355338, %v2257_v56 }
 0x580   : > { %v2290_v61 = vmul.f32 0.35355338, %v2195_v60 }
 0x581   : > { %v2317_v62 = vsel %vm2298_vm2, %v2296_v51, -inf  ;;  %v2227_v0 = vpop.f32.mrf.mxu0  ;;  %v2314_v3 = vsel %vm2298_vm2, %v2295_v5, -inf }
 0x582   : > { %2318 = vmax.xlane.f32.xlu1 %v2317_v62  ;;  %v2293_v59 = vmul.f32 0.35355338, %v2227_v0  ;;  %v2299_v25 = vsel %vm2298_vm2, %v2290_v61, -inf }
 0x584   : > { %v2308_v19 = vsel %vm2298_vm2, %v2293_v59, -inf }
 0x585   : > { %2309 = vmax.xlane.f32.xlu2 %v2308_v19  ;;  %2300 = vmax.xlane.f32.xlu0 %v2299_v25 }
 0x586   : > { %v2287_v28 = vpop.f32.mrf.mxu2 }
 0x587   : > { %v2197_v30 = vpop.f32.mrf.mxu3  ;;  %v2297_v54 = vmul.f32 0.35355338, %v2287_v28 }
 0x588   : > { %v2291_v1 = vmul.f32 0.35355338, %v2197_v30 }
 0x589   : > { %v2320_v11 = vsel %vm2298_vm2, %v2297_v54, -inf }
 0x58a   : > { %2315 = vmax.xlane.f32.xlu1 %v2314_v3  ;;  %v2302_v55 = vsel %vm2298_vm2, %v2291_v1, -inf }
 0x58d   : > { %2321 = vmax.xlane.f32.xlu0 %v2320_v11  ;;  %2303 = vmax.xlane.f32.xlu2 %v2302_v55 }
 0x5a1   : > { %3795 = vrot.lane.b32.xlu0 %v3794_v52, %s4424_s8  ;;  %s3568_s8 = sshll.u32 %s4567_s0, 4  ;;  %s3146_s0 = scalar_lea.sflag [#allocation4], %s4721_s23 }
 0x5a3   : > { %3790 = vrot.lane.b32.xlu1 %v3794_v52, %s4423_s3  ;;  %s3415_s3 = sshll.u32 %s4721_s23, 4 }
 0x5a5   : > { %3800 = vrot.lane.b32.xlu2 %v3794_v52, %s4425_s30  ;;  %s904_s30 = scalar_lea.vmem [#allocation25], %s3415_s3 }
 0x5ed   : > { %v2313_v23 = vpop.xlane.xlu2 %2312 }
 0x5ee   : > { %v2327_v44 = vsub.f32 %v2294_v49, %v2313_v23 }
 0x5f0   : > { %v2339_v2 = vmul.f32 1.442695, %v2327_v44  ;;  %v2307_v14 = vpop.xlane.xlu0 %2306 }
 0x5f1   : > { %v2325_v40 = vsub.f32 %v5146_v42, %v2307_v14 }
 0x5f2   : > { %3844 = vpow2.f32 %v2339_v2 }
 0x5f3   : > { %v2335_v20 = vmul.f32 1.442695, %v2325_v40 }
 0x5f5   : > { %v2319_v38 = vpop.xlane.xlu1 %2318 }
 0x5f6   : > { %v2329_v16 = vsub.f32 %v2296_v51, %v2319_v38 }
 0x5f8   : > { %v5165_v18 = vpop.eup %3844  ;;  %v2343_v15 = vmul.f32 1.442695, %v2329_v16  ;;  %v2310_v6 = vpop.xlane.xlu2 %2309 }
 0x5f9   : > { %v2301_v27 = vpop.xlane.xlu0 %2300  ;;  %v2359_v7 = vsel %vm2298_vm2, %v5165_v18, 0.0  ;;  %v2326_v17 = vsub.f32 %v2293_v59, %v2310_v6  ;;  %v1944_v59 = vrot.slane %v5158_v13, 4 }
 0x5fa   : > { %3846 = vpow2.f32 %v2343_v15  ;;  %v2323_v29 = vsub.f32 %v2290_v61, %v2301_v27  ;;  %2360 = vadd.xlane.f32.xlu1 %v2359_v7 }
 0x5fb   : > { %v2337_v58 = vmul.f32 1.442695, %v2326_v17 }
 0x5fc   : > { %v2331_v21 = vmul.f32 1.442695, %v2323_v29 }
 0x5fd   : > { %v2316_v31 = vpop.xlane.xlu1 %2315 }
 0x5fe   : > { %v2328_v32 = vsub.f32 %v2295_v5, %v2316_v31  ;;  %3848 = vpow2.f32 %v2331_v21  ;;  %v2000_v5 = vrot.slane %v5156_v53, 4 }
 0x600   : > { %v5169_v8 = vpop.eup %3846  ;;  %v2341_v39 = vmul.f32 1.442695, %v2328_v32  ;;  %v2304_v34 = vpop.xlane.xlu2 %2303 }
 0x601   : > { %v2322_v33 = vpop.xlane.xlu0 %2321  ;;  %v2365_v35 = vsel %vm2298_vm2, %v5169_v8, 0.0  ;;  %v2324_v37 = vsub.f32 %v2291_v1, %v2304_v34 }
 0x602   : > { %3850 = vpow2.f32 %v2341_v39  ;;  %v2330_v36 = vsub.f32 %v2297_v54, %v2322_v33  ;;  %2366 = vadd.xlane.f32.xlu2 %v2365_v35 }
 0x603   : > { %v2333_v22 = vmul.f32 1.442695, %v2324_v37 }
 0x604   : > { %v2345_v4 = vmul.f32 1.442695, %v2330_v36  ;;  %v5174_v24 = vpop.eup %3848 }
 0x605   : > { %v2347_v46 = vsel %vm2298_vm2, %v5174_v24, 0.0 }
 0x606   : > { %3852 = vpow2.f32 %v2345_v4  ;;  %2348 = vadd.xlane.f32.xlu0 %v2347_v46 }
 0x607   : > { %3854 = vpow2.f32 %v2333_v22 }
 0x608   : > { %v5178_v49 = vpop.eup %3850  ;;  %3856 = vpow2.f32 %v2335_v20  ;;  %v3801_v60 = vpop.permute.xlu2 %3800 }
 0x609   : > { %v2362_v50 = vsel %vm2298_vm2, %v5178_v49, 0.0  ;;  %3858 = vpow2.f32 %v2337_v58  ;;  %v3803_v56 = vunpack.i.h.bf16 %v3801_v60  ;;  %v3802_v0 = vunpack.i.l.bf16 %v3801_v60 }
 0x60a   : > { %2363 = vadd.xlane.f32.xlu2 %v2362_v50 }
 0x60b   : > { %v2010_v3 = vrot.slane %v3803_v56, 4  ;;  %v1954_v11 = vrot.slane %v3802_v0, 4 }
 0x60c   : > { %v5182_v42 = vpop.eup %3852 }
 0x60d   : > { %v5184_v26 = vpop.eup %3854  ;;  %v2368_v45 = vsel %vm2298_vm2, %v5182_v42, 0.0 }
 0x60e   : > { %v2350_v51 = vsel %vm2298_vm2, %v5184_v26, 0.0  ;;  %2369 = vadd.xlane.f32.xlu0 %v2368_v45  ;;  %v5190_v61 = vpop.eup %3856 }
 0x60f   : > { %2351 = vadd.xlane.f32.xlu1 %v2350_v51  ;;  %v5192_v62 = vpop.eup %3858  ;;  %v2353_v54 = vsel %vm2298_vm2, %v5190_v61, 0.0 }
 0x610   : > { %v2356_v1 = vsel %vm2298_vm2, %v5192_v62, 0.0 }
 0x613   : > { %v3796_v19 = vpop.permute.xlu0 %3795 }
 0x614   : > { %v3798_v25 = vunpack.i.h.bf16 %v3796_v19  ;;  %v3797_v28 = vunpack.i.l.bf16 %v3796_v19 }
 0x615   : > { %v3791_v30 = vpop.permute.xlu1 %3790 }
 0x616   : > { %v3793_v55 = vunpack.i.h.bf16 %v3791_v30  ;;  %v3792_v9 = vunpack.i.l.bf16 %v3791_v30  ;;  %v1998_v52 = vrot.slane %v3798_v25, 4  ;;  %v2001_v23 = vsel %vm1446_vm1, %v3798_v25, %v2000_v5  ;;  %2354 = vadd.xlane.f32.xlu0 %v2353_v54 }
 0x617   : > { %v1942_v44 = vrot.slane %v3797_v28, 4  ;;  %v1945_v2 = vsel %vm1446_vm1, %v3797_v28, %v1944_v59  ;;  %2357 = vadd.xlane.f32.xlu1 %v2356_v1  ;;  %v2009_v14 = vperm.slane %v2001_v23, %v4861_v41 }
 0x618   : > { %v1953_v38 = vperm.slane %v1945_v2, %v4861_v41  ;;  %v2012_v16 = vrot.slane %v3793_v55, 4  ;;  %v1955_v15 = vsel %vm1446_vm1, %v1954_v11, %v3792_v9  ;;  %v1999_v6 = vsel %vm1446_vm1, %v1998_v52, %v5156_v53 }
 0x619   : > { %v1943_v27 = vsel %vm1446_vm1, %v1942_v44, %v5158_v13  ;;  %v1956_v7 = vrot.slane %v3792_v9, 4  ;;  %v1961_v29 = vperm.slane %v1955_v15, %v4861_v41  ;;  %v2005_v21 = vperm.slane %v1999_v6, %v4861_v41 }
 0x61a   : > { %v1949_v31 = vperm.slane %v1943_v27, %v4861_v41  ;;  %v1980_v32 = vrot.slane %v1953_v38, 4  ;;  %v2011_v34 = vsel %vm1446_vm1, %v2010_v3, %v3793_v55  ;;  %v2013_v35 = vsel %vm1446_vm1, %v3803_v56, %v2012_v16 }
 0x61b   : > { %v1957_v39 = vsel %vm1446_vm1, %v3802_v0, %v1956_v7  ;;  %v1966_v33 = vrot.slane %v1961_v29, 4  ;;  %v2024_v36 = vrot.slane %v2005_v21, 4  ;;  %v2017_v13 = vperm.slane %v2011_v34, %v4861_v41 }
 0x61c   : > { %v1968_v53 = vrot.slane %v1949_v31, 4  ;;  %v1965_v37 = vperm.slane %v1957_v39, %v4861_v41  ;;  %v2036_v40 = vrot.slane %v2009_v14, 4  ;;  %v2021_v4 = vperm.slane %v2013_v35, %v4861_v41 }
 0x61d   : > { %v1967_v17 = vsel %vm1446_vm1, %v1966_v33, %v1949_v31  ;;  %v2022_v51 = vrot.slane %v2017_v13, 4  ;;  %v2025_v60 = vsel %vm1446_vm1, %v2017_v13, %v2024_v36 }
 0x61e   : > { %v1969_v22 = vsel %vm1446_vm1, %v1961_v29, %v1968_v53  ;;  %v1973_v46 = vperm.slane %v1967_v17, %v4875_v63  ;;  %v1978_v20 = vrot.slane %v1965_v37, 4  ;;  %v1981_v58 = vsel %vm1446_vm1, %v1965_v37, %v1980_v32 }
 0x61f   : > { %v1977_v50 = vperm.slane %v1969_v22, %v4875_v63  ;;  %v1989_v45 = vperm.slane %v1981_v58, %v4875_v63  ;;  %v2033_v59 = vperm.slane %v2025_v60, %v4875_v63  ;;  %v2034_v5 = vrot.slane %v2021_v4, 4 }
 0x620   : > { %v1979_v56 = vsel %vm1446_vm1, %v1978_v20, %v1953_v38  ;;  %v1990_v0 = vrot.slane %v1973_v46, 4  ;;  %v2023_v30 = vsel %vm1446_vm1, %v2022_v51, %v2005_v21  ;;  %v2037_v11 = vsel %vm1446_vm1, %v2021_v4, %v2036_v40 }
 0x621   : > { %v1985_v19 = vperm.slane %v1979_v56, %v4875_v63  ;;  %v1992_v25 = vrot.slane %v1977_v50, 4  ;;  %v1996_v28 = vrot.slane %v1989_v45, 4  ;;  %v2029_v1 = vperm.slane %v2023_v30, %v4875_v63 }
 0x622   : > { %v1991_v54 = vsel %vm1446_vm1, 0.0, %v1990_v0  ;;  %v2035_v3 = vsel %vm1446_vm1, %v2034_v5, %v2009_v14  ;;  %v2045_v44 = vperm.slane %v2037_v11, %v4875_v63  ;;  %v2048_v38 = vrot.slane %v2033_v59, 4 }
 0x623   : > { %v1993_v55 = vsel %vm1446_vm1, 0.0, %v1992_v25  ;;  %v1994_v9 = vrot.slane %v1985_v19, 4  ;;  %v1997_v52 = vsel %vm1446_vm1, 0.0, %v1996_v28  ;;  %v2041_v23 = vperm.slane %v2035_v3, %v4875_v63 }
 0x624   : > { %v2046_v2 = vrot.slane %v2029_v1, 4  ;;  %v2054_v16 = vsel %vm1446_vm1, %v1992_v25, %v1973_v46  ;;  %v2059_v27 = vrot.slane %v1993_v55, 4  ;;  %v2049_v29 = vsel %vm1446_vm1, 0.0, %v2048_v38 }
 0x625   : > { %v1995_v15 = vsel %vm1446_vm1, 0.0, %v1994_v9  ;;  %v2050_v6 = vrot.slane %v2041_v23, 4  ;;  %v2058_v14 = vperm.slane %v2054_v16, %v4861_v41  ;;  %v2052_v21 = vrot.slane %v2045_v44, 4 }
 0x626   : > { %v2047_v7 = vsel %vm1446_vm1, 0.0, %v2046_v2  ;;  %v2065_v31 = vsel %vm1446_vm1, %v1996_v28, %v1985_v19  ;;  %v2060_v39 = vsel %vm1446_vm1, %v2059_v27, %v1991_v54  ;;  %v2070_v34 = vrot.slane %v1997_v52, 4 }
 0x627   : > { %v2051_v32 = vsel %vm1446_vm1, 0.0, %v2050_v6  ;;  %v2069_v33 = vperm.slane %v2065_v31, %v4861_v41  ;;  %v2053_v35 = vsel %vm1446_vm1, 0.0, %v2052_v21  ;;  %v2108_v36 = vsel %vm1446_vm1, %v2048_v38, %v2029_v1 }
 0x628   : > { %v2113_v53 = vrot.slane %v2049_v29, 4  ;;  %v2119_v37 = vsel %vm1446_vm1, %v2052_v21, %v2041_v23  ;;  %v2071_v13 = vsel %vm1446_vm1, %v2070_v34, %v1995_v15  ;;  %v2112_v40 = vperm.slane %v2108_v36, %v4861_v41 }
 0x629   : > { %v2123_v17 = vperm.slane %v2119_v37, %v4861_v41  ;;  %v2124_v4 = vrot.slane %v2053_v35, 4  ;;  %v2064_v46 = vperm.slane %v2060_v39, %v4861_v41  ;;  %v2075_v20 = vperm.slane %v2071_v13, %v4861_v41 }
 0x62a   : > { %v2114_v22 = vsel %vm1446_vm1, %v2113_v53, %v2047_v7  ;;  %v2078_v58 = vrot.slane %v2058_v14, 4  ;;  %v2090_v45 = vrot.slane %v2069_v33, 4  ;;  %v2132_v60 = vrot.slane %v2112_v40, 4 }
 0x62b   : > { %v2125_v50 = vsel %vm1446_vm1, %v2124_v4, %v2051_v32  ;;  %v2118_v51 = vperm.slane %v2114_v22, %v4861_v41  ;;  %v2144_v59 = vrot.slane %v2123_v17, 4  ;;  %v2076_v5 = vrot.slane %v2064_v46, 4 }
 0x62c   : > { %v2079_v56 = vsel %vm1446_vm1, %v2064_v46, %v2078_v58  ;;  %v2129_v0 = vperm.slane %v2125_v50, %v4861_v41  ;;  %v2091_v25 = vsel %vm1446_vm1, %v2075_v20, %v2090_v45  ;;  %v2088_v30 = vrot.slane %v2075_v20, 4 }
 0x62d   : > { %v2087_v19 = vperm.slane %v2079_v56, %v4875_v63  ;;  %v2133_v28 = vsel %vm1446_vm1, %v2118_v51, %v2132_v60  ;;  %v2099_v54 = vperm.slane %v2091_v25, %v4875_v63  ;;  %v2077_v11 = vsel %vm1446_vm1, %v2076_v5, %v2058_v14 }
 0x62e   : > { %v2141_v1 = vperm.slane %v2133_v28, %v4875_v63  ;;  %v2145_v3 = vsel %vm1446_vm1, %v2129_v0, %v2144_v59  ;;  %v2083_v52 = vperm.slane %v2077_v11, %v4875_v63  ;;  %v2089_v23 = vsel %vm1446_vm1, %v2088_v30, %v2069_v33 }
 0x62f   : > { %v2153_v55 = vperm.slane %v2145_v3, %v4875_v63  ;;  %v2106_v9 = vrot.slane %v2087_v19, 4  ;;  %v2104_v44 = vrot.slane %v2099_v54, 4  ;;  %v2095_v38 = vperm.slane %v2089_v23, %v4875_v63 }
 0x630   : > { %v2160_v2 = vrot.slane %v2141_v1, 4  ;;  %v2130_v16 = vrot.slane %v2118_v51, 4  ;;  %v2142_v27 = vrot.slane %v2129_v0, 4  ;;  %v2102_v7 = vrot.slane %v2083_v52, 4 }
 0x631   : > { %v2158_v15 = vrot.slane %v2153_v55, 4  ;;  %v2107_v6 = vsel %vm1446_vm1, %v2099_v54, %v2106_v9  ;;  %v2105_v29 = vsel %vm1446_vm1, %v2104_v44, %v2087_v19  ;;  %v2100_v31 = vrot.slane %v2095_v38, 4 }
 0x632   : > { %v2161_v14 = vsel %vm1446_vm1, %v2153_v55, %v2160_v2  ;;  %v2168_v21 = vpack.c.bf16 %v2107_v6, %v2107_v6  ;;  %v2166_v39 = vpack.c.bf16 %v2105_v29, %v2105_v29  ;;  %v2131_v34 = vsel %vm1446_vm1, %v2130_v16, %v2112_v40 }
 0x633   : > { %v2159_v32 = vsel %vm1446_vm1, %v2158_v15, %v2141_v1  ;;  %v2169_v33 = vpack.c.bf16 %v2161_v14, %v2161_v14  ;;  %v2101_v53 = vsel %vm1446_vm1, %v2100_v31, %v2083_v52  ;;  %v2137_v37 = vperm.slane %v2131_v34, %v4875_v63 }
 0x634   : > { %v2167_v35 = vpack.c.bf16 %v2159_v32, %v2159_v32  ;;  %v2590_v36 = vunpack.c.l.b16 %v2168_v21  ;;  %v2562_v13 = vunpack.c.l.b16 %v2166_v39  ;;  %v2143_v22 = vsel %vm1446_vm1, %v2142_v27, %v2123_v17 }
 0x635   : > { %v2591_v4 = vunpack.c.l.b16 %v2169_v33  ;;  %v2149_v20 = vperm.slane %v2143_v22, %v4875_v63  ;;  %v2103_v58 = vsel %vm1446_vm1, %v2095_v38, %v2102_v7  ;;  %v2156_v50 = vrot.slane %v2137_v37, 4 }
 0x636   : > { %v2563_v46 = vunpack.c.l.b16 %v2167_v35  ;;  %v2162_v51 = vpack.c.bf16 %v2101_v53, %v2101_v53  ;;  %v2164_v60 = vpack.c.bf16 %v2103_v58, %v2103_v58 }
 0x637   : > { %v2592_v45 = vpack.c.b16 %v2591_v4, %v2590_v36  ;;  %v2154_v56 = vrot.slane %v2149_v20, 4  ;;  %v2157_v0 = vsel %vm1446_vm1, %v2149_v20, %v2156_v50 }
 0x638   : > { %v2564_v40 = vpack.c.b16 %v2563_v46, %v2562_v13  ;;  %v2165_v59 = vpack.c.bf16 %v2157_v0, %v2157_v0  ;;  %v2534_v5 = vunpack.c.l.b16 %v2164_v60  ;;  %v2506_v25 = vunpack.c.l.b16 %v2162_v51 }
 0x639   : > { %2604 = vmatpush.bf16.msra.mxu2 %v2592_v45  ;;  %v2155_v19 = vsel %vm1446_vm1, %v2154_v56, %v2137_v37 }
 0x63a   : > { %2576 = vmatpush.bf16.msra.mxu1 %v2564_v40  ;;  %v2163_v17 = vpack.c.bf16 %v2155_v19, %v2155_v19  ;;  %v2535_v28 = vunpack.c.l.b16 %v2165_v59 }
 0x63c   : > { %v2507_v30 = vunpack.c.l.b16 %v2163_v17  ;;  %v2536_v54 = vpack.c.b16 %v2535_v28, %v2534_v5 }
 0x63e   : > { %v2508_v1 = vpack.c.b16 %v2507_v30, %v2506_v25  ;;  %2548 = vmatpush.bf16.msra.mxu0 %v2536_v54 }
 0x640   : > { %2520 = vmatpush.bf16.msrb.mxu3 %v2508_v1 }
 0x66d   : > { %v2361_v3 = vpop.xlane.xlu1 %2360 }
 0x66e   : > { %3860 = vrcp.f32 %v2361_v3  ;;  %v2442_v44 = vand.u32 2147483648, %v2361_v3  ;;  %vm2436_vm4 = vweird.f32 %v2361_v3  ;;  %v2440_v16 = vand.u32 2147483647, %v2361_v3 }
 0x670   : > { %v2443_v29 = vor.u32 1.1754944e-38, %v2442_v44  ;;  %vm2441_vm6 = vcmp.eq.f32.partialorder %v2440_v16, 8.507059e+37 }
 0x674   : > { %v3861_v11 = vpop.eup %3860 }
 0x675   : > { %v2432_v55 = vmul.f32 %v3861_v11, %v2361_v3  ;;  %v2367_v9 = vpop.xlane.xlu2 %2366  ;;  %vm2437_vm3 = vweird.f32 %v3861_v11 }
 0x676   : > { %3862 = vrcp.f32 %v2367_v9  ;;  %vm2438_vm5 = vmor %vm2436_vm4, %vm2437_vm3  ;;  %vm2466_vm7 = vweird.f32 %v2367_v9  ;;  %v2470_v39 = vand.u32 2147483647, %v2367_v9  ;;  %v2472_v37 = vand.u32 2147483648, %v2367_v9 }
 0x677   : > { %v2433_v52 = vsub.f32 1.0, %v2432_v55 }
 0x678   : > { %vm2471_vm12 = vcmp.eq.f32.partialorder %v2470_v39, 8.507059e+37  ;;  %v2473_v40 = vor.u32 1.1754944e-38, %v2472_v37 }
 0x679   : > { %v2434_v23 = vmul.f32 %v3861_v11, %v2433_v52  ;;  %v2349_v2 = vpop.xlane.xlu0 %2348 }
 0x67a   : > { %3864 = vrcp.f32 %v2349_v2  ;;  %v2380_v22 = vand.u32 2147483647, %v2349_v2  ;;  %v2382_v46 = vand.u32 2147483648, %v2349_v2  ;;  %vm2376_vm13 = vweird.f32 %v2349_v2 }
 0x67b   : > { %v2435_v38 = vadd.f32 %v3861_v11, %v2434_v23 }
 0x67c   : > { %v3863_v15 = vpop.eup %3862  ;;  %vm5296_vm14 = vcmp.eq.f32.partialorder %v2380_v22, 8.507059e+37  ;;  %v2383_v5 = vor.u32 1.1754944e-38, %v2382_v46 }
 0x67d   : > { %v2439_v6 = vsel %vm2438_vm5, %v3861_v11, %v2435_v38  ;;  %v2462_v27 = vmul.f32 %v3863_v15, %v2367_v9  ;;  %v2364_v7 = vpop.xlane.xlu2 %2363  ;;  %vm2467_vm8 = vweird.f32 %v3863_v15 }
 0x67e   : > { %3866 = vrcp.f32 %v2364_v7  ;;  %v2444_v21 = vsel %vm2441_vm6, %v2443_v29, %v2439_v6  ;;  %vm5290_vm10 = vmor %vm2466_vm7, %vm2467_vm8  ;;  %v2455_v50 = vand.u32 2147483647, %v2364_v7  ;;  %v2457_v51 = vand.u32 2147483648, %v2364_v7 }
 0x67f   : > { %v2463_v14 = vsub.f32 1.0, %v2462_v27  ;;  %v2445_v36 = vmul.f32 %v5165_v18, %v2444_v21  ;;  %vm2451_vm3 = vweird.f32 %v2364_v7 }
 0x680   : > { %v3865_v31 = vpop.eup %3864  ;;  %vm5306_vm5 = vcmp.eq.f32.partialorder %v2455_v50, 8.507059e+37  ;;  %v2458_v3 = vor.u32 1.1754944e-38, %v2457_v51 }
 0x681   : > { %v2464_v32 = vmul.f32 %v3863_v15, %v2463_v14  ;;  %v2372_v33 = vmul.f32 %v3865_v31, %v2349_v2  ;;  %v5282_v34 = vpop.xlane.xlu0 %2369  ;;  %vm2377_vm11 = vweird.f32 %v3865_v31  ;;  %v2495_v60 = vpack.c.bf16 %v2445_v36, %v2445_v36 }
 0x682   : > { %v5284_v35 = vpop.xlane.xlu1 %2351  ;;  %3868 = vrcp.f32 %v5282_v34  ;;  %vm5300_vm15 = vmor %vm2376_vm13, %vm2377_vm11  ;;  %v2485_v23 = vand.u32 2147483647, %v5282_v34  ;;  %v2487_v16 = vand.u32 2147483648, %v5282_v34 }
 0x683   : > { %v2465_v53 = vadd.f32 %v3863_v15, %v2464_v32  ;;  %v2373_v4 = vsub.f32 1.0, %v2372_v33  ;;  %3870 = vrcp.f32 %v5284_v35  ;;  %v2557_v9 = vunpack.c.l.b16 %v2495_v60 }
 0x684   : > { %v3867_v13 = vpop.eup %3866  ;;  %v2395_v29 = vand.u32 2147483647, %v5284_v35  ;;  %vm2391_vm11 = vweird.f32 %v5284_v35  ;;  %vm2486_vm13 = vcmp.eq.f32.partialorder %v2485_v23, 8.507059e+37 }
 0x685   : > { %v2447_v58 = vmul.f32 %v3867_v13, %v2364_v7  ;;  %v2469_v18 = vsel %vm5290_vm10, %v3863_v15, %v2465_v53  ;;  %v2374_v45 = vmul.f32 %v3865_v31, %v2373_v4  ;;  %vm2452_vm4 = vweird.f32 %v3867_v13 }
 0x686   : > { %v2474_v17 = vsel %vm2471_vm12, %v2473_v40, %v2469_v18  ;;  %vm2453_vm6 = vmor %vm2451_vm3, %vm2452_vm4  ;;  %vm2481_vm10 = vweird.f32 %v5282_v34  ;;  %v2488_v53 = vor.u32 1.1754944e-38, %v2487_v16 }
 0x687   : > { %v2448_v56 = vsub.f32 1.0, %v2447_v58  ;;  %v2375_v0 = vadd.f32 %v3865_v31, %v2374_v45  ;;  %v2475_v2 = vmul.f32 %v5169_v8, %v2474_v17  ;;  %v2397_v8 = vand.u32 2147483648, %v5284_v35 }
 0x688   : > { %v3869_v19 = vpop.eup %3868 }
 0x689   : > { %v2449_v28 = vmul.f32 %v3867_v13, %v2448_v56  ;;  %v3871_v30 = vpop.eup %3870  ;;  %v2379_v54 = vsel %vm5300_vm15, %v3865_v31, %v2375_v0  ;;  %v2477_v11 = vmul.f32 %v3869_v19, %v5282_v34  ;;  %v5311_v55 = vpop.xlane.xlu0 %2354  ;;  %vm2482_vm7 = vweird.f32 %v3869_v19 }
 0x68a   : > { %v2387_v44 = vmul.f32 %v3871_v30, %v5284_v35  ;;  %3872 = vrcp.f32 %v5311_v55  ;;  %v5318_v15 = vpop.xlane.xlu1 %2357  ;;  %v2384_v6 = vsel %vm5296_vm14, %v2383_v5, %v2379_v54  ;;  %vm2392_vm8 = vweird.f32 %v3871_v30  ;;  %vm2483_vm12 = vmor %vm2481_vm10, %vm2482_vm7 }
 0x68b   : > { %v2450_v52 = vadd.f32 %v3867_v13, %v2449_v28  ;;  %v2478_v38 = vsub.f32 1.0, %v2477_v11  ;;  %3874 = vrcp.f32 %v5318_v15  ;;  %v2385_v39 = vmul.f32 %v5174_v24, %v2384_v6  ;;  %vm2393_vm14 = vmor %vm2391_vm11, %vm2392_vm8 }
 0x68c   : > { %v2388_v7 = vsub.f32 1.0, %v2387_v44  ;;  %v2497_v4 = vpack.c.bf16 %v2475_v2, %v2475_v2  ;;  %vm2396_vm15 = vcmp.eq.f32.partialorder %v2395_v29, 8.507059e+37  ;;  %v2412_v60 = vand.u32 2147483648, %v5311_v55 }
 0x68d   : > { %v2454_v27 = vsel %vm2453_vm6, %v3867_v13, %v2450_v52  ;;  %v2479_v21 = vmul.f32 %v3869_v19, %v2478_v38  ;;  %v2491_v50 = vpack.c.bf16 %v2385_v39, %v2385_v39  ;;  %v2410_v17 = vand.u32 2147483647, %v5311_v55 }
 0x68e   : > { %v2459_v14 = vsel %vm5306_vm5, %v2458_v3, %v2454_v27  ;;  %v2389_v32 = vmul.f32 %v3871_v30, %v2388_v7  ;;  %v2585_v56 = vunpack.c.l.b16 %v2497_v4  ;;  %vm2406_vm4 = vweird.f32 %v5311_v55 }
 0x68f   : > { %v2460_v31 = vmul.f32 %v5178_v49, %v2459_v14  ;;  %v2480_v33 = vadd.f32 %v3869_v19, %v2479_v21  ;;  %v2398_v49 = vor.u32 1.1754944e-38, %v2397_v8  ;;  %v2413_v54 = vor.u32 1.1754944e-38, %v2412_v60 }
 0x690   : > { %v2390_v37 = vadd.f32 %v3871_v30, %v2389_v32  ;;  %v3873_v13 = vpop.eup %3872  ;;  %v2427_v1 = vand.u32 2147483648, %v5318_v15  ;;  %v2425_v11 = vand.u32 2147483647, %v5318_v15  ;;  %vm2411_vm7 = vcmp.eq.f32.partialorder %v2410_v17, 8.507059e+37 }
 0x691   : > { %v2496_v36 = vpack.c.bf16 %v2460_v31, %v2460_v31  ;;  %v2484_v22 = vsel %vm2483_vm12, %v3869_v19, %v2480_v33  ;;  %v2402_v24 = vmul.f32 %v3873_v13, %v5311_v55  ;;  %v3875_v18 = vpop.eup %3874  ;;  %vm2407_vm3 = vweird.f32 %v3873_v13 }
 0x692   : > { %v2489_v20 = vsel %vm2486_vm13, %v2488_v53, %v2484_v22  ;;  %v2394_v58 = vsel %vm2393_vm14, %v3871_v30, %v2390_v37  ;;  %v2417_v59 = vmul.f32 %v3875_v18, %v5318_v15  ;;  %vm2408_vm5 = vmor %vm2406_vm4, %vm2407_vm3  ;;  %vm2422_vm6 = vweird.f32 %v3875_v18 }
 0x693   : > { %v2558_v46 = vunpack.c.l.b16 %v2496_v36  ;;  %v2490_v34 = vmul.f32 %v5182_v42, %v2489_v20  ;;  %v2399_v35 = vsel %vm2396_vm15, %v2398_v49, %v2394_v58  ;;  %v2403_v51 = vsub.f32 1.0, %v2402_v24 }
 0x694   : > { %v2400_v45 = vmul.f32 %v5184_v26, %v2399_v35  ;;  %v2501_v42 = vunpack.c.l.b16 %v2491_v50  ;;  %v2418_v26 = vsub.f32 1.0, %v2417_v59  ;;  %vm2421_vm8 = vweird.f32 %v5318_v15 }
 0x695   : > { %v2559_v40 = vpack.c.b16 %v2558_v46, %v2557_v9  ;;  %v2498_v0 = vpack.c.bf16 %v2490_v34, %v2490_v34  ;;  %v2404_v19 = vmul.f32 %v3873_v13, %v2403_v51  ;;  %vm2423_vm10 = vmor %vm2421_vm8, %vm2422_vm6  ;;  %v2428_v38 = vor.u32 1.1754944e-38, %v2427_v1 }
 0x696   : > { %v2492_v5 = vpack.c.bf16 %v2400_v45, %v2400_v45  ;;  %v2419_v3 = vmul.f32 %v3875_v18, %v2418_v26  ;;  %vm2426_vm11 = vcmp.eq.f32.partialorder %v2425_v11, 8.507059e+37 }
 0x697   : > { %3492 = vmatmul.msk.bf16.vlgmr.msra.gmra.mxu1 %vm2298_vm2, %v2559_v40  ;;  %v2586_v25 = vunpack.c.l.b16 %v2498_v0  ;;  %v2405_v30 = vadd.f32 %v3873_v13, %v2404_v19 }
 0x698   : > { %v2502_v28 = vunpack.c.l.b16 %v2492_v5  ;;  %v2420_v2 = vadd.f32 %v3875_v18, %v2419_v3 }
 0x699   : > { %v2587_v9 = vpack.c.b16 %v2586_v25, %v2585_v56  ;;  %v2409_v52 = vsel %vm2408_vm5, %v3873_v13, %v2405_v30 }
 0x69a   : > { %v2503_v23 = vpack.c.b16 %v2502_v28, %v2501_v42  ;;  %v2414_v44 = vsel %vm2411_vm7, %v2413_v54, %v2409_v52  ;;  %v2424_v16 = vsel %vm2423_vm10, %v3875_v18, %v2420_v2 }
 0x69b   : > { %3493 = vmatmul.msk.bf16.vlgmr.msra.gmra.mxu2 %vm2298_vm2, %v2587_v9  ;;  %v2415_v55 = vmul.f32 %v5190_v61, %v2414_v44  ;;  %v2429_v27 = vsel %vm2426_vm11, %v2428_v38, %v2424_v16  ;;  %vm3120_vm11 = vcmask 523264  }
 0x69c   : > { %3490 = vmatmul.msk.bf16.vlgmr.msrb.gmra.mxu3 %vm2298_vm2, %v2503_v23  ;;  %v2430_v7 = vmul.f32 %v5192_v62, %v2429_v27 }
 0x69d   : > { %v2493_v6 = vpack.c.bf16 %v2415_v55, %v2415_v55 }
 0x69e   : > { %v2494_v14 = vpack.c.bf16 %v2430_v7, %v2430_v7 }
 0x69f   : > { %v2529_v29 = vunpack.c.l.b16 %v2493_v6 }
 0x6a0   : > { %v2530_v21 = vunpack.c.l.b16 %v2494_v14 }
 0x6a2   : > { %v2531_v8 = vpack.c.b16 %v2530_v21, %v2529_v29 }
 0x6a4   : > { %3491 = vmatmul.msk.bf16.vlgmr.msra.gmra.mxu0 %vm2298_vm2, %v2531_v8 }
 0x714   : > { %v2578_v15 = vpop.f32.mrf.mxu1 }
 0x715   : > { %v2611_v31 = vrot.slane %v2578_v15, 4 }
 0x71c   : > { %v2580_v13 = vpop.f32.mrf.mxu1 }
 0x71d   : > { %v2667_v20 = vrot.slane %v2580_v13, 4 }
 0x71e   : > { %v2606_v32 = vpop.f32.mrf.mxu2 }
 0x71f   : > { %v2522_v61 = vpop.f32.mrf.mxu3  ;;  %v2623_v53 = vrot.slane %v2606_v32, 4 }
 0x720   : > { %v2612_v39 = vsel %vm1446_vm1, %v2611_v31, %v2522_v61  ;;  %v2613_v33 = vrot.slane %v2522_v61, 4 }
 0x721   : > { %v2618_v36 = vperm.slane %v2612_v39, %v4861_v41  ;;  %v2550_v22 = vpop.f32.mrf.mxu0 }
 0x722   : > { %v2614_v37 = vsel %vm1446_vm1, %v2578_v15, %v2613_v33  ;;  %v2624_v49 = vsel %vm1446_vm1, %v2623_v53, %v2550_v22  ;;  %v2625_v46 = vrot.slane %v2550_v22, 4 }
 0x723   : > { %v2622_v62 = vperm.slane %v2614_v37, %v4861_v41  ;;  %v2637_v4 = vrot.slane %v2618_v36, 4  ;;  %v2630_v24 = vperm.slane %v2624_v49, %v4861_v41 }
 0x724   : > { %v2626_v34 = vsel %vm1446_vm1, %v2606_v32, %v2625_v46 }
 0x725   : > { %v2649_v58 = vrot.slane %v2622_v62, 4  ;;  %v2634_v18 = vperm.slane %v2626_v34, %v4861_v41  ;;  %v2635_v45 = vrot.slane %v2630_v24, 4  ;;  %v2638_v51 = vsel %vm1446_vm1, %v2630_v24, %v2637_v4 }
 0x726   : > { %v2608_v50 = vpop.f32.mrf.mxu2  ;;  %v2646_v40 = vperm.slane %v2638_v51, %v4875_v63 }
 0x727   : > { %v2524_v35 = vpop.f32.mrf.mxu3  ;;  %v2679_v0 = vrot.slane %v2608_v50, 4  ;;  %v2636_v59 = vsel %vm1446_vm1, %v2635_v45, %v2618_v36  ;;  %v2647_v5 = vrot.slane %v2634_v18, 4  ;;  %v2650_v19 = vsel %vm1446_vm1, %v2634_v18, %v2649_v58 }
 0x728   : > { %v2668_v60 = vsel %vm1446_vm1, %v2667_v20, %v2524_v35  ;;  %v2669_v56 = vrot.slane %v2524_v35, 4  ;;  %v2642_v42 = vperm.slane %v2636_v59, %v4875_v63  ;;  %v2658_v25 = vperm.slane %v2650_v19, %v4875_v63 }
 0x729   : > { %v2674_v17 = vperm.slane %v2668_v60, %v4861_v41  ;;  %v2661_v26 = vrot.slane %v2646_v40, 4  ;;  %v2648_v30 = vsel %vm1446_vm1, %v2647_v5, %v2622_v62  ;;  %v2552_v1 = vpop.f32.mrf.mxu0 }
 0x72a   : > { %v2670_v28 = vsel %vm1446_vm1, %v2580_v13, %v2669_v56  ;;  %v2654_v3 = vperm.slane %v2648_v30, %v4875_v63  ;;  %v2659_v11 = vrot.slane %v2642_v42, 4  ;;  %v2665_v52 = vrot.slane %v2658_v25, 4 }
 0x72b   : > { %v2678_v54 = vperm.slane %v2670_v28, %v4861_v41  ;;  %v2662_v9 = vsel %vm1446_vm1, 0.0, %v2661_v26  ;;  %v2723_v23 = vsel %vm1446_vm1, %v2661_v26, %v2642_v42  ;;  %v2693_v2 = vrot.slane %v2674_v17, 4 }
 0x72c   : > { %v2728_v44 = vrot.slane %v2662_v9, 4  ;;  %v2680_v55 = vsel %vm1446_vm1, %v2679_v0, %v2552_v1  ;;  %v2660_v38 = vsel %vm1446_vm1, 0.0, %v2659_v11  ;;  %v2663_v16 = vrot.slane %v2654_v3, 4 }
 0x72d   : > { %v2666_v6 = vsel %vm1446_vm1, 0.0, %v2665_v52  ;;  %v2727_v27 = vperm.slane %v2723_v23, %v4861_v41  ;;  %v2734_v29 = vsel %vm1446_vm1, %v2665_v52, %v2654_v3  ;;  %v2681_v21 = vrot.slane %v2552_v1, 4 }
 0x72e   : > { %v2729_v7 = vsel %vm1446_vm1, %v2728_v44, %v2660_v38  ;;  %v2739_v14 = vrot.slane %v2666_v6, 4  ;;  %v2705_v15 = vrot.slane %v2678_v54, 4  ;;  %v2686_v31 = vperm.slane %v2680_v55, %v4861_v41 }
 0x72f   : > { %v2733_v8 = vperm.slane %v2729_v7, %v4861_v41  ;;  %v2664_v32 = vsel %vm1446_vm1, 0.0, %v2663_v16  ;;  %v2747_v61 = vrot.slane %v2727_v27, 4  ;;  %v2682_v39 = vsel %vm1446_vm1, %v2608_v50, %v2681_v21 }
 0x730   : > { %v2738_v33 = vperm.slane %v2734_v29, %v4861_v41  ;;  %v2740_v36 = vsel %vm1446_vm1, %v2739_v14, %v2664_v32  ;;  %v2690_v53 = vperm.slane %v2682_v39, %v4861_v41  ;;  %v2691_v37 = vrot.slane %v2686_v31, 4 }
 0x731   : > { %v2694_v13 = vsel %vm1446_vm1, %v2686_v31, %v2693_v2  ;;  %v2744_v62 = vperm.slane %v2740_v36, %v4861_v41  ;;  %v2745_v58 = vrot.slane %v2733_v8, 4  ;;  %v2748_v35 = vsel %vm1446_vm1, %v2733_v8, %v2747_v61 }
 0x732   : > { %v2702_v4 = vperm.slane %v2694_v13, %v4875_v63  ;;  %v2759_v22 = vrot.slane %v2738_v33, 4  ;;  %v2692_v49 = vsel %vm1446_vm1, %v2691_v37, %v2674_v17  ;;  %v2703_v46 = vrot.slane %v2690_v53, 4 }
 0x733   : > { %v2706_v20 = vsel %vm1446_vm1, %v2690_v53, %v2705_v15  ;;  %v2698_v24 = vperm.slane %v2692_v49, %v4875_v63  ;;  %v2756_v5 = vperm.slane %v2748_v35, %v4875_v63  ;;  %v2746_v19 = vsel %vm1446_vm1, %v2745_v58, %v2727_v27 }
 0x734   : > { %v2714_v50 = vperm.slane %v2706_v20, %v4875_v63  ;;  %v2717_v34 = vrot.slane %v2702_v4, 4  ;;  %v2704_v18 = vsel %vm1446_vm1, %v2703_v46, %v2678_v54  ;;  %v2760_v45 = vsel %vm1446_vm1, %v2744_v62, %v2759_v22 }
 0x735   : > { %v2710_v51 = vperm.slane %v2704_v18, %v4875_v63  ;;  %v2715_v60 = vrot.slane %v2698_v24, 4  ;;  %v2768_v1 = vperm.slane %v2760_v45, %v4875_v63  ;;  %v2775_v23 = vrot.slane %v2756_v5, 4 }
 0x736   : > { %v2718_v40 = vsel %vm1446_vm1, 0.0, %v2717_v34  ;;  %v2721_v56 = vrot.slane %v2714_v50, 4  ;;  %v2777_v0 = vsel %vm1446_vm1, %v2717_v34, %v2698_v24  ;;  %v2752_v2 = vperm.slane %v2746_v19, %v4875_v63 }
 0x737   : > { %v2782_v59 = vrot.slane %v2718_v40, 4  ;;  %v2716_v17 = vsel %vm1446_vm1, 0.0, %v2715_v60  ;;  %v2719_v42 = vrot.slane %v2710_v51, 4  ;;  %v2781_v26 = vperm.slane %v2777_v0, %v4861_v41  ;;  %v3558_v0 = vld [vmem:[#allocation10] sm:$0xff] }
 0x738   : > { %v2722_v25 = vsel %vm1446_vm1, 0.0, %v2721_v56  ;;  %v2788_v30 = vsel %vm1446_vm1, %v2721_v56, %v2710_v51  ;;  %v2757_v55 = vrot.slane %v2744_v62, 4  ;;  %v2773_v29 = vrot.slane %v2768_v1, 4  ;;  %v3559_v56 = vld [vmem:[#allocation10 + $0x8] sm:$0xff] }
 0x739   : > { %v2783_v28 = vsel %vm1446_vm1, %v2782_v59, %v2716_v17  ;;  %v2793_v54 = vrot.slane %v2722_v25, 4  ;;  %v2801_v11 = vrot.slane %v2781_v26, 4  ;;  %v2720_v9 = vsel %vm1446_vm1, 0.0, %v2719_v42  ;;  %2892 = vmatpush.bf16.msra.mxu3 %v3559_v56 }
 0x73a   : > { %v2787_v3 = vperm.slane %v2783_v28, %v4861_v41  ;;  %v2792_v52 = vperm.slane %v2788_v30, %v4861_v41  ;;  %v2758_v14 = vsel %vm1446_vm1, %v2757_v55, %v2738_v33  ;;  %v2776_v36 = vsel %vm1446_vm1, %v2768_v1, %v2775_v23 }
 0x73b   : > { %v2794_v44 = vsel %vm1446_vm1, %v2793_v54, %v2720_v9  ;;  %v2764_v8 = vperm.slane %v2758_v14, %v4875_v63  ;;  %v2774_v49 = vsel %vm1446_vm1, %v2773_v29, %v2756_v5  ;;  %v3823_v29 = vld [vmem:[#allocation11] ss:$0 sm:$0xff]  ;;  %v5442_v14 = vld [vmem:[%s4829_s6] sm:$0x7f] }
 0x73c   : > { %v2798_v38 = vperm.slane %v2794_v44, %v4861_v41  ;;  %v2802_v16 = vsel %vm1446_vm1, %v2787_v3, %v2801_v11  ;;  %v2813_v6 = vrot.slane %v2792_v52, 4  ;;  %v2799_v27 = vrot.slane %v2787_v3, 4 }
 0x73d   : > { %v2810_v7 = vperm.slane %v2802_v16, %v4875_v63  ;;  %v2771_v41 = vrot.slane %v2752_v2, 4  ;;  %v2769_v53 = vrot.slane %v2764_v8, 4  ;;  %2893 = vmatpush.bf16.msra.mxu3 %v3558_v0  ;;  %v1264_v56 = vperm.slane %v5442_v14, 6 }
 0x73e   : > { %v2814_v21 = vsel %vm1446_vm1, %v2798_v38, %v2813_v6  ;;  %v2800_v15 = vsel %vm1446_vm1, %v2799_v27, %v2781_v26  ;;  %v2811_v31 = vrot.slane %v2798_v38, 4 }
 0x73f   : > { %v2822_v32 = vperm.slane %v2814_v21, %v4875_v63  ;;  %v2829_v61 = vrot.slane %v2810_v7, 4  ;;  %v2806_v39 = vperm.slane %v2800_v15, %v4875_v63  ;;  %v2770_v46 = vsel %vm1446_vm1, %v2769_v53, %v2752_v2 }
 0x740   : > { %v2812_v37 = vsel %vm1446_vm1, %v2811_v31, %v2792_v52  ;;  %v2772_v58 = vsel %vm1446_vm1, %v2764_v8, %v2771_v41  ;;  %v2900_v21 = vperm.slane %v5442_v14, 2 }
 0x741   : > { %v2830_v33 = vsel %vm1446_vm1, %v2822_v32, %v2829_v61  ;;  %v2827_v13 = vrot.slane %v2822_v32, 4  ;;  %v2818_v62 = vperm.slane %v2812_v37, %v4875_v63  ;;  %v2825_v4 = vrot.slane %v2806_v39, 4  ;;  %v3822_v63 = vld [vmem:[#allocation19] ss:$0 sm:$0xff] }
 0x742   : > { %v3814_v22 = vpack.i.bf16 %v2830_v33, %v2776_v36  ;;  %v1211_v45 = vadd.f32 %v3822_v63, %v5143_v12  ;;  %v1209_v51 = vadd.f32 %v3822_v63, %v5141_v43 }
 0x743   : > { %v2828_v20 = vsel %vm1446_vm1, %v2827_v13, %v2810_v7  ;;  %v2823_v24 = vrot.slane %v2818_v62, 4  ;;  %v2826_v50 = vsel %vm1446_vm1, %v2818_v62, %v2825_v4 }
 0x744   : > { %3815 = vrot.lane.b32.xlu1 %v3814_v22, %s4428_s21  ;;  %v3809_v34 = vpack.i.bf16 %v2828_v20, %v2774_v49  ;;  %v3804_v35 = vpack.i.bf16 %v2826_v50, %v2772_v58  ;;  %v1216_v60 = vsel %vm919_vm0, %v1211_v45, 0.0  ;;  %v1213_v40 = vsel %vm919_vm0, %v1209_v51, 0.0 }
 0x745   : > { %v2824_v18 = vsel %vm1446_vm1, %v2823_v24, %v2806_v39  ;;  %vm2859_vm1 = vcmask 195584  }
 0x746   : > { %3810 = vrot.lane.b32.xlu0 %v3809_v34, %s4429_s7  ;;  %3805 = vrot.lane.b32.xlu2 %v3804_v35, %s5553_s9  ;;  %v1258_v35 = vperm.slane %v4833_v57, 5  ;;  %s5602_s9 = sld [smem:[#allocation50_spill]] }
 0x74c   : > { %s3157_s1 = scalar_lea.hbm %s5602_s9, %s3568_s8  ;;  %s4331_s7 = scalar_lea.hbm %s5602_s9, 32 }
 0x74d   : > { %s3160_s6 = sshll.u32 %s3157_s1, 4  ;;  %s3161_s6 = int_to_ptr.hbm [resolvable:$true] %s3160_s6 }
 0x76f   : > { %1217 = vadd.xlane.f32.xlu2 %v1216_v60 }
 0x770   : > { %1214 = vadd.xlane.f32.xlu0 %v1213_v40 }
 0x7a0   : > { %v3806_v59 = vpop.permute.xlu2 %3805 }
 0x7a1   : > { %v3808_v5 = vunpack.i.h.bf16 %v3806_v59  ;;  %v3807_v19 = vunpack.i.l.bf16 %v3806_v59 }
 0x7a3   : > { %v2855_v43 = vsel %vm1111_vm9, %v2770_v46, %v3807_v19  ;;  %v2856_v26 = vsel %vm1111_vm9, %v2824_v18, %v3808_v5 }
 0x7b6   : > { %v3816_v17 = vpop.permute.xlu1 %3815 }
 0x7b7   : > { %v3818_v28 = vunpack.i.h.bf16 %v3816_v17  ;;  %v3817_v30 = vunpack.i.l.bf16 %v3816_v17 }
 0x7b8   : > { %v3811_v42 = vpop.permute.xlu0 %3810 }
 0x7b9   : > { %v3813_v25 = vunpack.i.h.bf16 %v3811_v42  ;;  %v3812_v12 = vunpack.i.l.bf16 %v3811_v42 }
 0x7bb   : > { %v2857_v54 = vsel %vm2298_vm2, %v2855_v43, %v3812_v12  ;;  %v2858_v1 = vsel %vm2298_vm2, %v2856_v26, %v3813_v25 }
 0x7bc   : > { %v2860_v3 = vsel %vm2859_vm1, %v2857_v54, %v3817_v30  ;;  %v2861_v11 = vsel %vm2859_vm1, %v2858_v1, %v3818_v28  ;;  %v4431_v1 = vmov 64.0  }
 0x7bd   : > { %v2862_v9 = vpack.c.bf16 %v2861_v11, %v2860_v3 }
 0x7bf   : > { %3502 = vmatmul.msk.bf16.vlgmr.msra.gmra.mxu3 %vm919_vm0, %v2862_v9 }
 0x7e2   : > { %v1218_v52 = vpop.xlane.xlu2 %1217 }
 0x7e3   : > { %v1220_v23 = vmul.f32 %v1218_v52, %v4769_v10  ;;  %v1215_v44 = vpop.xlane.xlu0 %1214 }
 0x7e4   : > { %v1219_v2 = vmul.f32 %v1215_v44, %v4769_v10 }
 0x7e5   : > { %v1222_v55 = vsub.f32 %v1211_v45, %v1220_v23 }
 0x7e6   : > { %v1221_v38 = vsub.f32 %v1209_v51, %v1219_v2  ;;  %v1261_v51 = vperm.slane %v5442_v14, 4 }
 0x7e7   : > { %v1224_v16 = vmul.f32 %v1222_v55, %v1222_v55 }
 0x7e8   : > { %v1223_v6 = vmul.f32 %v1221_v38, %v1221_v38 }
 0x7e9   : > { %v1228_v27 = vsel %vm919_vm0, %v1224_v16, 0.0 }
 0x7ea   : > { %1229 = vadd.xlane.f32.xlu0 %v1228_v27  ;;  %v1225_v7 = vsel %vm919_vm0, %v1223_v6, 0.0 }
 0x7eb   : > { %1226 = vadd.xlane.f32.xlu1 %v1225_v7 }
 0x842   : > { %v2895_v8 = vpop.f32.mrf.mxu3 }
 0x843   : > { %v2896_v15 = vadd.f32 %v3823_v29, %v2895_v8 }
 0x845   : > { %v2901_v31 = vmul.f32 %v2900_v21, %v2896_v15 }
 0x847   : > { %v5446_v32 = vadd.f32 %v2901_v31, %v4777_v47 }
 0x849   : > { %v2911_v61 = vsel %vm919_vm0, %v5446_v32, 0.0 }
 0x84a   : > { %2912 = vadd.xlane.f32.xlu0 %v2911_v61  ;;  %v2897_v59 = vpop.f32.mrf.mxu3 }
 0x84b   : > { %v2898_v42 = vadd.f32 %v3823_v29, %v2897_v59 }
 0x84d   : > { %v2902_v26 = vmul.f32 %v2900_v21, %v2898_v42 }
 0x84f   : > { %v2904_v30 = vadd.f32 %v2902_v26, %v4779_v48 }
 0x851   : > { %v2914_v54 = vsel %vm919_vm0, %v2904_v30, 0.0 }
 0x85d   : > { %v1230_v41 = vpop.xlane.xlu0 %1229 }
 0x85e   : > { %v1232_v39 = vmul.f32 %v1230_v41, %v4769_v10  ;;  %v1227_v36 = vpop.xlane.xlu1 %1226 }
 0x85f   : > { %v1231_v53 = vmul.f32 %v1227_v36, %v4769_v10 }
 0x860   : > { %v1234_v37 = vadd.f32 1e-06, %v1232_v39 }
 0x861   : > { %v1233_v33 = vadd.f32 1e-06, %v1231_v53 }
 0x862   : > { %3876 = vrsqrt.f32 %v1234_v37  ;;  %vm1251_vm12 = vweird.f32 %v1234_v37 }
 0x863   : > { %3878 = vrsqrt.f32 %v1233_v33  ;;  %vm1241_vm14 = vweird.f32 %v1233_v33 }
 0x864   : > { %3880 = vrcp.f32 %v4431_v1 }
 0x868   : > { %v3877_v13 = vpop.eup %3876 }
 0x869   : > { %v3879_v62 = vpop.eup %3878  ;;  %v1246_v4 = vmul.f32 %v3877_v13, %v1234_v37  ;;  %vm1252_vm9 = vweird.f32 %v3877_v13 }
 0x86a   : > { %v1236_v22 = vmul.f32 %v3879_v62, %v1233_v33  ;;  %vm1242_vm2 = vweird.f32 %v3879_v62  ;;  %vm1253_vm13 = vmor %vm1251_vm12, %vm1252_vm9  ;;  %v3881_v3 = vpop.eup %3880 }
 0x86b   : > { %v1247_v49 = vmul.f32 %v3877_v13, %v1246_v4  ;;  %vm1243_vm15 = vmor %vm1241_vm14, %vm1242_vm2  ;;  %v2920_v11 = vmul.f32 64.0, %v3881_v3  ;;  %vm2924_vm3 = vweird.f32 %v3881_v3 }
 0x86c   : > { %v1237_v46 = vmul.f32 %v3879_v62, %v1236_v22 }
 0x86d   : > { %v1248_v20 = vmul.f32 0.5, %v1247_v49  ;;  %v2921_v9 = vsub.f32 1.0, %v2920_v11  ;;  %v3563_v49 = vld [vmem:[#allocation22 + $0x8] sm:$0xff] }
 0x86e   : > { %v1238_v58 = vmul.f32 0.5, %v1237_v46  ;;  %v3561_v46 = vld [vmem:[#allocation20 + $0x8] sm:$0xff]  ;;  %3022 = vmatpush.bf16.msrb.mxu0 %v3563_v49 }
 0x86f   : > { %v1249_v24 = vsub.f32 1.5, %v1248_v20  ;;  %v2922_v52 = vmul.f32 %v3881_v3, %v2921_v9  ;;  %3051 = vmatpush.bf16.msrb.mxu1 %v3561_v46 }
 0x870   : > { %v1239_v50 = vsub.f32 1.5, %v1238_v58  ;;  %v3562_v58 = vld [vmem:[#allocation22] sm:$0xff] }
 0x871   : > { %v1250_v34 = vmul.f32 %v3877_v13, %v1249_v24  ;;  %v2923_v23 = vadd.f32 %v3881_v3, %v2922_v52  ;;  %v3560_v24 = vld [vmem:[#allocation20] sm:$0xff] }
 0x872   : > { %v1240_v10 = vmul.f32 %v3879_v62, %v1239_v50  ;;  %3023 = vmatpush.bf16.msrb.mxu0 %v3562_v58 }
 0x873   : > { %v1254_v18 = vsel %vm1253_vm13, %v3877_v13, %v1250_v34  ;;  %v2925_v2 = vsel %vm2924_vm3, %v3881_v3, %v2923_v23  ;;  %3052 = vmatpush.bf16.msrb.mxu1 %v3560_v24 }
 0x874   : > { %v1256_v63 = vmul.f32 %v1254_v18, %v1222_v55  ;;  %v1244_v45 = vsel %vm1243_vm15, %v3879_v62, %v1240_v10 }
 0x875   : > { %v1255_v60 = vmul.f32 %v1244_v45, %v1221_v38 }
 0x876   : > { %v1260_v40 = vmul.f32 %v1258_v35, %v1256_v63 }
 0x877   : > { %v1259_v0 = vmul.f32 %v1258_v35, %v1255_v60 }
 0x878   : > { %v1263_v5 = vadd.f32 %v1261_v51, %v1260_v40 }
 0x879   : > { %v1262_v19 = vadd.f32 %v1261_v51, %v1259_v0  ;;  %v918_v0 = vld [vmem:[%s4725_s20] sm:$0xf]  ;;  %s3158_s20 = sshll.u32 %s904_s30, 4  ;;  %s3159_s20 = int_to_ptr.vmem [resolvable:$true] %s3158_s20 }
 0x87a   : > { %v1266_v17 = vmul.f32 %v1264_v56, %v1263_v5  ;;  %v2988_v1 = vperm.slane %v918_v0, 1  ;;  %v2980_v3 = vperm.slane %v918_v0, 0 }
 0x87b   : > { %v1265_v25 = vmul.f32 %v1264_v56, %v1262_v19 }
 0x87c   : > { %v1268_v12 = vadd.f32 %v1266_v17, %v4779_v48  ;;  %v2976_v17 = vadd.f32 1.0, %v918_v0  ;;  %v3138_v0 = vperm.slane %v5442_v14, 3 }
 0x87d   : > { %v1267_v57 = vadd.f32 %v1265_v25, %v4777_v47 }
 0x87e   : > { %v2908_v43 = vsel %vm919_vm0, %v1268_v12, 0.0 }
 0x87f   : > { %2909 = vadd.xlane.f32.xlu1 %v2908_v43  ;;  %v2905_v28 = vsel %vm919_vm0, %v1267_v57, 0.0  ;;  %v2985_v43 = vperm.slane %v2976_v17, 3 }
 0x880   : > { %2906 = vadd.xlane.f32.xlu2 %v2905_v28 }
 0x888   : > { %2915 = vadd.xlane.f32.xlu2 %v2914_v54 }
 0x8bd   : > { %v2913_v44 = vpop.xlane.xlu0 %2912 }
 0x8f2   : > { %v2910_v21 = vpop.xlane.xlu1 %2909 }
 0x8f3   : > { %v2907_v55 = vpop.xlane.xlu2 %2906 }
 0x8f4   : > { %v2917_v38 = vadd.f32 %v2913_v44, %v2907_v55 }
 0x8f6   : > { %v2926_v16 = vmul.f32 %v2925_v2, %v2917_v38 }
 0x8f8   : > { %v2930_v6 = vsub.f32 %v5446_v32, %v2926_v16  ;;  %v2928_v27 = vsub.f32 %v1267_v57, %v2926_v16  ;;  %v2977_v57 = vperm.slane %v2976_v17, 2 }
 0x8fa   : > { %v2940_v7 = vmul.f32 %v2930_v6, %v2930_v6  ;;  %v2932_v29 = vmul.f32 %v2928_v27, %v2928_v27 }
 0x8fb   : > { %v2916_v8 = vpop.xlane.xlu2 %2915 }
 0x8fc   : > { %v2918_v15 = vadd.f32 %v2916_v8, %v2910_v21  ;;  %v2942_v31 = vsel %vm919_vm0, %v2940_v7, 0.0  ;;  %v2934_v61 = vsel %vm919_vm0, %v2932_v29, 0.0  ;;  %v3565_v8 = vld [vmem:[%s5600_s24 + $0x8] sm:$0xff] }
 0x8fd   : > { %2943 = vadd.xlane.f32.xlu2 %v2942_v31  ;;  %2935 = vadd.xlane.f32.xlu1 %v2934_v61 }
 0x8fe   : > { %v2927_v41 = vmul.f32 %v2925_v2, %v2918_v15  ;;  %v3824_v15 = vld [vmem:[#allocation23] ss:$0 sm:$0xff] }
 0x900   : > { %v2929_v39 = vsub.f32 %v1268_v12, %v2927_v41  ;;  %v2931_v36 = vsub.f32 %v2904_v30, %v2927_v41 }
 0x902   : > { %v2933_v53 = vmul.f32 %v2929_v39, %v2929_v39  ;;  %v2941_v37 = vmul.f32 %v2931_v36, %v2931_v36 }
 0x904   : > { %v2937_v33 = vsel %vm919_vm0, %v2933_v53, 0.0  ;;  %v2945_v32 = vsel %vm919_vm0, %v2941_v37, 0.0 }
 0x905   : > { %2938 = vadd.xlane.f32.xlu0 %v2937_v33  ;;  %2946 = vadd.xlane.f32.xlu1 %v2945_v32 }
 0x970   : > { %v2944_v13 = vpop.xlane.xlu2 %2943  ;;  %v2936_v62 = vpop.xlane.xlu1 %2935 }
 0x971   : > { %v2948_v4 = vadd.f32 %v2944_v13, %v2936_v62 }
 0x973   : > { %v2950_v22 = vmul.f32 %v2948_v4, %v2925_v2 }
 0x975   : > { %v2952_v20 = vadd.f32 1e-06, %v2950_v22 }
 0x977   : > { %3882 = vrsqrt.f32 %v2952_v20  ;;  %vm2960_vm5 = vweird.f32 %v2952_v20 }
 0x978   : > { %v2947_v50 = vpop.xlane.xlu1 %2946  ;;  %v2939_v34 = vpop.xlane.xlu0 %2938 }
 0x979   : > { %v2949_v10 = vadd.f32 %v2947_v50, %v2939_v34 }
 0x97b   : > { %v2951_v35 = vmul.f32 %v2949_v10, %v2925_v2 }
 0x97d   : > { %v3883_v18 = vpop.eup %3882  ;;  %v2953_v63 = vadd.f32 1e-06, %v2951_v35 }
 0x97e   : > { %v2955_v45 = vmul.f32 %v3883_v18, %v2952_v20  ;;  %vm2961_vm4 = vweird.f32 %v3883_v18 }
 0x97f   : > { %3884 = vrsqrt.f32 %v2953_v63  ;;  %vm2962_vm6 = vmor %vm2960_vm5, %vm2961_vm4  ;;  %vm2970_vm8 = vweird.f32 %v2953_v63 }
 0x980   : > { %v2956_v51 = vmul.f32 %v3883_v18, %v2955_v45 }
 0x982   : > { %v2957_v60 = vmul.f32 0.5, %v2956_v51 }
 0x984   : > { %v2958_v40 = vsub.f32 1.5, %v2957_v60 }
 0x985   : > { %v3885_v56 = vpop.eup %3884 }
 0x986   : > { %v2959_v59 = vmul.f32 %v3883_v18, %v2958_v40  ;;  %v2965_v5 = vmul.f32 %v3885_v56, %v2953_v63  ;;  %vm2971_vm7 = vweird.f32 %v3885_v56 }
 0x987   : > { %vm2972_vm10 = vmor %vm2970_vm8, %vm2971_vm7 }
 0x988   : > { %v2966_v19 = vmul.f32 %v3885_v56, %v2965_v5  ;;  %v2963_v42 = vsel %vm2962_vm6, %v3883_v18, %v2959_v59 }
 0x989   : > { %v2974_v26 = vmul.f32 %v2963_v42, %v2928_v27  ;;  %v2983_v28 = vmul.f32 %v2963_v42, %v2930_v6  ;;  %v3567_v6 = vld [vmem:[%s5600_s24 + $0x18] sm:$0xff]  ;;  %v3566_v27 = vld [vmem:[%s5600_s24 + $0x10] sm:$0xff] }
 0x98a   : > { %v2967_v25 = vmul.f32 0.5, %v2966_v19  ;;  %3128 = vmatpush.bf16.msrb.mxu2 %v3567_v6 }
 0x98b   : > { %v2978_v11 = vmul.f32 %v2977_v57, %v2974_v26  ;;  %v2986_v9 = vmul.f32 %v2985_v43, %v2983_v28 }
 0x98c   : > { %v2968_v12 = vsub.f32 1.5, %v2967_v25 }
 0x98d   : > { %v2989_v55 = vadd.f32 %v2988_v1, %v2986_v9  ;;  %v2981_v16 = vadd.f32 %v2980_v3, %v2978_v11 }
 0x98e   : > { %v2969_v30 = vmul.f32 %v3885_v56, %v2968_v12  ;;  %3129 = vmatpush.bf16.msrb.mxu2 %v3566_v27 }
 0x990   : > { %v2973_v54 = vsel %vm2972_vm10, %v3885_v56, %v2969_v30  ;;  %v3825_v56 = vld [vmem:[%s5601_s10] ss:$0 sm:$0xff]  ;;  %s4325_s10 = sshra.s32 %s3161_s6, 4  ;;  %s4326_s10 = int_to_ptr.hbm [resolvable:$true] %s4325_s10 }
 0x991   : > { %v2975_v52 = vmul.f32 %v2973_v54, %v2929_v39  ;;  %v2984_v23 = vmul.f32 %v2973_v54, %v2931_v36  ;;  %v3564_v39 = vld [vmem:[%s5600_s24] sm:$0xff]  ;;  %s4327_s3 = scalar_lea.hbm %s4326_s10, 16  ;;  %p4332_p8 = scmp.lt.s32.totalorder %s4326_s10, %s5602_s9 }
 0x992   : > { %3130 = vmatpush.bf16.msrb.mxu2 %v3565_v8  ;;  %p4328_p1 = scmp.ne.s32.totalorder %s4326_s10, %s4327_s3  ;;  %p4333_p7 = scmp.lt.s32.totalorder %s4331_s7, %s4327_s3 }
 0x993   : > { %v2979_v44 = vmul.f32 %v2977_v57, %v2975_v52  ;;  %v2987_v2 = vmul.f32 %v2985_v43, %v2984_v23 }
 0x994   : > { %p4329_p4 = pnand %p4328_p1, %p4690_p13  ;;  %p4334_p9 = por %p4333_p7, %p4332_p8 }
 0x995   : > { %v2990_v38 = vadd.f32 %v2988_v1, %v2987_v2  ;;  %v2982_v7 = vadd.f32 %v2980_v3, %v2979_v44 }
 0x996   : > { %3131 = vmatpush.bf16.msrb.mxu2 %v3564_v39  ;;  %p4330_p12 = pneg %p4329_p4 }
 0x997   : > { %v2996_v29 = vpack.c.bf16 %v2990_v38, %v2989_v55  ;;  %v2991_v21 = vpack.c.bf16 %v2982_v7, %v2981_v16 }
 0x998   : > { %p4335_p10 = pnand %p4334_p9, %p4330_p12 }
 0x999   : > { %3511 = vmatmul.msk.bf16.vlgmr.msrb.gmra.mxu0 %vm919_vm0, %v2996_v29  ;;  %3520 = vmatmul.msk.bf16.vlgmr.msrb.gmra.mxu1 %vm919_vm0, %v2991_v21 }
 0xa16   : > { %v3025_v31 = vpop.f32.mrf.mxu0  ;;  %v3054_v61 = vpop.f32.mrf.mxu1 }
 0xa17   : > { %v3055_v41 = vadd.f32 %v3054_v61, %v3025_v31 }
 0xa19   : > { %v3063_v36 = vadd.f32 %v3824_v15, %v3055_v41 }
 0xa1b   : > { %v3067_v53 = vmul.f32 0.044715, %v3063_v36  ;;  %v3065_v18 = vmul.f32 0.5, %v3063_v36 }
 0xa1d   : > { %v3069_v37 = vmul.f32 %v3067_v53, %v3063_v36 }
 0xa1e   : > { %v3027_v33 = vpop.f32.mrf.mxu0  ;;  %v3056_v32 = vpop.f32.mrf.mxu1 }
 0xa1f   : > { %v3071_v13 = vmul.f32 %v3069_v37, %v3063_v36  ;;  %v3057_v62 = vadd.f32 %v3056_v32, %v3027_v33 }
 0xa21   : > { %v3073_v4 = vadd.f32 %v3071_v13, %v3063_v36  ;;  %v3064_v22 = vadd.f32 %v3824_v15, %v3057_v62 }
 0xa23   : > { %v3068_v49 = vmul.f32 0.044715, %v3064_v22  ;;  %v3075_v46 = vmul.f32 0.7978846, %v3073_v4  ;;  %v3066_v63 = vmul.f32 0.5, %v3064_v22 }
 0xa25   : > { %v3070_v20 = vmul.f32 %v3068_v49, %v3064_v22  ;;  %3886 = vtanh.f32 %v3075_v46 }
 0xa27   : > { %v3072_v58 = vmul.f32 %v3070_v20, %v3064_v22 }
 0xa29   : > { %v3074_v24 = vadd.f32 %v3072_v58, %v3064_v22 }
 0xa2b   : > { %v3076_v50 = vmul.f32 0.7978846, %v3074_v24  ;;  %v3887_v34 = vpop.eup %3886 }
 0xa2c   : > { %v3079_v10 = vadd.f32 1.0, %v3887_v34 }
 0xa2d   : > { %3888 = vtanh.f32 %v3076_v50 }
 0xa2e   : > { %v3081_v51 = vmul.f32 %v3079_v10, %v3065_v18 }
 0xa33   : > { %v3889_v35 = vpop.eup %3888 }
 0xa34   : > { %v3080_v45 = vadd.f32 1.0, %v3889_v35 }
 0xa36   : > { %v3082_v60 = vmul.f32 %v3080_v45, %v3066_v63 }
 0xa38   : > { %v3083_v40 = vpack.c.bf16 %v3082_v60, %v3081_v51 }
 0xa3a   : > { %3537 = vmatmul.msk.bf16.vlgmr.msrb.gmra.mxu2 %vm3120_vm11, %v3083_v40 }
 0xabd   : > { %v3133_v59 = vpop.f32.mrf.mxu2 }
 0xabe   : > { %v3134_v5 = vadd.f32 %v3825_v56, %v3133_v59 }
 0xac0   : > { %v3139_v19 = vmul.f32 %v3138_v0, %v3134_v5 }
 0xac2   : > { %v3141_v17 = vadd.f32 %v3139_v19, %v4777_v47 }
 0xac4   : > { %3143 = vst.msk [vmem:[%s904_s30] sm:$0xff] %vm919_vm0, %v3141_v17 }
 0xac5   : > { %v3135_v42 = vpop.f32.mrf.mxu2 }
 0xac6   : > { %v3136_v25 = vadd.f32 %v3825_v56, %v3135_v42 }
 0xac8   : > { %v3140_v14 = vmul.f32 %v3138_v0, %v3136_v25 }
 0xaca   : > { %v3142_v12 = vadd.f32 %v3140_v14, %v4779_v48 }
 0xacc   : > { %3144 = vst.msk [vmem:[%s904_s30 + $0x8] sm:$0xff] %vm919_vm0, %v3142_v12 }
 0xacd   : > { %4338 = shalt.err (!%p4335_p10)
}
 0xace   : > { %s4432_s23 = smov 128   ;;  %s5603_s30 = smov 8  }
 0xacf   : > { %3623 = dma.vmem_to_hbm [thread:$0]  (%p4690_p13), %s3159_s20, 256, %s3161_s6, %s3146_s0, %s4432_s23, %s4432_s23, %s5603_s30  }
 0xad0 PF: > { %s3175_s11 = sand.u32 1, %s4393_s2   ;;  %p5604_p11 = scmp.ge.s32.totalorder %s4405_s27, 2 }
 0xad1   : > { %s3176_s4 = scalar_lea.sflag [#allocation4], %s3175_s11 }
 0xad2   : > { %p3670_p0 = pnand %p5604_p11, %p4695_p5 }
 0xad4   : > { %p3671_p2 = pneg %p3670_p0 }
 0xad6   : > { %4388 = dma.done.wait (%p3671_p2), %s3176_s4, 256  }
 0xad7   : > { %4390 = vsyncadd (%p3671_p2), %s3176_s4, 4294967040  ;;  %p41_p6 = scmp.ge.s32.totalorder %s4670_s28, 4   ;;  %s5605_s2 = smov %s4397_s25 }
 0xad8   : > { %s5606_s25 = smov %s4401_s26  ;;  %s5607_s26 = smov %s4682_s29 }
 0xad9   : > { %s5608_s27 = smov %s4670_s28  ;;  %43 = sbr.rel (!%p41_p6) target bundleno = 28 (0x1c), region = 207 }
 0xade   :  { %3182 = vsyncpa [#allocation3], 1 }
 0xadf   :  { %3184 = vsyncpa [#allocation3 + $0x1], 1 }
 0xae0   :  { %3185 = vsyncpa [#allocation6], 1 }
 0xae1   :  { %3186 = vsyncpa [#allocation9], 1 }
 0xae2   :  { %3187 = vsyncpa [#allocation12], 1 }
 0xae3   :  { %3188 = vsyncpa [#allocation15], 1 }
 0xae4   :  { %3189 = vsyncpa [#allocation18], 1 }
 0xae5   :  { %3190 = vsyncpa [#allocation21], 1 }
 0xae6   :  { %3191 = vsyncpa [#allocation24], 1 }
 0xae7   :  { %3192 = vsyncpa [#allocation4], 1 }
 0xae8   :  { %3194 = vsyncpa [#allocation4 + $0x1], 1 }

</bundles_post_ra>
